<compile_context>
chip_gen: v7x
topology: tpu7x:2x2x1
jax: 0.10.0
libtpu: 0.0.40
codegen_flags: <defaults>
</compile_context>

<pallas_src>
import functools

import jax
import jax.numpy as jnp
from jax.experimental import pallas as pl
from jax.experimental.pallas import tpu as pltpu


def _round_up(x, m):
    return (x + m - 1) // m * m


def _device_kind():
    try:
        return jax.devices()[0].device_kind.lower()
    except Exception:
        return ""


def _vmem_capacity_bytes(kind):
    try:
        return int(pltpu.get_tpu_info().vmem_capacity_bytes)
    except Exception:
        return (64 if "v7" in kind else 128) * 1024 * 1024


# ---------------------------------------------------------------------------
# Fused Pallas kernel: all SAGE layers + shared LayerNorm (+ReLU) + final Linear
# ---------------------------------------------------------------------------
def fused_sage_kernel(a_ref, d_ref, x_hbm_ref, w_ref, b_ref, g_ref, bt_ref,
                      wf_ref, bf_ref, o_ref, act_ref, x_sem, *, n_pad, tm,
                      hidden, a_resident, split_lin, eps):
    l = pl.program_id(0)                  # layer index (outer, sequential)
    i = pl.program_id(1)                  # node-row tile (inner, sequential)
    num_layers = pl.num_programs(0)

    row0 = pl.multiple_of(i * tm, 128)
    read_off = pl.multiple_of(((l + 1) % 2) * n_pad, 128)   # prev activations
    write_off = pl.multiple_of((l % 2) * n_pad, 128)        # this layer's out

    # One-time: DMA the padded bf16 input features HBM -> ping-pong slot 1
    # (the "layer -1" activations).  No resident X block, no vreg slab copy.
    @pl.when(jnp.logical_and(l == 0, i == 0))
    def _():
        cp = pltpu.make_async_copy(
            x_hbm_ref, act_ref.at[pl.ds(n_pad, n_pad), :], x_sem)
        cp.start()
        cp.wait()

    # Previous-layer activations: all nodes (aggregation) + this tile's rows.
    x_prev = act_ref[pl.ds(read_off, n_pad), :]                            # [n_pad, P]
    x_self = act_ref[pl.ds(pl.multiple_of(read_off + row0, 128), tm), :]   # [tm, P]

    if a_resident:
        a_cnt = a_ref[pl.ds(row0, tm), :]        # int8 counts, whole A in VMEM
    else:
        a_cnt = a_ref[...]                       # streamed (tm, n_pad) tile
    # int8 count tile -> bf16 via guaranteed-supported casts (VPU, hidden
    # under the O(tm * n_pad * P) MXU work).
    a_bf = a_cnt.astype(jnp.int32).astype(jnp.float32).astype(jnp.bfloat16)

    # Sum over incoming neighbours (MXU, f32 acc), then exact mean via the
    # per-row 1/deg scale.
    agg = jnp.dot(a_bf, x_prev, preferred_element_type=jnp.float32)
    agg = agg * d_ref[...]                       # [tm, P] * [tm, 1]
    agg_bf = agg.astype(jnp.bfloat16)

    P = w_ref.shape[1]
    if split_lin:
        # v5e: 4x128x128 MXU -> K=2P buys nothing; skip the concat re-pack.
        h = (jnp.dot(agg_bf, w_ref[pl.ds(0, P), :],
                     preferred_element_type=jnp.float32)
             + jnp.dot(x_self, w_ref[pl.ds(P, P), :],
                       preferred_element_type=jnp.float32)
             + b_ref[...])
    else:
        # v6e/v7x: one fused MXU matmul with K = 2P fills the 256-deep MXU.
        cat = jnp.concatenate([agg_bf, x_self], axis=-1)                   # [tm, 2P]
        h = jnp.dot(cat, w_ref[...], preferred_element_type=jnp.float32) + b_ref[...]

    # LayerNorm over the real `hidden` channels, single pass.  Padded lanes of
    # h are exactly zero (zero-padded weights/bias), so plain sums over the
    # padded 128-wide axis divided by `hidden` are the exact statistics.
    inv_h = 1.0 / float(hidden)
    mean = jnp.sum(h, axis=-1, keepdims=True) * inv_h
    ex2 = jnp.sum(h * h, axis=-1, keepdims=True) * inv_h
    var = jnp.maximum(ex2 - mean * mean, 0.0)
    hn = (h - mean) * jax.lax.rsqrt(var + eps)
    hn = hn * g_ref[...] + bt_ref[...]           # padded gamma/beta are zero

    # ReLU after every SAGE layer except the last (num_layers == 1 keeps the
    # ReLU), matching the PyTorch forward.  Dropout: inference identity.
    relu_here = jnp.logical_or(l == 0, l < num_layers - 1)
    thr = jnp.where(relu_here, 0.0, -jnp.inf).astype(jnp.float32)
    hn = jnp.maximum(hn, thr)

    hn_bf = hn.astype(jnp.bfloat16)
    act_ref[pl.ds(pl.multiple_of(write_off + row0, 128), tm), :] = hn_bf

    # Final nn.Linear fused into the last layer's step (lane-dense store).
    @pl.when(l == num_layers - 1)
    def _():
        out = jnp.dot(hn_bf, wf_ref[...], preferred_element_type=jnp.float32)
        o_ref[...] = (out + bf_ref[...]).astype(o_ref.dtype)


# ---------------------------------------------------------------------------
# Plain-JAX glue
# ---------------------------------------------------------------------------
def build_mean_adjacency_parts(edge_index, num_nodes):
    """Edge-count matrix C[i, j] = #edges j -> i (duplicates with multiplicity)
    and per-row inverse in-degree, so mean aggregation = diag(1/deg) @ C."""
    src, dst = edge_index[0], edge_index[1]
    counts = jnp.zeros((num_nodes, num_nodes), jnp.float32)
    counts = counts.at[dst, src].add(1.0)
    deg = counts.sum(axis=1, keepdims=True)
    inv_deg = 1.0 / jnp.maximum(deg, 1.0)
    return counts, inv_deg


def sage_model_forward(params, x, edge_index, *, tm=None,
                       a_vmem_budget_bytes=None):
    """Full GraphSAGE forward pass in ONE pallas_call."""
    N, in_ch = x.shape
    convs = params["conv"]
    num_layers = len(convs)
    hidden = convs[0]["lin_l_w"].shape[0]
    out_ch = params["fc_w"].shape[0]

    f32, bf16 = jnp.float32, jnp.bfloat16
    kind = _device_kind()
    phys_vmem = _vmem_capacity_bytes(kind)
    split_lin = "v5" in kind                # v5e/v5p: 128-deep MXU

    # ---- padded (lane-dense) sizes -----------------------------------------
    P = _round_up(max(in_ch, hidden), 128)   # shared activation channel width
    OP = _round_up(out_ch, 128)              # final output channel width
    n_pad = _round_up(N, 128)

    # ---- generation-aware A residency (int8 counts: n_pad^2 bytes) ---------
    act_bytes = 2 * n_pad * P * 2                               # ping-pong scratch
    w_bytes = 2 * (2 * P * P * 2 + P * 4) + P * OP * 2 + OP * 4 + 2 * P * 4
    if a_vmem_budget_bytes is None:
        # ~45% of physical VMEM minus the always-resident pieces: ~50 MiB on
        # v5e/v6e, ~20 MiB on v7x (64 MiB VMEM), per the streamed-A roofline.
        a_vmem_budget_bytes = max(4 << 20,
                                  int(phys_vmem * 0.45) - act_bytes - w_bytes)
    a_resident = (n_pad * n_pad) <= a_vmem_budget_bytes

    # ---- row tile -----------------------------------------------------------
    if tm is None:
        tm = 256
    tm = min(max(tm, 128), n_pad)
    if tm % 128 != 0 or n_pad % tm != 0:
        tm = 128
    if (not a_resident) and 2 * tm * n_pad > (16 << 20):
        tm = 128                          # keep streamed-A double buffers modest
    n_tiles = n_pad // tm

    # ---- pack operands (zero padding -> padded lanes never contribute) -----
    counts, inv_deg = build_mean_adjacency_parts(edge_index, N)
    # TODO(synk): promote counts to bf16 if any edge multiplicity exceeds 127.
    counts_i8 = jnp.minimum(counts, 127.0)
    A_p = jnp.zeros((n_pad, n_pad), f32).at[:N, :N].set(counts_i8).astype(jnp.int8)
    D_p = jnp.ones((n_pad, 1), f32).at[:N, :].set(inv_deg)
    X_p = jnp.zeros((n_pad, P), f32).at[:N, :in_ch].set(x).astype(bf16)

    W_all = jnp.zeros((num_layers, 2 * P, P), f32)
    b_all = jnp.zeros((num_layers, 1, P), f32)
    for li, c in enumerate(convs):
        cin_l = c["lin_l_w"].shape[1]
        W_all = W_all.at[li, :cin_l, :hidden].set(c["lin_l_w"].T)
        W_all = W_all.at[li, P:P + cin_l, :hidden].set(c["lin_r_w"].T)
        b_all = b_all.at[li, 0, :hidden].set(c["lin_l_b"])
    W_all = W_all.astype(bf16)

    gamma = jnp.zeros((1, P), f32).at[0, :hidden].set(params["ln_gamma"])
    beta = jnp.zeros((1, P), f32).at[0, :hidden].set(params["ln_beta"])
    Wf = jnp.zeros((P, OP), f32).at[:hidden, :out_ch].set(params["fc_w"].T).astype(bf16)
    bf_ = jnp.zeros((1, OP), f32).at[0, :out_ch].set(params["fc_b"])

    last_layer = num_layers - 1
    kern = functools.partial(fused_sage_kernel, n_pad=n_pad, tm=tm,
                             hidden=hidden, a_resident=a_resident,
                             split_lin=split_lin, eps=1e-5)

    def _run(use_buffered):
        def const_spec(shape):
            imap = lambda l, i: (0,) * len(shape)
            if use_buffered:
                return pl.BlockSpec(shape, imap, pipeline_mode=pl.Buffered(1))
            return pl.BlockSpec(shape, imap)

        if a_resident:
            a_spec = const_spec((n_pad, n_pad))          # read from HBM once
            a_bufs = 1 if use_buffered else 2
            a_block_bytes = n_pad * n_pad
        else:
            a_spec = pl.BlockSpec((tm, n_pad), lambda l, i: (i, 0))
            a_bufs = 2
            a_block_bytes = tm * n_pad

        const_bufs = 1 if use_buffered else 2
        vmem_est = (a_bufs * a_block_bytes
                    + 2 * (2 * P * P * 2 + P * 4)               # W / b (per layer)
                    + const_bufs * (P * OP * 2 + OP * 4 + 2 * P * 4)
                    + 2 * tm * 4                                # 1/deg tiles
                    + 2 * tm * OP * 4                           # output tile
                    + act_bytes)                                # act scratch
        vmem_limit = int(min(phys_vmem - (2 << 20),
                             max(32 << 20, vmem_est * 3 // 2)))

        out_pad = pl.pallas_call(
            kern,
            out_shape=jax.ShapeDtypeStruct((n_pad, OP), f32),
            grid=(num_layers, n_tiles),
            in_specs=[
                a_spec,                                                   # A counts
                pl.BlockSpec((tm, 1), lambda l, i: (i, 0)),               # 1/deg
                pl.BlockSpec(memory_space=pl.ANY),                        # X (HBM)
                pl.BlockSpec((None, 2 * P, P), lambda l, i: (l, 0, 0)),   # W per layer
                pl.BlockSpec((None, 1, P), lambda l, i: (l, 0, 0)),       # b per layer
                const_spec((1, P)),                                       # LN gamma
                const_spec((1, P)),                                       # LN beta
                const_spec((P, OP)),                                      # final W
                const_spec((1, OP)),                                      # final b
            ],
            # Intermediate layers never write HBM: the output block index only
            # advances while the final layer runs, so each block is written
            # exactly once, after the kernel has initialized it.
            out_specs=pl.BlockSpec(
                (tm, OP), lambda l, i: (jnp.where(l == last_layer, i, 0), 0)),
            scratch_shapes=[pltpu.VMEM((2 * n_pad, P), bf16),   # act ping-pong
                            pltpu.SemaphoreType.DMA],           # X staging DMA
            compiler_params=pltpu.CompilerParams(
                # Layer l+1 of ANY row tile reads layer l of ALL row tiles from
                # the shared VMEM scratch, so both axes must stay sequential.
                # TODO(synk): on v7x shard the row axis across the 2 TensorCores
                # (VMEM_SHARED activations + core_barrier per layer).
                dimension_semantics=("arbitrary", "arbitrary"),
                vmem_limit_bytes=vmem_limit),
        )(A_p, D_p, X_p, W_all, b_all, gamma, beta, Wf, bf_)
        return jax.block_until_ready(out_pad)

    try:
        out_pad = _run(use_buffered=True)
    except Exception:
        # Fallback for jax versions without BlockSpec(pipeline_mode=...).
        out_pad = _run(use_buffered=False)

    return out_pad[:N, :out_ch]


# ---------------------------------------------------------------------------
# Deterministic parameter init (PyTorch layout) + pure-JAX f32 reference
# ---------------------------------------------------------------------------
def init_params(key, in_channels, hidden_channels, out_channels, num_layers):
    keys = jax.random.split(key, 3 * num_layers + 2)
    ki = iter(keys)

    def w(k, fan_out, fan_in):
        return jax.random.normal(k, (fan_out, fan_in), jnp.float32) * 0.1

    convs = []
    cin = in_channels
    for _ in range(num_layers):
        convs.append(dict(
            lin_l_w=w(next(ki), hidden_channels, cin),
            lin_r_w=w(next(ki), hidden_channels, cin),
            lin_l_b=jax.random.normal(next(ki), (hidden_channels,), jnp.float32) * 0.1,
        ))
        cin = hidden_channels
    return dict(
        conv=convs,
        ln_gamma=jnp.ones((hidden_channels,), jnp.float32),
        ln_beta=jnp.zeros((hidden_channels,), jnp.float32),
        fc_w=w(next(ki), out_channels, hidden_channels),
        fc_b=jax.random.normal(next(ki), (out_channels,), jnp.float32) * 0.1,
    )


def sage_reference(params, x, edge_index):
    """Pure-JAX f32 reference matching the PyTorch forward (dropout=identity)."""
    counts, inv_deg = build_mean_adjacency_parts(edge_index, x.shape[0])
    A = counts * inv_deg
    convs = params["conv"]
    L = len(convs)
    g, b = params["ln_gamma"], params["ln_beta"]
    h = x
    for l, c in enumerate(convs):
        agg = A @ h
        h = agg @ c["lin_l_w"].T + c["lin_l_b"] + h @ c["lin_r_w"].T
        mu = h.mean(-1, keepdims=True)
        var = ((h - mu) ** 2).mean(-1, keepdims=True)
        h = (h - mu) / jnp.sqrt(var + 1e-5) * g + b
        if l == 0 or l < L - 1:
            h = jnp.maximum(h, 0.0)
    return h @ params["fc_w"].T + params["fc_b"]


# ---------------------------------------------------------------------------
if __name__ == "__main__":
    num_nodes = 100
    in_channels = 16
    hidden_channels = 32
    out_channels = 8
    num_layers = 3
    num_edges = 400

    key = jax.random.PRNGKey(0)
    kx, ke1, ke2, kp = jax.random.split(key, 4)

    x = jax.random.normal(kx, (num_nodes, in_channels), jnp.float32)
    src = jax.random.randint(ke1, (num_edges,), 0, num_nodes, jnp.int32)
    dst = jax.random.randint(ke2, (num_edges,), 0, num_nodes, jnp.int32)
    edge_index = jnp.stack([src, dst], axis=0)  # [2, E]

    params = init_params(kp, in_channels, hidden_channels, out_channels,
                         num_layers)

    out = sage_model_forward(params, x, edge_index)
    jax.block_until_ready(out)
    assert out.shape == (num_nodes, out_channels)

    # Sanity check vs. an f32 reference (kernel uses bf16 operands, so a
    # generous tolerance over 3 layers).
    ref = sage_reference(params, x, edge_index)
    max_err = float(jnp.max(jnp.abs(out - ref)))
    assert max_err < 2e-1, f"mismatch vs f32 reference: {max_err}"

    print("KERNEL_OK")
</pallas_src>

<mosaic_0001>
module attributes {stable_mosaic.version = 11 : i64} {
  func.func @fused_sage_kernel(%arg0: i32, %arg1: i32, %arg2: memref<128x128xi8, #tpu.memory_space<vmem>>, %arg3: memref<128x1xf32, #tpu.memory_space<vmem>>, %arg4: memref<128x128xbf16, #tpu.memory_space<any>>, %arg5: memref<1x256x128xbf16, #tpu.memory_space<vmem>>, %arg6: memref<1x1x128xf32, #tpu.memory_space<vmem>>, %arg7: memref<1x128xf32, #tpu.memory_space<vmem>>, %arg8: memref<1x128xf32, #tpu.memory_space<vmem>>, %arg9: memref<128x128xbf16, #tpu.memory_space<vmem>>, %arg10: memref<1x128xf32, #tpu.memory_space<vmem>>, %arg11: memref<128x128xf32, #tpu.memory_space<vmem>>, %arg12: memref<256x128xbf16, #tpu.memory_space<vmem>>, %arg13: memref<!tpu.dma_semaphore, #tpu.memory_space<semaphore_mem>>) attributes {dimension_semantics = [#tpu.dimension_semantics<arbitrary>, #tpu.dimension_semantics<arbitrary>], iteration_bounds = array<i64: 3, 1>, scalar_prefetch = 0 : i64, scratch_operands = 2 : i64, tpu.core_type = #tpu.core_type<tc>, window_params = [{pipeline_mode = #tpu.pipeline_mode<synchronous>, transform_indices = @transform_0, window_bounds = array<i64: 128, 128>}, {transform_indices = @transform_1, window_bounds = array<i64: 128, 1>}, {}, {transform_indices = @transform_3, window_bounds = array<i64: 1, 256, 128>}, {transform_indices = @transform_4, window_bounds = array<i64: 1, 1, 128>}, {pipeline_mode = #tpu.pipeline_mode<synchronous>, transform_indices = @transform_5, window_bounds = array<i64: 1, 128>}, {pipeline_mode = #tpu.pipeline_mode<synchronous>, transform_indices = @transform_6, window_bounds = array<i64: 1, 128>}, {pipeline_mode = #tpu.pipeline_mode<synchronous>, transform_indices = @transform_7, window_bounds = array<i64: 128, 128>}, {pipeline_mode = #tpu.pipeline_mode<synchronous>, transform_indices = @transform_8, window_bounds = array<i64: 1, 128>}, {transform_indices = @transform_9, window_bounds = array<i64: 128, 128>}]} {
    %c128_i32 = arith.constant 128 : i32
    %0 = arith.muli %arg1, %c128_i32 : i32
    %1 = tpu.assume_multiple %0, 128 : i32
    %c1_i32 = arith.constant 1 : i32
    %2 = arith.addi %arg0, %c1_i32 : i32
    %c2_i32 = arith.constant 2 : i32
    %c0_i32 = arith.constant 0 : i32
    %3 = arith.cmpi eq, %c2_i32, %c0_i32 : i32
    %c1_i32_0 = arith.constant 1 : i32
    %4 = arith.select %3, %c1_i32_0, %c2_i32 : i32
    %5 = arith.remsi %2, %4 : i32
    %c0_i32_1 = arith.constant 0 : i32
    %6 = arith.cmpi ne, %5, %c0_i32_1 : i32
    %c0_i32_2 = arith.constant 0 : i32
    %7 = arith.cmpi slt, %5, %c0_i32_2 : i32
    %c0_i32_3 = arith.constant 0 : i32
    %8 = arith.cmpi slt, %4, %c0_i32_3 : i32
    %9 = arith.xori %7, %8 : i1
    %10 = arith.andi %9, %6 : i1
    %11 = arith.addi %5, %4 : i32
    %12 = arith.select %10, %11, %5 : i32
    %c128_i32_4 = arith.constant 128 : i32
    %13 = arith.muli %12, %c128_i32_4 : i32
    %14 = tpu.assume_multiple %13, 128 : i32
    %c2_i32_5 = arith.constant 2 : i32
    %c0_i32_6 = arith.constant 0 : i32
    %15 = arith.cmpi eq, %c2_i32_5, %c0_i32_6 : i32
    %c1_i32_7 = arith.constant 1 : i32
    %16 = arith.select %15, %c1_i32_7, %c2_i32_5 : i32
    %17 = arith.remsi %arg0, %16 : i32
    %c0_i32_8 = arith.constant 0 : i32
    %18 = arith.cmpi ne, %17, %c0_i32_8 : i32
    %c0_i32_9 = arith.constant 0 : i32
    %19 = arith.cmpi slt, %17, %c0_i32_9 : i32
    %c0_i32_10 = arith.constant 0 : i32
    %20 = arith.cmpi slt, %16, %c0_i32_10 : i32
    %21 = arith.xori %19, %20 : i1
    %22 = arith.andi %21, %18 : i1
    %23 = arith.addi %17, %16 : i32
    %24 = arith.select %22, %23, %17 : i32
    %c128_i32_11 = arith.constant 128 : i32
    %25 = arith.muli %24, %c128_i32_11 : i32
    %26 = tpu.assume_multiple %25, 128 : i32
    %c0_i32_12 = arith.constant 0 : i32
    %27 = arith.cmpi eq, %arg0, %c0_i32_12 : i32
    %c0_i32_13 = arith.constant 0 : i32
    %28 = arith.cmpi eq, %arg1, %c0_i32_13 : i32
    %29 = arith.andi %27, %28 : i1
    %30 = arith.extui %29 : i1 to i32
    %c0_i32_14 = arith.constant 0 : i32
    %31 = arith.cmpi ne, %30, %c0_i32_14 : i32
    scf.if %31 {
      %c128_i32_43 = arith.constant 128 : i32
      %c0_i32_44 = arith.constant 0 : i32
      %96 = tpu.memref_slice %arg12[%c128_i32_43, %c0_i32_44] : memref<256x128xbf16, #tpu.memory_space<vmem>> -> memref<128x128xbf16, #tpu.memory_space<vmem>>
      tpu.enqueue_dma source(%arg4 : memref<128x128xbf16, #tpu.memory_space<any>>) target(%96 : memref<128x128xbf16, #tpu.memory_space<vmem>>) target_semaphore(%arg13 : memref<!tpu.dma_semaphore, #tpu.memory_space<semaphore_mem>>)
      %c128_i32_45 = arith.constant 128 : i32
      %c0_i32_46 = arith.constant 0 : i32
      %97 = tpu.memref_slice %arg12[%c128_i32_45, %c0_i32_46] : memref<256x128xbf16, #tpu.memory_space<vmem>> -> memref<128x128xbf16, #tpu.memory_space<vmem>>
      tpu.wait_dma2 semaphore(%arg13 : memref<!tpu.dma_semaphore, #tpu.memory_space<semaphore_mem>>) src(%arg4 : memref<128x128xbf16, #tpu.memory_space<any>>) dst(%97 : memref<128x128xbf16, #tpu.memory_space<vmem>>)
    } else {
    }
    %32 = arith.index_cast %14 : i32 to index
    %c0 = arith.constant 0 : index
    %33 = vector.load %arg12[%32, %c0] : memref<256x128xbf16, #tpu.memory_space<vmem>>, vector<128x128xbf16>
    %34 = arith.addi %14, %1 : i32
    %35 = tpu.assume_multiple %34, 128 : i32
    %36 = arith.index_cast %35 : i32 to index
    %c0_15 = arith.constant 0 : index
    %37 = vector.load %arg12[%36, %c0_15] : memref<256x128xbf16, #tpu.memory_space<vmem>>, vector<128x128xbf16>
    %38 = arith.index_cast %1 : i32 to index
    %c0_16 = arith.constant 0 : index
    %39 = vector.load %arg2[%38, %c0_16] : memref<128x128xi8, #tpu.memory_space<vmem>>, vector<128x128xi8>
    %40 = arith.extsi %39 : vector<128x128xi8> to vector<128x128xi32>
    %41 = arith.sitofp %40 : vector<128x128xi32> to vector<128x128xf32>
    %42 = arith.truncf %41 : vector<128x128xf32> to vector<128x128xbf16>
    %cst = arith.constant dense<0.000000e+00> : vector<128x128xf32>
    %43 = tpu.matmul %42, %33, %cst {dimension_numbers = #tpu.dot_dimension_numbers<[1], [0], [0], [1], [0, 0, 1, 1], [], []>} : vector<128x128xbf16>, vector<128x128xbf16>, vector<128x128xf32> -> vector<128x128xf32>
    %c0_17 = arith.constant 0 : index
    %c0_18 = arith.constant 0 : index
    %44 = vector.load %arg3[%c0_17, %c0_18] : memref<128x1xf32, #tpu.memory_space<vmem>>, vector<128x1xf32>
    %45 = vector.broadcast %44 : vector<128x1xf32> to vector<128x128xf32>
    %46 = arith.mulf %43, %45 : vector<128x128xf32>
    %47 = arith.truncf %46 : vector<128x128xf32> to vector<128x128xbf16>
    %48 = tpu.concatenate %47, %37 in 1 : vector<128x128xbf16>, vector<128x128xbf16> -> vector<128x256xbf16>
    %c0_19 = arith.constant 0 : index
    %c0_20 = arith.constant 0 : index
    %c0_21 = arith.constant 0 : index
    %49 = vector.load %arg5[%c0_19, %c0_20, %c0_21] : memref<1x256x128xbf16, #tpu.memory_space<vmem>>, vector<1x256x128xbf16>
    %50 = vector.shape_cast %49 : vector<1x256x128xbf16> to vector<256x128xbf16>
    %cst_22 = arith.constant dense<0.000000e+00> : vector<128x128xf32>
    %51 = tpu.matmul %48, %50, %cst_22 {dimension_numbers = #tpu.dot_dimension_numbers<[1], [0], [0], [1], [0, 0, 1, 1], [], []>} : vector<128x256xbf16>, vector<256x128xbf16>, vector<128x128xf32> -> vector<128x128xf32>
    %c0_23 = arith.constant 0 : index
    %c0_24 = arith.constant 0 : index
    %c0_25 = arith.constant 0 : index
    %52 = vector.load %arg6[%c0_23, %c0_24, %c0_25] : memref<1x1x128xf32, #tpu.memory_space<vmem>>, vector<1x1x128xf32>
    %53 = vector.shape_cast %52 : vector<1x1x128xf32> to vector<1x128xf32>
    %54 = vector.broadcast %53 : vector<1x128xf32> to vector<128x128xf32>
    %55 = arith.addf %51, %54 : vector<128x128xf32>
    %cst_26 = arith.constant dense<0.000000e+00> : vector<128xf32>
    %56 = vector.multi_reduction <add>, %55, %cst_26 [1] : vector<128x128xf32> to vector<128xf32>
    %57 = vector.shape_cast %56 : vector<128xf32> to vector<128x1xf32>
    %cst_27 = arith.constant 3.125000e-02 : f32
    %58 = vector.broadcast %cst_27 : f32 to vector<128x1xf32>
    %59 = arith.mulf %57, %58 : vector<128x1xf32>
    %60 = arith.mulf %55, %55 : vector<128x128xf32>
    %cst_28 = arith.constant dense<0.000000e+00> : vector<128xf32>
    %61 = vector.multi_reduction <add>, %60, %cst_28 [1] : vector<128x128xf32> to vector<128xf32>
    %62 = vector.shape_cast %61 : vector<128xf32> to vector<128x1xf32>
    %cst_29 = arith.constant 3.125000e-02 : f32
    %63 = vector.broadcast %cst_29 : f32 to vector<128x1xf32>
    %64 = arith.mulf %62, %63 : vector<128x1xf32>
    %65 = arith.mulf %59, %59 : vector<128x1xf32>
    %66 = arith.subf %64, %65 : vector<128x1xf32>
    %cst_30 = arith.constant 0.000000e+00 : f32
    %67 = vector.broadcast %cst_30 : f32 to vector<128x1xf32>
    %68 = arith.maximumf %66, %67 : vector<128x1xf32>
    %69 = vector.broadcast %59 : vector<128x1xf32> to vector<128x128xf32>
    %70 = arith.subf %55, %69 : vector<128x128xf32>
    %cst_31 = arith.constant 9.99999974E-6 : f32
    %71 = vector.broadcast %cst_31 : f32 to vector<128x1xf32>
    %72 = arith.addf %68, %71 : vector<128x1xf32>
    %73 = math.rsqrt %72 : vector<128x1xf32>
    %74 = vector.broadcast %73 : vector<128x1xf32> to vector<128x128xf32>
    %75 = arith.mulf %70, %74 : vector<128x128xf32>
    %c0_32 = arith.constant 0 : index
    %c0_33 = arith.constant 0 : index
    %76 = vector.load %arg7[%c0_32, %c0_33] : memref<1x128xf32, #tpu.memory_space<vmem>>, vector<1x128xf32>
    %77 = vector.broadcast %76 : vector<1x128xf32> to vector<128x128xf32>
    %78 = arith.mulf %75, %77 : vector<128x128xf32>
    %c0_34 = arith.constant 0 : index
    %c0_35 = arith.constant 0 : index
    %79 = vector.load %arg8[%c0_34, %c0_35] : memref<1x128xf32, #tpu.memory_space<vmem>>, vector<1x128xf32>
    %80 = vector.broadcast %79 : vector<1x128xf32> to vector<128x128xf32>
    %81 = arith.addf %78, %80 : vector<128x128xf32>
    %c0_i32_36 = arith.constant 0 : i32
    %82 = arith.cmpi eq, %arg0, %c0_i32_36 : i32
    %c2_i32_37 = arith.constant 2 : i32
    %83 = arith.cmpi slt, %arg0, %c2_i32_37 : i32
    %84 = arith.ori %82, %83 : i1
    %cst_38 = arith.constant 0.000000e+00 : f32
    %cst_39 = arith.constant 0xFF800000 : f32
    %85 = arith.select %84, %cst_38, %cst_39 : f32
    %86 = vector.broadcast %85 : f32 to vector<128x128xf32>
    %87 = arith.maximumf %81, %86 : vector<128x128xf32>
    %88 = arith.truncf %87 : vector<128x128xf32> to vector<128x128xbf16>
    %89 = arith.addi %26, %1 : i32
    %90 = tpu.assume_multiple %89, 128 : i32
    %91 = arith.index_cast %90 : i32 to index
    %c0_40 = arith.constant 0 : index
    %92 = vector.load %arg12[%91, %c0_40] : memref<256x128xbf16, #tpu.memory_space<vmem>>, vector<128x128xbf16>
    tpu.vector_store %arg12[%91, %c0_40], %88 {strides = array<i32>} : memref<256x128xbf16, #tpu.memory_space<vmem>>, vector<128x128xbf16>,
    %c2_i32_41 = arith.constant 2 : i32
    %93 = arith.cmpi eq, %arg0, %c2_i32_41 : i32
    %94 = arith.extui %93 : i1 to i32
    %c0_i32_42 = arith.constant 0 : i32
    %95 = arith.cmpi ne, %94, %c0_i32_42 : i32
    scf.if %95 {
      %c0_43 = arith.constant 0 : index
      %c0_44 = arith.constant 0 : index
      %96 = vector.load %arg9[%c0_43, %c0_44] : memref<128x128xbf16, #tpu.memory_space<vmem>>, vector<128x128xbf16>
      %cst_45 = arith.constant dense<0.000000e+00> : vector<128x128xf32>
      %97 = tpu.matmul %88, %96, %cst_45 {dimension_numbers = #tpu.dot_dimension_numbers<[1], [0], [0], [1], [0, 0, 1, 1], [], []>} : vector<128x128xbf16>, vector<128x128xbf16>, vector<128x128xf32> -> vector<128x128xf32>
      %c0_46 = arith.constant 0 : index
      %c0_47 = arith.constant 0 : index
      %98 = vector.load %arg10[%c0_46, %c0_47] : memref<1x128xf32, #tpu.memory_space<vmem>>, vector<1x128xf32>
      %99 = vector.broadcast %98 : vector<1x128xf32> to vector<128x128xf32>
      %100 = arith.addf %97, %99 : vector<128x128xf32>
      %c0_48 = arith.constant 0 : index
      %c0_49 = arith.constant 0 : index
      %101 = vector.load %arg11[%c0_48, %c0_49] : memref<128x128xf32, #tpu.memory_space<vmem>>, vector<128x128xf32>
      tpu.vector_store %arg11[%c0_48, %c0_49], %100 {strides = array<i32>} : memref<128x128xf32, #tpu.memory_space<vmem>>, vector<128x128xf32>,
    } else {
    }
    return
  }
  func.func @transform_0(%arg0: i32, %arg1: i32) -> (i32, i32) {
    %c0_i32 = arith.constant 0 : i32
    %c0_i32_0 = arith.constant 0 : i32
    %c0_i32_1 = arith.constant 0 : i32
    return %c0_i32, %c0_i32_0 : i32, i32
  }
  func.func @transform_1(%arg0: i32, %arg1: i32) -> (i32, i32) {
    %c0_i32 = arith.constant 0 : i32
    %c0_i32_0 = arith.constant 0 : i32
    return %arg1, %c0_i32 : i32, i32
  }
  func.func @transform_3(%arg0: i32, %arg1: i32) -> (i32, i32, i32) {
    %c0_i32 = arith.constant 0 : i32
    %c0_i32_0 = arith.constant 0 : i32
    %c0_i32_1 = arith.constant 0 : i32
    return %arg0, %c0_i32, %c0_i32_0 : i32, i32, i32
  }
  func.func @transform_4(%arg0: i32, %arg1: i32) -> (i32, i32, i32) {
    %c0_i32 = arith.constant 0 : i32
    %c0_i32_0 = arith.constant 0 : i32
    %c0_i32_1 = arith.constant 0 : i32
    return %arg0, %c0_i32, %c0_i32_0 : i32, i32, i32
  }
  func.func @transform_5(%arg0: i32, %arg1: i32) -> (i32, i32) {
    %c0_i32 = arith.constant 0 : i32
    %c0_i32_0 = arith.constant 0 : i32
    %c0_i32_1 = arith.constant 0 : i32
    return %c0_i32, %c0_i32_0 : i32, i32
  }
  func.func @transform_6(%arg0: i32, %arg1: i32) -> (i32, i32) {
    %c0_i32 = arith.constant 0 : i32
    %c0_i32_0 = arith.constant 0 : i32
    %c0_i32_1 = arith.constant 0 : i32
    return %c0_i32, %c0_i32_0 : i32, i32
  }
  func.func @transform_7(%arg0: i32, %arg1: i32) -> (i32, i32) {
    %c0_i32 = arith.constant 0 : i32
    %c0_i32_0 = arith.constant 0 : i32
    %c0_i32_1 = arith.constant 0 : i32
    return %c0_i32, %c0_i32_0 : i32, i32
  }
  func.func @transform_8(%arg0: i32, %arg1: i32) -> (i32, i32) {
    %c0_i32 = arith.constant 0 : i32
    %c0_i32_0 = arith.constant 0 : i32
    %c0_i32_1 = arith.constant 0 : i32
    return %c0_i32, %c0_i32_0 : i32, i32
  }
  func.func @transform_9(%arg0: i32, %arg1: i32) -> (i32, i32) {
    %c2_i32 = arith.constant 2 : i32
    %0 = arith.cmpi eq, %arg0, %c2_i32 : i32
    %c0_i32 = arith.constant 0 : i32
    %1 = arith.select %0, %arg1, %c0_i32 : i32
    %c0_i32_0 = arith.constant 0 : i32
    %c0_i32_1 = arith.constant 0 : i32
    return %1, %c0_i32_0 : i32, i32
  }
}

module attributes {stable_mosaic.version = 11 : i64} {
  func.func @fused_sage_kernel(%arg0: i32, %arg1: i32, %arg2: memref<128x128xi8, #tpu.memory_space<vmem>>, %arg3: memref<128x1xf32, #tpu.memory_space<vmem>>, %arg4: memref<128x128xbf16, #tpu.memory_space<any>>, %arg5: memref<1x256x128xbf16, #tpu.memory_space<vmem>>, %arg6: memref<1x1x128xf32, #tpu.memory_space<vmem>>, %arg7: memref<1x128xf32, #tpu.memory_space<vmem>>, %arg8: memref<1x128xf32, #tpu.memory_space<vmem>>, %arg9: memref<128x128xbf16, #tpu.memory_space<vmem>>, %arg10: memref<1x128xf32, #tpu.memory_space<vmem>>, %arg11: memref<128x128xf32, #tpu.memory_space<vmem>>, %arg12: memref<256x128xbf16, #tpu.memory_space<vmem>>, %arg13: memref<!tpu.dma_semaphore, #tpu.memory_space<semaphore_mem>>) attributes {dimension_semantics = [#tpu.dimension_semantics<arbitrary>, #tpu.dimension_semantics<arbitrary>], iteration_bounds = array<i64: 3, 1>, scalar_prefetch = 0 : i64, scratch_operands = 2 : i64, tpu.core_type = #tpu.core_type<tc>, window_params = [{pipeline_mode = #tpu.pipeline_mode<synchronous>, transform_indices = @transform_0, window_bounds = array<i64: 128, 128>}, {transform_indices = @transform_1, window_bounds = array<i64: 128, 1>}, {}, {transform_indices = @transform_3, window_bounds = array<i64: 1, 256, 128>}, {transform_indices = @transform_4, window_bounds = array<i64: 1, 1, 128>}, {pipeline_mode = #tpu.pipeline_mode<synchronous>, transform_indices = @transform_5, window_bounds = array<i64: 1, 128>}, {pipeline_mode = #tpu.pipeline_mode<synchronous>, transform_indices = @transform_6, window_bounds = array<i64: 1, 128>}, {pipeline_mode = #tpu.pipeline_mode<synchronous>, transform_indices = @transform_7, window_bounds = array<i64: 128, 128>}, {pipeline_mode = #tpu.pipeline_mode<synchronous>, transform_indices = @transform_8, window_bounds = array<i64: 1, 128>}, {transform_indices = @transform_9, window_bounds = array<i64: 128, 128>}]} {
    %c128_i32 = arith.constant 128 : i32
    %0 = arith.muli %arg1, %c128_i32 : i32
    %1 = tpu.assume_multiple %0, 128 : i32
    %c1_i32 = arith.constant 1 : i32
    %2 = arith.addi %arg0, %c1_i32 : i32
    %c2_i32 = arith.constant 2 : i32
    %c0_i32 = arith.constant 0 : i32
    %3 = arith.cmpi eq, %c2_i32, %c0_i32 : i32
    %c1_i32_0 = arith.constant 1 : i32
    %4 = arith.select %3, %c1_i32_0, %c2_i32 : i32
    %5 = arith.remsi %2, %4 : i32
    %c0_i32_1 = arith.constant 0 : i32
    %6 = arith.cmpi ne, %5, %c0_i32_1 : i32
    %c0_i32_2 = arith.constant 0 : i32
    %7 = arith.cmpi slt, %5, %c0_i32_2 : i32
    %c0_i32_3 = arith.constant 0 : i32
    %8 = arith.cmpi slt, %4, %c0_i32_3 : i32
    %9 = arith.xori %7, %8 : i1
    %10 = arith.andi %9, %6 : i1
    %11 = arith.addi %5, %4 : i32
    %12 = arith.select %10, %11, %5 : i32
    %c128_i32_4 = arith.constant 128 : i32
    %13 = arith.muli %12, %c128_i32_4 : i32
    %14 = tpu.assume_multiple %13, 128 : i32
    %c2_i32_5 = arith.constant 2 : i32
    %c0_i32_6 = arith.constant 0 : i32
    %15 = arith.cmpi eq, %c2_i32_5, %c0_i32_6 : i32
    %c1_i32_7 = arith.constant 1 : i32
    %16 = arith.select %15, %c1_i32_7, %c2_i32_5 : i32
    %17 = arith.remsi %arg0, %16 : i32
    %c0_i32_8 = arith.constant 0 : i32
    %18 = arith.cmpi ne, %17, %c0_i32_8 : i32
    %c0_i32_9 = arith.constant 0 : i32
    %19 = arith.cmpi slt, %17, %c0_i32_9 : i32
    %c0_i32_10 = arith.constant 0 : i32
    %20 = arith.cmpi slt, %16, %c0_i32_10 : i32
    %21 = arith.xori %19, %20 : i1
    %22 = arith.andi %21, %18 : i1
    %23 = arith.addi %17, %16 : i32
    %24 = arith.select %22, %23, %17 : i32
    %c128_i32_11 = arith.constant 128 : i32
    %25 = arith.muli %24, %c128_i32_11 : i32
    %26 = tpu.assume_multiple %25, 128 : i32
    %c0_i32_12 = arith.constant 0 : i32
    %27 = arith.cmpi eq, %arg0, %c0_i32_12 : i32
    %c0_i32_13 = arith.constant 0 : i32
    %28 = arith.cmpi eq, %arg1, %c0_i32_13 : i32
    %29 = arith.andi %27, %28 : i1
    %30 = arith.extui %29 : i1 to i32
    %c0_i32_14 = arith.constant 0 : i32
    %31 = arith.cmpi ne, %30, %c0_i32_14 : i32
    scf.if %31 {
      %c128_i32_43 = arith.constant 128 : i32
      %c0_i32_44 = arith.constant 0 : i32
      %96 = tpu.memref_slice %arg12[%c128_i32_43, %c0_i32_44] : memref<256x128xbf16, #tpu.memory_space<vmem>> -> memref<128x128xbf16, #tpu.memory_space<vmem>>
      tpu.enqueue_dma source(%arg4 : memref<128x128xbf16, #tpu.memory_space<any>>) target(%96 : memref<128x128xbf16, #tpu.memory_space<vmem>>) target_semaphore(%arg13 : memref<!tpu.dma_semaphore, #tpu.memory_space<semaphore_mem>>)
      %c128_i32_45 = arith.constant 128 : i32
      %c0_i32_46 = arith.constant 0 : i32
      %97 = tpu.memref_slice %arg12[%c128_i32_45, %c0_i32_46] : memref<256x128xbf16, #tpu.memory_space<vmem>> -> memref<128x128xbf16, #tpu.memory_space<vmem>>
      tpu.wait_dma2 semaphore(%arg13 : memref<!tpu.dma_semaphore, #tpu.memory_space<semaphore_mem>>) src(%arg4 : memref<128x128xbf16, #tpu.memory_space<any>>) dst(%97 : memref<128x128xbf16, #tpu.memory_space<vmem>>)
    } else {
    }
    %32 = arith.index_cast %14 : i32 to index
    %c0 = arith.constant 0 : index
    %33 = vector.load %arg12[%32, %c0] : memref<256x128xbf16, #tpu.memory_space<vmem>>, vector<128x128xbf16>
    %34 = arith.addi %14, %1 : i32
    %35 = tpu.assume_multiple %34, 128 : i32
    %36 = arith.index_cast %35 : i32 to index
    %c0_15 = arith.constant 0 : index
    %37 = vector.load %arg12[%36, %c0_15] : memref<256x128xbf16, #tpu.memory_space<vmem>>, vector<128x128xbf16>
    %38 = arith.index_cast %1 : i32 to index
    %c0_16 = arith.constant 0 : index
    %39 = vector.load %arg2[%38, %c0_16] : memref<128x128xi8, #tpu.memory_space<vmem>>, vector<128x128xi8>
    %40 = arith.extsi %39 : vector<128x128xi8> to vector<128x128xi32>
    %41 = arith.sitofp %40 : vector<128x128xi32> to vector<128x128xf32>
    %42 = arith.truncf %41 : vector<128x128xf32> to vector<128x128xbf16>
    %cst = arith.constant dense<0.000000e+00> : vector<128x128xf32>
    %43 = tpu.matmul %42, %33, %cst {dimension_numbers = #tpu.dot_dimension_numbers<[1], [0], [0], [1], [0, 0, 1, 1], [], []>} : vector<128x128xbf16>, vector<128x128xbf16>, vector<128x128xf32> -> vector<128x128xf32>
    %c0_17 = arith.constant 0 : index
    %c0_18 = arith.constant 0 : index
    %44 = vector.load %arg3[%c0_17, %c0_18] : memref<128x1xf32, #tpu.memory_space<vmem>>, vector<128x1xf32>
    %45 = vector.broadcast %44 : vector<128x1xf32> to vector<128x128xf32>
    %46 = arith.mulf %43, %45 : vector<128x128xf32>
    %47 = arith.truncf %46 : vector<128x128xf32> to vector<128x128xbf16>
    %48 = tpu.concatenate %47, %37 in 1 : vector<128x128xbf16>, vector<128x128xbf16> -> vector<128x256xbf16>
    %c0_19 = arith.constant 0 : index
    %c0_20 = arith.constant 0 : index
    %c0_21 = arith.constant 0 : index
    %49 = vector.load %arg5[%c0_19, %c0_20, %c0_21] : memref<1x256x128xbf16, #tpu.memory_space<vmem>>, vector<1x256x128xbf16>
    %50 = vector.shape_cast %49 : vector<1x256x128xbf16> to vector<256x128xbf16>
    %cst_22 = arith.constant dense<0.000000e+00> : vector<128x128xf32>
    %51 = tpu.matmul %48, %50, %cst_22 {dimension_numbers = #tpu.dot_dimension_numbers<[1], [0], [0], [1], [0, 0, 1, 1], [], []>} : vector<128x256xbf16>, vector<256x128xbf16>, vector<128x128xf32> -> vector<128x128xf32>
    %c0_23 = arith.constant 0 : index
    %c0_24 = arith.constant 0 : index
    %c0_25 = arith.constant 0 : index
    %52 = vector.load %arg6[%c0_23, %c0_24, %c0_25] : memref<1x1x128xf32, #tpu.memory_space<vmem>>, vector<1x1x128xf32>
    %53 = vector.shape_cast %52 : vector<1x1x128xf32> to vector<1x128xf32>
    %54 = vector.broadcast %53 : vector<1x128xf32> to vector<128x128xf32>
    %55 = arith.addf %51, %54 : vector<128x128xf32>
    %cst_26 = arith.constant dense<0.000000e+00> : vector<128xf32>
    %56 = vector.multi_reduction <add>, %55, %cst_26 [1] : vector<128x128xf32> to vector<128xf32>
    %57 = vector.shape_cast %56 : vector<128xf32> to vector<128x1xf32>
    %cst_27 = arith.constant 3.125000e-02 : f32
    %58 = vector.broadcast %cst_27 : f32 to vector<128x1xf32>
    %59 = arith.mulf %57, %58 : vector<128x1xf32>
    %60 = arith.mulf %55, %55 : vector<128x128xf32>
    %cst_28 = arith.constant dense<0.000000e+00> : vector<128xf32>
    %61 = vector.multi_reduction <add>, %60, %cst_28 [1] : vector<128x128xf32> to vector<128xf32>
    %62 = vector.shape_cast %61 : vector<128xf32> to vector<128x1xf32>
    %cst_29 = arith.constant 3.125000e-02 : f32
    %63 = vector.broadcast %cst_29 : f32 to vector<128x1xf32>
    %64 = arith.mulf %62, %63 : vector<128x1xf32>
    %65 = arith.mulf %59, %59 : vector<128x1xf32>
    %66 = arith.subf %64, %65 : vector<128x1xf32>
    %cst_30 = arith.constant 0.000000e+00 : f32
    %67 = vector.broadcast %cst_30 : f32 to vector<128x1xf32>
    %68 = arith.maximumf %66, %67 : vector<128x1xf32>
    %69 = vector.broadcast %59 : vector<128x1xf32> to vector<128x128xf32>
    %70 = arith.subf %55, %69 : vector<128x128xf32>
    %cst_31 = arith.constant 9.99999974E-6 : f32
    %71 = vector.broadcast %cst_31 : f32 to vector<128x1xf32>
    %72 = arith.addf %68, %71 : vector<128x1xf32>
    %73 = math.rsqrt %72 : vector<128x1xf32>
    %74 = vector.broadcast %73 : vector<128x1xf32> to vector<128x128xf32>
    %75 = arith.mulf %70, %74 : vector<128x128xf32>
    %c0_32 = arith.constant 0 : index
    %c0_33 = arith.constant 0 : index
    %76 = vector.load %arg7[%c0_32, %c0_33] : memref<1x128xf32, #tpu.memory_space<vmem>>, vector<1x128xf32>
    %77 = vector.broadcast %76 : vector<1x128xf32> to vector<128x128xf32>
    %78 = arith.mulf %75, %77 : vector<128x128xf32>
    %c0_34 = arith.constant 0 : index
    %c0_35 = arith.constant 0 : index
    %79 = vector.load %arg8[%c0_34, %c0_35] : memref<1x128xf32, #tpu.memory_space<vmem>>, vector<1x128xf32>
    %80 = vector.broadcast %79 : vector<1x128xf32> to vector<128x128xf32>
    %81 = arith.addf %78, %80 : vector<128x128xf32>
    %c0_i32_36 = arith.constant 0 : i32
    %82 = arith.cmpi eq, %arg0, %c0_i32_36 : i32
    %c2_i32_37 = arith.constant 2 : i32
    %83 = arith.cmpi slt, %arg0, %c2_i32_37 : i32
    %84 = arith.ori %82, %83 : i1
    %cst_38 = arith.constant 0.000000e+00 : f32
    %cst_39 = arith.constant 0xFF800000 : f32
    %85 = arith.select %84, %cst_38, %cst_39 : f32
    %86 = vector.broadcast %85 : f32 to vector<128x128xf32>
    %87 = arith.maximumf %81, %86 : vector<128x128xf32>
    %88 = arith.truncf %87 : vector<128x128xf32> to vector<128x128xbf16>
    %89 = arith.addi %26, %1 : i32
    %90 = tpu.assume_multiple %89, 128 : i32
    %91 = arith.index_cast %90 : i32 to index
    %c0_40 = arith.constant 0 : index
    %92 = vector.load %arg12[%91, %c0_40] : memref<256x128xbf16, #tpu.memory_space<vmem>>, vector<128x128xbf16>
    tpu.vector_store %arg12[%91, %c0_40], %88 {strides = array<i32>} : memref<256x128xbf16, #tpu.memory_space<vmem>>, vector<128x128xbf16>,
    %c2_i32_41 = arith.constant 2 : i32
    %93 = arith.cmpi eq, %arg0, %c2_i32_41 : i32
    %94 = arith.extui %93 : i1 to i32
    %c0_i32_42 = arith.constant 0 : i32
    %95 = arith.cmpi ne, %94, %c0_i32_42 : i32
    scf.if %95 {
      %c0_43 = arith.constant 0 : index
      %c0_44 = arith.constant 0 : index
      %96 = vector.load %arg9[%c0_43, %c0_44] : memref<128x128xbf16, #tpu.memory_space<vmem>>, vector<128x128xbf16>
      %cst_45 = arith.constant dense<0.000000e+00> : vector<128x128xf32>
      %97 = tpu.matmul %88, %96, %cst_45 {dimension_numbers = #tpu.dot_dimension_numbers<[1], [0], [0], [1], [0, 0, 1, 1], [], []>} : vector<128x128xbf16>, vector<128x128xbf16>, vector<128x128xf32> -> vector<128x128xf32>
      %c0_46 = arith.constant 0 : index
      %c0_47 = arith.constant 0 : index
      %98 = vector.load %arg10[%c0_46, %c0_47] : memref<1x128xf32, #tpu.memory_space<vmem>>, vector<1x128xf32>
      %99 = vector.broadcast %98 : vector<1x128xf32> to vector<128x128xf32>
      %100 = arith.addf %97, %99 : vector<128x128xf32>
      %c0_48 = arith.constant 0 : index
      %c0_49 = arith.constant 0 : index
      %101 = vector.load %arg11[%c0_48, %c0_49] : memref<128x128xf32, #tpu.memory_space<vmem>>, vector<128x128xf32>
      tpu.vector_store %arg11[%c0_48, %c0_49], %100 {strides = array<i32>} : memref<128x128xf32, #tpu.memory_space<vmem>>, vector<128x128xf32>,
    } else {
    }
    return
  }
  func.func @transform_0(%arg0: i32, %arg1: i32) -> (i32, i32) {
    %c0_i32 = arith.constant 0 : i32
    %c0_i32_0 = arith.constant 0 : i32
    %c0_i32_1 = arith.constant 0 : i32
    return %c0_i32, %c0_i32_0 : i32, i32
  }
  func.func @transform_1(%arg0: i32, %arg1: i32) -> (i32, i32) {
    %c0_i32 = arith.constant 0 : i32
    %c0_i32_0 = arith.constant 0 : i32
    return %arg1, %c0_i32 : i32, i32
  }
  func.func @transform_3(%arg0: i32, %arg1: i32) -> (i32, i32, i32) {
    %c0_i32 = arith.constant 0 : i32
    %c0_i32_0 = arith.constant 0 : i32
    %c0_i32_1 = arith.constant 0 : i32
    return %arg0, %c0_i32, %c0_i32_0 : i32, i32, i32
  }
  func.func @transform_4(%arg0: i32, %arg1: i32) -> (i32, i32, i32) {
    %c0_i32 = arith.constant 0 : i32
    %c0_i32_0 = arith.constant 0 : i32
    %c0_i32_1 = arith.constant 0 : i32
    return %arg0, %c0_i32, %c0_i32_0 : i32, i32, i32
  }
  func.func @transform_5(%arg0: i32, %arg1: i32) -> (i32, i32) {
    %c0_i32 = arith.constant 0 : i32
    %c0_i32_0 = arith.constant 0 : i32
    %c0_i32_1 = arith.constant 0 : i32
    return %c0_i32, %c0_i32_0 : i32, i32
  }
  func.func @transform_6(%arg0: i32, %arg1: i32) -> (i32, i32) {
    %c0_i32 = arith.constant 0 : i32
    %c0_i32_0 = arith.constant 0 : i32
    %c0_i32_1 = arith.constant 0 : i32
    return %c0_i32, %c0_i32_0 : i32, i32
  }
  func.func @transform_7(%arg0: i32, %arg1: i32) -> (i32, i32) {
    %c0_i32 = arith.constant 0 : i32
    %c0_i32_0 = arith.constant 0 : i32
    %c0_i32_1 = arith.constant 0 : i32
    return %c0_i32, %c0_i32_0 : i32, i32
  }
  func.func @transform_8(%arg0: i32, %arg1: i32) -> (i32, i32) {
    %c0_i32 = arith.constant 0 : i32
    %c0_i32_0 = arith.constant 0 : i32
    %c0_i32_1 = arith.constant 0 : i32
    return %c0_i32, %c0_i32_0 : i32, i32
  }
  func.func @transform_9(%arg0: i32, %arg1: i32) -> (i32, i32) {
    %c2_i32 = arith.constant 2 : i32
    %0 = arith.cmpi eq, %arg0, %c2_i32 : i32
    %c0_i32 = arith.constant 0 : i32
    %1 = arith.select %0, %arg1, %c0_i32 : i32
    %c0_i32_0 = arith.constant 0 : i32
    %c0_i32_1 = arith.constant 0 : i32
    return %1, %c0_i32_0 : i32, i32
  }
}

</mosaic_0001>

<bundles_post_ra>
// kernel: tpu_custom_call.1
= control target key start
LH: loop header
LB: loop body
LE: loop exit
PB: predicated region body
PF: predicated region fallthrough
CT: control target
= control target key end

     0   :  { %s2900_s0 = inlined_call_operand.hbm [shape: s8[128,128], index: 0, kind: input, shape index: {}]   ;;  %s2901_s1 = inlined_call_operand.vmem [shape: f32[128,1], index: 1, kind: input, shape index: {}]   ;;  %s2902_s2 = inlined_call_operand.vmem [shape: bf16[128,128], index: 2, kind: input, shape index: {}]   ;;  %s2903_s3 = inlined_call_operand.hbm [shape: bf16[3,256,128], index: 3, kind: input, shape index: {}]   ;;  %s2904_s4 = inlined_call_operand.vmem [shape: f32[3,1,128], index: 4, kind: input, shape index: {}]   ;;  %s2905_s5 = inlined_call_operand.vmem [shape: f32[1,128], index: 5, kind: input, shape index: {}]   ;;  %s2906_s6 = inlined_call_operand.vmem [shape: f32[1,128], index: 6, kind: input, shape index: {}]   ;;  %s2907_s7 = inlined_call_operand.vmem [shape: bf16[128,128], index: 7, kind: input, shape index: {}]   ;;  %s2908_s8 = inlined_call_operand.vmem [shape: f32[1,128], index: 8, kind: input, shape index: {}]   ;;  %s2909_s9 = inlined_call_operand.hbm [shape: f32[128,128], index: 9, kind: output, shape index: {}]  }
   0x1   :  { %2915 = sst [smem:[#allocation15_spill]] %s2900_s0 }
   0x2   :  { %2916 = sst [smem:[#allocation16_spill]] %s2903_s3 }
   0x3   :  { %14 = vsyncpa [#allocation5], 0 }
   0x4   :  { %15 = vsyncpa [#allocation8], 0 }
   0x5   :  { %17 = vsyncpa [#allocation8 + $0x1], 0 }
   0x6   :  { %18 = vsyncpa [#allocation6], 0 }
   0x7   :  { %20 = vsyncpa [#allocation6 + $0x1], 0  ;;  %s2236_s30 = smov 0   ;;  %s2238_s10 = smov 0  }
   0x8   :  { %s2240_s11 = smov 0   ;;  %s2242_s12 = smov 0  }
   0x9   :  { %s2244_s13 = smov 0   ;;  %s2246_s14 = smov 0  }
   0xa LB: > { %s2914_s15 = sadd.s32 4294967295, %s2174_s14   ;;  %p105_p0 = scmp.ne.s32.totalorder %s2158_s10, %s2154_s30  ;;  %s2174_s14 = sphi %s2246_s14, %s26_s14   ;;  %s2170_s13 = sphi %s2244_s13, %s2935_s13   ;;  %s2166_s12 = sphi %s2242_s12, %s2934_s12   ;;  %s2162_s11 = sphi %s2240_s11, %s2933_s11   ;;  %s2158_s10 = sphi %s2238_s10, %s2932_s10   ;;  %s2154_s30 = sphi %s2236_s30, %s2931_s30  }
   0xb   : > { %p2269_p1 = scmp.eq.s32.totalorder %s2914_s15, 0  ;;  %p1637_p2 = scmp.ge.s32.totalorder %s2174_s14, 1 }
   0xc   : > { %p256_p3 = scmp.lt.s32.totalorder %s2174_s14, 4  ;;  %s2176_s20 = smov [#allocation4]  }
   0xd   : > { %s2917_s17 = scalar_select %p2269_p1, 1, 0 }
   0xe   : > { %p2277_p4 = por %p2269_p1, %p105_p0  ;;  %p2281_p5 = pnand %p1637_p2, %p256_p3 }
   0xf   : > { %s268_s21 = sshll.u32 %s2176_s20, 4  ;;  %s2921_s0 = sld [smem:[#allocation15_spill]]  ;;  %s269_s21 = int_to_ptr.vmem [resolvable:$true] %s268_s21 }
  0x10   : > { %s2918_s18 = scalar_select %p2277_p4, 1, 0 }
  0x11   : > { %s2919_s19 = scalar_select %p2281_p5, 1, 0 }
  0x12   : > { %p1897_p6 = pneg %p2281_p5 }
  0x14   : > { %p2289_p7 = pnand %p1897_p6, %p2269_p1 }
  0x15   : > { %s2030_s25 = scalar_lea.hbm %s2921_s0, 512 }
  0x16   : > { %p2031_p8 = scmp.ne.s32.totalorder %s2921_s0, %s2030_s25  ;;  %p2032_p9 = pneg %p2289_p7 }
  0x17   : > { %p2037_p12 = scmp.lt.u32.totalorder %s2030_s25, %s2921_s0 }
  0x18   : > { %p2033_p10 = pnand %p2032_p9, %p2031_p8 }
  0x1a   : > { %p2034_p11 = pneg %p2033_p10 }
  0x1c   : > { %p2039_p13 = pnand %p2037_p12, %p2034_p11 }
  0x1e   : > { %2042 = shalt.err (!%p2039_p13)
}
  0x1f   : > { %s2043_s30 = scalar_lea.vmem %s269_s21, 512  ;;  %p2051_p6 = scmp.lt.s32.totalorder %s269_s21, %s269_s21 }
  0x20   : > { %p2044_p0 = scmp.ne.s32.totalorder %s269_s21, %s2043_s30  ;;  %p2052_p4 = scmp.lt.s32.totalorder %s2043_s30, %s2043_s30 }
  0x22   : > { %p2046_p2 = pnand %p2044_p0, %p2032_p9  ;;  %p2053_p1 = por %p2052_p4, %p2051_p6 }
  0x24   : > { %p2047_p3 = pneg %p2046_p2 }
  0x26   : > { %p2054_p5 = pnand %p2053_p1, %p2047_p3 }
  0x28   : > { %2057 = shalt.err (!%p2054_p5)
}
  0x29   : > { %s2177_s20 = smov 128   ;;  %s2178_s23 = smov 8  }
  0x2a   : > { %1900 = dma.hbm_to_vmem [thread:$0]  (!%p2289_p7), %s2921_s0, 512, %s269_s21, [#allocation5], %s2177_s20, %s2177_s20, %s2178_s23  }
  0x2b   : > { %s38_s26 = sadd.s32 1, %s2170_s13  ;;  %s92_s27 = sadd.s32 1, %s2162_s11 }
  0x2c   : > { %p40_p1 = scmp.ge.s32.totalorder %s38_s26, 3  ;;  %p99_p4 = scmp.ne.s32.totalorder %s2162_s11, %s2158_s10 }
  0x2d   : > { %p100_p5 = scmp.eq.s32.totalorder %s2174_s14, 0  ;;  %p1910_p8 = scmp.lt.s32.totalorder %s2174_s14, 3 }
  0x2e   : > { %s2937_s26 = smov (%p40_p1, %s38_s26), 0  ;;  %s303_s28 = sand.u32 1, %s2162_s11  }
  0x2f   : > { %p101_p9 = por %p100_p5, %p99_p4  ;;  %s89_s29 = ssub.s32 %s2170_s13, %s2937_s26 }
  0x30   : > { %p90_p10 = scmp.eq.s32.totalorder %s89_s29, 0  ;;  %s1641_s30 = sshll.u32 %s303_s28, 7 }
  0x31   : > { %s1693_s22 = sshll.u32 %s2170_s13, 11  ;;  %s2922_s3 = sld [smem:[#allocation16_spill]] }
  0x32   : > { %s2322_s16 = scalar_select %p90_p10, %s2162_s11, %s92_s27  }
  0x33   : > { %s307_s23 = scalar_lea.vmem [#allocation7], %s1641_s30  ;;  %p2333_p7 = pnand %p1910_p8, %p101_p9 }
  0x34   : > { %s314_s25 = sshll.u32 %s307_s23, 4  ;;  %s2337_s27 = scalar_lea.sflag [#allocation8], %s303_s28  ;;  %s2329_s25 = int_to_ptr.vmem [resolvable:$true] %s314_s25 }
  0x35   : > { %p2060_p12 = pneg %p2333_p7 }
  0x37   : > { %s2327_s20 = scalar_lea.hbm %s2922_s3, %s1693_s22  ;;  %s2063_s21 = scalar_lea.hbm %s2922_s3, 6144 }
  0x38   : > { %s2058_s24 = scalar_lea.hbm %s2327_s20, 2048  ;;  %p2064_p2 = scmp.lt.u32.totalorder %s2327_s20, %s2922_s3 }
  0x39   : > { %p2059_p11 = scmp.ne.s32.totalorder %s2327_s20, %s2058_s24  ;;  %p2065_p3 = scmp.lt.u32.totalorder %s2063_s21, %s2058_s24 }
  0x3a   : > { %p2067_p1 = scmp.lt.u32.totalorder %s2058_s24, %s2327_s20 }
  0x3b   : > { %p2061_p13 = pnand %p2060_p12, %p2059_p11  ;;  %p2066_p6 = por %p2065_p3, %p2064_p2 }
  0x3d   : > { %p2062_p0 = pneg %p2061_p13  ;;  %p2068_p4 = por %p2067_p1, %p2066_p6 }
  0x3f   : > { %p2069_p5 = pnand %p2068_p4, %p2062_p0 }
  0x41   : > { %2072 = shalt.err (!%p2069_p5)
}
  0x42   : > { %s2073_s28 = scalar_lea.vmem %s2329_s25, 2048  ;;  %s2179_s30 = smov [#allocation7]  }
  0x43   : > { %p2074_p8 = scmp.ne.s32.totalorder %s2329_s25, %s2073_s28  ;;  %s2078_s22 = sshll.u32 %s2179_s30, 4  ;;  %s2079_s22 = int_to_ptr.vmem [resolvable:$false] %s2078_s22 }
  0x44   : > { %s2080_s15 = scalar_lea.vmem %s2079_s22, 4096  ;;  %p2081_p11 = scmp.lt.s32.totalorder %s2329_s25, %s2079_s22 }
  0x45   : > { %p2076_p9 = pnand %p2074_p8, %p2060_p12  ;;  %p2082_p13 = scmp.lt.s32.totalorder %s2080_s15, %s2073_s28 }
  0x47   : > { %p2077_p10 = pneg %p2076_p9  ;;  %p2083_p2 = por %p2082_p13, %p2081_p11 }
  0x49   : > { %p2084_p3 = pnand %p2083_p2, %p2077_p10 }
  0x4b   : > { %2087 = shalt.err (!%p2084_p3)
}
  0x4c   : > { %s2180_s24 = smov 64   ;;  %s2181_s21 = smov 4  }
  0x4d   : > { %1904 = dma.hbm_to_vmem [thread:$0]  (!%p2333_p7), %s2327_s20, 2048, %s2329_s25, %s2337_s27, %s2180_s24, %s2180_s24, %s2181_s21  }
  0x4e   : > { %p2924_p12 = scmp.ne.s32.totalorder %s2919_s19, 0 }
  0x4f   : > { %p2925_p0 = scmp.ne.s32.totalorder (!%p2924_p12), %s2917_s17, 0 }
  0x50   : > { %332 = sbr.rel (%p2924_p12) target bundleno = 1092 (0x444), region = 52 }
  0x57   : > { %2139 = dma.done.wait (%p2925_p0), [#allocation5], 512  }
  0x58   : > { %2141 = vsyncadd (%p2925_p0), [#allocation5], 4294966784  ;;  %s338_s23 = sand.u32 1, %s2158_s10   ;;  %p2926_p6 = scmp.ne.s32.totalorder %s2918_s18, 0 }
  0x59   : > { %s1646_s28 = sshll.u32 %s338_s23, 7  ;;  %s339_s30 = scalar_lea.sflag [#allocation8], %s338_s23 }
  0x5a   : > { %s2372_s22 = scalar_lea.vmem [#allocation7], %s1646_s28 }
  0x5b   : > { %2143 = dma.done.wait (%p2926_p6), %s339_s30, 2048  }
  0x5c   : > { %2145 = vsyncadd (%p2926_p6), %s339_s30, 4294965248  ;;  %p389_p7 = scmp.lt.s32.totalorder %s2166_s12, 2  ;;  %s397_s17 = sadd.s32 1, %s2166_s12 }
  0x5d   : > { %p398_p1 = scmp.lt.s32.totalorder %s397_s17, 0  ;;  %s399_s19 = ssub.s32 0, %s397_s17 }
  0x5e   : > { %s2383_s20 = scalar_select %p389_p7, %s2166_s12, 2 }
  0x5f   : > { %s1647_s25 = smin.u32 %s399_s19, %s397_s17  ;;  %s412_s21 = ssub.s32 0, %s2166_s12 }
  0x60   : > { %s391_s27 = scalar_lea.vmem %s2904_s4, %s2383_s20  ;;  %s401_s15 = sand.u32 1, %s1647_s25  }
  0x61   : > { %s402_s24 = ssub.s32 0, %s401_s15  ;;  %s1651_s23 = smin.u32 %s2166_s12, %s412_s21 }
  0x62   : > { %s2939_s24 = smov (!%p398_p1, %s402_s24), %s401_s15  ;;  %p424_p4 = scmp.eq.s32.totalorder %s2166_s12, 0 }
  0x63   : > { %p1649_p5 = scmp.lt.s32.totalorder %s2939_s24, 0  ;;  %s408_s28 = sadd.s32 2, %s2939_s24  ;;  %v463_v0 = vld [vmem:[%s2902_s2] sm:$0xff] (%p424_p4)  ;;  %v465_v1 = vld [vmem:[%s2902_s2 + $0x8] sm:$0xff] (%p424_p4)  ;;  %v467_v2 = vld [vmem:[%s2902_s2 + $0x10] sm:$0xff] (%p424_p4) }
  0x64   : > { %p411_p8 = scmp.lt.s32.totalorder %s2166_s12, 0  ;;  %s414_s30 = sand.u32 1, %s1651_s23   ;;  %464 = vst [vmem:[#allocation2 + $0x40] sm:$0xff] (%p424_p4), %v463_v0  ;;  %466 = vst [vmem:[#allocation2 + $0x48] sm:$0xff] (%p424_p4), %v465_v1  ;;  %v469_v3 = vld [vmem:[%s2902_s2 + $0x18] sm:$0xff] (%p424_p4)  ;;  %v471_v4 = vld [vmem:[%s2902_s2 + $0x20] sm:$0xff] (%p424_p4) }
  0x65   : > { %s2941_s28 = smov (!%p1649_p5, %s408_s28), %s2939_s24  ;;  %s415_s0 = ssub.s32 0, %s414_s30  ;;  %468 = vst [vmem:[#allocation2 + $0x50] sm:$0xff] (%p424_p4), %v467_v2  ;;  %v473_v5 = vld [vmem:[%s2902_s2 + $0x28] sm:$0xff] (%p424_p4)  ;;  %470 = vst [vmem:[#allocation2 + $0x58] sm:$0xff] (%p424_p4), %v469_v3  ;;  %v475_v6 = vld [vmem:[%s2902_s2 + $0x30] sm:$0xff] (%p424_p4) }
  0x66   : > { %s1650_s3 = sshll.u32 %s2941_s28, 7  ;;  %s2943_s0 = smov (!%p411_p8, %s415_s0), %s414_s30  ;;  %472 = vst [vmem:[#allocation2 + $0x60] sm:$0xff] (%p424_p4), %v471_v4  ;;  %474 = vst [vmem:[#allocation2 + $0x68] sm:$0xff] (%p424_p4), %v473_v5  ;;  %v477_v7 = vld [vmem:[%s2902_s2 + $0x38] sm:$0xff] (%p424_p4) }
  0x67   : > { %p1653_p9 = scmp.lt.s32.totalorder %s2943_s0, 0  ;;  %s421_s17 = sadd.s32 2, %s2943_s0  ;;  %476 = vst [vmem:[#allocation2 + $0x70] sm:$0xff] (%p424_p4), %v475_v6  ;;  %478 = vst [vmem:[#allocation2 + $0x78] sm:$0xff] (%p424_p4), %v477_v7 }
  0x68   : > { %429 = sbr.rel (!%p424_p4) target bundleno = 114 (0x72), region = 64 }
  0x69   : > { %s2945_s17 = smov (!%p1653_p9, %s421_s17), %s2943_s0 }
  0x6a   : > { %s1654_s19 = sshll.u32 %s2945_s17, 7 }
  0x6f   : > { %486 = vsyncadd [#allocation3], 1024 }
  0x70   : > { %2146 = dma.done.wait [#allocation3], 1024 }
  0x71   : > { %2147 = vsyncadd [#allocation3], 4294966272 }
  0x72 PF: > { %s491_s0 = sshra.s32 %s1650_s3, 4  ;;  %v2425_v8 = vld [vmem:[#allocation4] sm:$0xff]  ;;  %v2182_v10 = vmov 0   ;;  %v635_v11 = vld [vmem:[%s2901_s1 + $0x30] sm:$0xff]  ;;  %v636_v13 = vld [vmem:[%s2901_s1 + $0x38] sm:$0xff]  ;;  %p2655_p10 = por %p424_p4, %p389_p7 }
  0x73   : > { %s1656_s23 = sshll.u32 %s491_s0, 3  ;;  %v524_v9 = vunpack.c.l.s8.bf16 %v2425_v8  ;;  %1973 = vset.pattern.permute.xlu1 %v2182_v10  ;;  %1972 = vset.pattern.permute.xlu0 %v2182_v10  ;;  %v633_v12 = vld [vmem:[%s2901_s1 + $0x20] sm:$0xff]  ;;  %v634_v17 = vld [vmem:[%s2901_s1 + $0x28] sm:$0xff]  ;;  %v640_v21 = vld [vmem:[%s2901_s1 + $0x58] sm:$0xff]  ;;  %v525_v44 = vunpack.c.h.s8.bf16 %v2425_v8  ;;  %s2684_s24 = sshra.s32 %s1654_s19, 4 }
  0x74   : > { %677 = vperm.xlu1 %1973, %v635_v11   ;;  %667 = vperm.xlu0 %1972, %v633_v12   ;;  %s2437_s15 = scalar_lea.vmem [#allocation2], %s1656_s23  ;;  %v638_v18 = vld [vmem:[%s2901_s1 + $0x48] sm:$0xff]  ;;  %v637_v19 = vld [vmem:[%s2901_s1 + $0x40] sm:$0xff]  ;;  %v639_v22 = vld [vmem:[%s2901_s1 + $0x50] sm:$0xff]  ;;  %s1677_s17 = sshll.u32 %s2684_s24, 3 }
  0x75   : > { %v2440_v14 = vld [vmem:[%s2437_s15] sm:$0xff]  ;;  %v2443_v15 = vld [vmem:[%s2437_s15 + $0x8] sm:$0xff]  ;;  %v497_v16 = vld [vmem:[%s2437_s15 + $0x10] sm:$0xff]  ;;  %1807 = vmatprep.mubr.bf16.mxu0 %v524_v9  ;;  %s1253_s3 = scalar_select %p2655_p10, 0.0, -inf }
  0x76   : > { %1791 = vmatprep.subr.bf16.mxu0 %v2440_v14  ;;  %932 = vmatprep.mubr.bf16.mxu1 %v497_v16  ;;  %v2460_v20 = vld [vmem:[%s2437_s15 + $0x18] sm:$0xff]  ;;  %v2469_v23 = vld [vmem:[%s2437_s15 + $0x20] sm:$0xff]  ;;  %v630_v24 = vld [vmem:[%s2901_s1 + $0x8] sm:$0xff]  ;;  %s2708_s19 = scalar_lea.vmem [#allocation2], %s1677_s17  ;;  %p1678_p11 = scmp.ne.s32.totalorder %s2166_s12, 2 }
  0x77   : > { %1792 = vmatpush3.bf16.msra.mxu0 %v2440_v14  ;;  %v629_v25 = vld [vmem:[%s2901_s1] sm:$0xff]  ;;  %v2480_v26 = vld [vmem:[%s2437_s15 + $0x28] sm:$0xff]  ;;  %v2495_v32 = vld [vmem:[%s2437_s15 + $0x30] sm:$0xff] }
  0x78   : > { %1793 = vmatprep.subr.bf16.mxu0 %v2443_v15  ;;  %682 = vperm.xlu1 %1973, %v636_v13   ;;  %v642_v27 = vld [vmem:[%s2901_s1 + $0x68] sm:$0xff]  ;;  %v1974_v28 = vld [vmem:[%s2372_s22 + $0x40] sm:$0xff]   ;;  %v632_v33 = vld [vmem:[%s2901_s1 + $0x18] sm:$0xff] }
  0x79   : > { %672 = vperm.xlu0 %1972, %v634_v17   ;;  %v1975_v29 = vld [vmem:[%s2372_s22] sm:$0xff]   ;;  %1855 = vmatprep.subr.bf16.mxu1 %v1974_v28  ;;  %v1976_v31 = vld [vmem:[%s2372_s22 + $0x48] sm:$0xff]   ;;  %v631_v35 = vld [vmem:[%s2901_s1 + $0x10] sm:$0xff] }
  0x7a   : > { %v641_v30 = vld [vmem:[%s2901_s1 + $0x60] sm:$0xff]  ;;  %1863 = vmatpush3.bf16.msra.mxu1 %v1975_v29  ;;  %v1977_v34 = vld [vmem:[%s2372_s22 + $0x8] sm:$0xff]   ;;  %v1978_v36 = vld [vmem:[%s2372_s22 + $0x50] sm:$0xff]  }
  0x7b   : > { %1794 = vmatpush3.bf16.msra.mxu0 %v2443_v15  ;;  %1856 = vmatprep.subr.bf16.mxu1 %v1976_v31  ;;  %v2508_v37 = vld [vmem:[%s2437_s15 + $0x38] sm:$0xff]  ;;  %v1979_v39 = vld [vmem:[%s2372_s22 + $0x10] sm:$0xff]   ;;  %v521_v41 = vld [vmem:[#allocation4 + $0x8] sm:$0xff] }
  0x7c   : > { %1795 = vmatprep.subr.bf16.mxu0 %v497_v16  ;;  %692 = vperm.xlu1 %1973, %v638_v18   ;;  %v644_v38 = vld [vmem:[%s2901_s1 + $0x78] sm:$0xff]  ;;  %v643_v40 = vld [vmem:[%s2901_s1 + $0x70] sm:$0xff]  ;;  %v1982_v45 = vld [vmem:[%s2372_s22 + $0x60] sm:$0xff]   ;;  %v526_v46 = vunpack.c.l.s8.bf16 %v521_v41  ;;  %v527_v50 = vunpack.c.h.s8.bf16 %v521_v41 }
  0x7d   : > { %687 = vperm.xlu0 %1972, %v637_v19   ;;  %v1980_v42 = vld [vmem:[%s2372_s22 + $0x58] sm:$0xff]   ;;  %v1983_v47 = vld [vmem:[%s2372_s22 + $0x20] sm:$0xff]   ;;  %v1984_v48 = vld [vmem:[%s2372_s22 + $0x68] sm:$0xff]  }
  0x7e   : > { %1864 = vmatpush3.bf16.msra.mxu1 %v1977_v34  ;;  %v1981_v43 = vld [vmem:[%s2372_s22 + $0x18] sm:$0xff]   ;;  %v522_v49 = vld [vmem:[#allocation4 + $0x10] sm:$0xff]  ;;  %v1985_v51 = vld [vmem:[%s2372_s22 + $0x28] sm:$0xff]  }
  0x7f   : > { %1796 = vmatpush3.bf16.msra.mxu0 %v497_v16  ;;  %1857 = vmatprep.subr.bf16.mxu1 %v1978_v36  ;;  %v528_v52 = vunpack.c.l.s8.bf16 %v522_v49  ;;  %v1986_v53 = vld [vmem:[%s2372_s22 + $0x70] sm:$0xff]   ;;  %v523_v54 = vld [vmem:[#allocation4 + $0x18] sm:$0xff]  ;;  %v529_v55 = vunpack.c.h.s8.bf16 %v522_v49 }
  0x80   : > { %1797 = vmatprep.subr.bf16.mxu0 %v2460_v20  ;;  %702 = vperm.xlu1 %1973, %v640_v21   ;;  %v530_v56 = vunpack.c.l.s8.bf16 %v523_v54  ;;  %v531_v57 = vunpack.c.h.s8.bf16 %v523_v54  ;;  %v1987_v58 = vld [vmem:[%s2372_s22 + $0x30] sm:$0xff]   ;;  %v1988_v59 = vld [vmem:[%s2372_s22 + $0x78] sm:$0xff]  }
  0x81   : > { %697 = vperm.xlu0 %1972, %v639_v22   ;;  %v1989_v60 = vld [vmem:[%s2372_s22 + $0x38] sm:$0xff]  }
  0x82   : > { %1865 = vmatpush3.bf16.msra.mxu1 %v1979_v39 }
  0x83   : > { %1798 = vmatpush3.bf16.msra.mxu0 %v2460_v20  ;;  %1858 = vmatprep.subr.bf16.mxu1 %v1980_v42 }
  0x84   : > { %1799 = vmatprep.subr.bf16.mxu0 %v2469_v23  ;;  %652 = vperm.xlu1 %1973, %v630_v24  }
  0x85   : > { %647 = vperm.xlu0 %1972, %v629_v25  }
  0x86   : > { %1866 = vmatpush3.bf16.msra.mxu1 %v1981_v43 }
  0x87   : > { %1800 = vmatpush3.bf16.msra.mxu0 %v2469_v23  ;;  %1859 = vmatprep.subr.bf16.mxu1 %v1982_v45 }
  0x88   : > { %1801 = vmatprep.subr.bf16.mxu0 %v2480_v26  ;;  %712 = vperm.xlu1 %1973, %v642_v27  }
  0x89   : > { %707 = vperm.xlu0 %1972, %v641_v30  }
  0x8a   : > { %1867 = vmatpush3.bf16.msra.mxu1 %v1983_v47 }
  0x8b   : > { %1802 = vmatpush3.bf16.msra.mxu0 %v2480_v26  ;;  %1860 = vmatprep.subr.bf16.mxu1 %v1984_v48 }
  0x8c   : > { %1803 = vmatprep.subr.bf16.mxu0 %v2495_v32  ;;  %662 = vperm.xlu1 %1973, %v632_v33  }
  0x8d   : > { %657 = vperm.xlu0 %1972, %v631_v35  }
  0x8e   : > { %1868 = vmatpush3.bf16.msra.mxu1 %v1985_v51 }
  0x8f   : > { %1804 = vmatpush3.bf16.msra.mxu0 %v2495_v32  ;;  %1861 = vmatprep.subr.bf16.mxu1 %v1986_v53 }
  0x90   : > { %1805 = vmatprep.subr.bf16.mxu0 %v2508_v37  ;;  %722 = vperm.xlu1 %1973, %v644_v38  }
  0x91   : > { %717 = vperm.xlu0 %1972, %v643_v40  }
  0x92   : > { %1869 = vmatpush3.bf16.msra.mxu1 %v1987_v58 }
  0x93   : > { %1806 = vmatpush3.bf16.msra.mxu0 %v2508_v37  ;;  %1862 = vmatprep.subr.bf16.mxu1 %v1988_v59 }
  0x94   : > { %1711 = vmatprep.subr.bf16.mxu0 %v1974_v28 }
  0x96   : > { %1808 = vmatmul.mubr.bf16.vlgmr.msra.gmra.mrb[0].mxu0 %v525_v44  ;;  %1870 = vmatpush3.bf16.msra.mxu1 %v1989_v60 }
  0x97   : > { %1811 = vmatprep.mubr.bf16.mxu0 %v526_v46  ;;  %1712 = vmatpush3.bf16.msra.mxu0 %v1975_v29 }
  0x98   : > { %1713 = vmatprep.subr.bf16.mxu0 %v1976_v31 }
  0x9b   : > { %1714 = vmatpush3.bf16.msra.mxu0 %v1977_v34 }
  0x9c   : > { %1715 = vmatprep.subr.bf16.mxu0 %v1978_v36 }
  0x9e   : > { %1812 = vmatmul.mubr.bf16.gmra.mrb[4].mxu0 %v527_v50 }
  0x9f   : > { %1815 = vmatprep.mubr.bf16.mxu0 %v528_v52  ;;  %1716 = vmatpush3.bf16.msra.mxu0 %v1979_v39 }
  0xa0   : > { %1717 = vmatprep.subr.bf16.mxu0 %v1980_v42 }
  0xa3   : > { %1718 = vmatpush3.bf16.msra.mxu0 %v1981_v43 }
  0xa4   : > { %1719 = vmatprep.subr.bf16.mxu0 %v1982_v45 }
  0xa6   : > { %1816 = vmatmul.mubr.bf16.gmra.mrb[8].mxu0 %v529_v55 }
  0xa7   : > { %1819 = vmatprep.mubr.bf16.mxu0 %v530_v56  ;;  %1720 = vmatpush3.bf16.msra.mxu0 %v1983_v47 }
  0xa8   : > { %1721 = vmatprep.subr.bf16.mxu0 %v1984_v48 }
  0xab   : > { %1722 = vmatpush3.bf16.msra.mxu0 %v1985_v51 }
  0xac   : > { %1723 = vmatprep.subr.bf16.mxu0 %v1986_v53 }
  0xae   : > { %1820 = vmatmul.mubr.bf16.gmra.mrb[12].mxu0 %v531_v57  ;;  %v2543_v57 = vld [vmem:[%s391_s27] ss:$0 sm:$0xff] }
  0xaf   : > { %916 = vmatprep.mubr.bf16.mxu0 %v2440_v14  ;;  %1724 = vmatpush3.bf16.msra.mxu0 %v1987_v58 }
  0xb0   : > { %1725 = vmatprep.subr.bf16.mxu0 %v1988_v59 }
  0xb3   : > { %1726 = vmatpush3.bf16.msra.mxu0 %v1989_v60 }
  0xf3   : > { %v678_v61 = vpop.permute.xlu1 %677  ;;  %v668_v62 = vpop.permute.xlu0 %667 }
  0xf7   : > { %v683_v63 = vpop.permute.xlu1 %682 }
  0xf8   : > { %v673_v0 = vpop.permute.xlu0 %672 }
  0xfb   : > { %v693_v1 = vpop.permute.xlu1 %692 }
  0xfc   : > { %v688_v2 = vpop.permute.xlu0 %687 }
  0xff   : > { %v703_v3 = vpop.permute.xlu1 %702 }
 0x100   : > { %v698_v4 = vpop.permute.xlu0 %697 }
 0x103   : > { %v653_v5 = vpop.permute.xlu1 %652 }
 0x104   : > { %v648_v6 = vpop.permute.xlu0 %647 }
 0x107   : > { %v713_v7 = vpop.permute.xlu1 %712 }
 0x108   : > { %v708_v8 = vpop.permute.xlu0 %707 }
 0x10b   : > { %v663_v10 = vpop.permute.xlu1 %662 }
 0x10c   : > { %v658_v12 = vpop.permute.xlu0 %657 }
 0x10f   : > { %v723_v47 = vpop.permute.xlu1 %722 }
 0x110   : > { %v718_v49 = vpop.permute.xlu0 %717 }
 0x169   : > { %v1809_v9 = vpop.f32.mrb[0].mxu0 }
 0x16a   : > { %v566_v11 = vpop.f32.mrb[1].mxu0  ;;  %v727_v14 = vmul.f32 %v1809_v9, %v658_v12 }
 0x16b   : > { %v1810_v13 = vpop.f32.mrb[2].mxu0  ;;  %v725_v18 = vmul.f32 %v648_v6, %v566_v11 }
 0x16c   : > { %v728_v16 = vmul.f32 %v1810_v13, %v663_v10  ;;  %v569_v17 = vpop.f32.mrb[3].mxu0 }
 0x16d   : > { %v726_v19 = vmul.f32 %v653_v5, %v569_v17 }
 0x16e   : > { %v742_v21 = vpack.c.bf16 %v728_v16, %v727_v14 }
 0x16f   : > { %v741_v22 = vpack.c.bf16 %v726_v19, %v725_v18 }
 0x171   : > { %v1813_v24 = vpop.f32.mrb[4].mxu0  ;;  %917 = vmatmul.mubr.bf16.vlgmr.msra.gmra.mrb[16].mxu0 %v741_v22 }
 0x172   : > { %v582_v25 = vpop.f32.mrb[5].mxu0  ;;  %924 = vmatprep.mubr.bf16.mxu0 %v2443_v15  ;;  %v731_v28 = vmul.f32 %v1813_v24, %v678_v61 }
 0x173   : > { %v1814_v27 = vpop.f32.mrb[6].mxu0  ;;  %v729_v31 = vmul.f32 %v668_v62, %v582_v25 }
 0x174   : > { %v732_v29 = vmul.f32 %v1814_v27, %v683_v63  ;;  %v585_v30 = vpop.f32.mrb[7].mxu0 }
 0x175   : > { %v730_v33 = vmul.f32 %v673_v0, %v585_v30 }
 0x176   : > { %v744_v34 = vpack.c.bf16 %v732_v29, %v731_v28 }
 0x177   : > { %v743_v35 = vpack.c.bf16 %v730_v33, %v729_v31 }
 0x179   : > { %v1817_v36 = vpop.f32.mrb[8].mxu0  ;;  %925 = vmatmul.mubr.bf16.gmra.mrb[20].mxu0 %v742_v21  ;;  %933 = vmatmul.mubr.bf16.vlgmr.msra.gmra.mrb[0].mxu1 %v743_v35 }
 0x17a   : > { %v598_v38 = vpop.f32.mrb[9].mxu0  ;;  %940 = vmatprep.mubr.bf16.mxu1 %v2460_v20  ;;  %v735_v40 = vmul.f32 %v1817_v36, %v698_v4 }
 0x17b   : > { %v1818_v39 = vpop.f32.mrb[10].mxu0  ;;  %v733_v43 = vmul.f32 %v688_v2, %v598_v38 }
 0x17c   : > { %v736_v41 = vmul.f32 %v1818_v39, %v703_v3  ;;  %v601_v42 = vpop.f32.mrb[11].mxu0 }
 0x17d   : > { %v734_v15 = vmul.f32 %v693_v1, %v601_v42 }
 0x17e   : > { %v746_v44 = vpack.c.bf16 %v736_v41, %v735_v40 }
 0x17f   : > { %v745_v45 = vpack.c.bf16 %v734_v15, %v733_v43 }
 0x181   : > { %v1821_v46 = vpop.f32.mrb[12].mxu0  ;;  %941 = vmatmul.mubr.bf16.gmra.mrb[4].mxu1 %v744_v34 }
 0x182   : > { %v614_v48 = vpop.f32.mrb[13].mxu0  ;;  %948 = vmatprep.mubr.bf16.mxu1 %v2469_v23  ;;  %v739_v51 = vmul.f32 %v1821_v46, %v718_v49 }
 0x183   : > { %v1822_v50 = vpop.f32.mrb[14].mxu0  ;;  %v737_v53 = vmul.f32 %v708_v8, %v614_v48 }
 0x184   : > { %v740_v52 = vmul.f32 %v1822_v50, %v723_v47  ;;  %v617_v20 = vpop.f32.mrb[15].mxu0 }
 0x185   : > { %v738_v54 = vmul.f32 %v713_v7, %v617_v20 }
 0x186   : > { %v748_v55 = vpack.c.bf16 %v740_v52, %v739_v51 }
 0x187   : > { %v747_v56 = vpack.c.bf16 %v738_v54, %v737_v53 }
 0x189   : > { %949 = vmatmul.mubr.bf16.gmra.mrb[8].mxu1 %v745_v45 }
 0x18a   : > { %956 = vmatprep.mubr.bf16.mxu1 %v2480_v26 }
 0x191   : > { %957 = vmatmul.mubr.bf16.gmra.mrb[12].mxu1 %v746_v44 }
 0x192   : > { %964 = vmatprep.mubr.bf16.mxu1 %v2495_v32 }
 0x199   : > { %965 = vmatmul.mubr.bf16.gmra.mrb[16].mxu1 %v747_v56 }
 0x19a   : > { %972 = vmatprep.mubr.bf16.mxu1 %v2508_v37 }
 0x1a1   : > { %973 = vmatmul.mubr.bf16.gmra.mrb[20].mxu1 %v748_v55 }
 0x244   : > { %v1727_v23 = vpop.f32.mrb[16].mxu0 }
 0x245   : > { %v1728_v58 = vpop.f32.mrb[17].mxu0 }
 0x246   : > { %v1729_v59 = vadd.f32 %v1728_v58, %v1727_v23  ;;  %v1730_v60 = vpop.f32.mrb[18].mxu0 }
 0x247   : > { %v1731_v61 = vpop.f32.mrb[19].mxu0 }
 0x248   : > { %v2546_v26 = vadd.f32 %v1729_v59, %v2543_v57  ;;  %v1732_v62 = vadd.f32 %v1731_v61, %v1730_v60 }
 0x24a   : > { %v2549_v32 = vadd.f32 %v1732_v62, %v2543_v57  ;;  %981 = vadd.xlane.f32.xlu0 %v2546_v26  ;;  %v1029_v7 = vmul.f32 %v2546_v26, %v2546_v26 }
 0x24c   : > { %v1733_v37 = vpop.f32.mrb[20].mxu0  ;;  %v1739_v63 = vpop.f32.mrb[0].mxu1  ;;  %983 = vadd.xlane.f32.xlu1 %v2549_v32  ;;  %v1030_v0 = vmul.f32 %v2549_v32, %v2549_v32 }
 0x24d   : > { %v1734_v1 = vpop.f32.mrb[21].mxu0  ;;  %v1740_v2 = vpop.f32.mrb[1].mxu1 }
 0x24e   : > { %v1735_v3 = vadd.f32 %v1734_v1, %v1733_v37  ;;  %v1741_v4 = vadd.f32 %v1740_v2, %v1739_v63  ;;  %v1736_v5 = vpop.f32.mrb[22].mxu0  ;;  %v1742_v6 = vpop.f32.mrb[2].mxu1  ;;  %1047 = vadd.xlane.f32.xlu0 %v1030_v0 }
 0x24f   : > { %v1737_v8 = vpop.f32.mrb[23].mxu0  ;;  %v1743_v9 = vpop.f32.mrb[3].mxu1 }
 0x250   : > { %v2558_v10 = vadd.f32 %v1735_v3, %v2543_v57  ;;  %v1738_v11 = vadd.f32 %v1737_v8, %v1736_v5  ;;  %v1744_v12 = vadd.f32 %v1743_v9, %v1742_v6  ;;  %1045 = vadd.xlane.f32.xlu1 %v1029_v7  ;;  %v2561_v13 = vadd.f32 %v1741_v4, %v2543_v57 }
 0x252   : > { %985 = vadd.xlane.f32.xlu0 %v2558_v10  ;;  %v2565_v14 = vadd.f32 %v1738_v11, %v2543_v57  ;;  %v1031_v21 = vmul.f32 %v2558_v10, %v2558_v10  ;;  %v2572_v24 = vadd.f32 %v1744_v12, %v2543_v57  ;;  %v1033_v27 = vmul.f32 %v2561_v13, %v2561_v13 }
 0x254   : > { %v1745_v16 = vpop.f32.mrb[4].mxu1  ;;  %989 = vadd.xlane.f32.xlu1 %v2561_v13  ;;  %v1032_v29 = vmul.f32 %v2565_v14, %v2565_v14  ;;  %v1034_v38 = vmul.f32 %v2572_v24, %v2572_v24 }
 0x255   : > { %v1746_v17 = vpop.f32.mrb[5].mxu1 }
 0x256   : > { %v1747_v18 = vadd.f32 %v1746_v17, %v1745_v16  ;;  %v1748_v19 = vpop.f32.mrb[6].mxu1  ;;  %987 = vadd.xlane.f32.xlu0 %v2565_v14 }
 0x257   : > { %v1749_v22 = vpop.f32.mrb[7].mxu1 }
 0x258   : > { %v1750_v25 = vadd.f32 %v1749_v22, %v1748_v19  ;;  %1049 = vadd.xlane.f32.xlu1 %v1031_v21  ;;  %v2580_v31 = vadd.f32 %v1747_v18, %v2543_v57 }
 0x25a   : > { %991 = vadd.xlane.f32.xlu0 %v2572_v24  ;;  %v1035_v39 = vmul.f32 %v2580_v31, %v2580_v31  ;;  %v2588_v40 = vadd.f32 %v1750_v25, %v2543_v57 }
 0x25c   : > { %v1751_v28 = vpop.f32.mrb[8].mxu1  ;;  %1053 = vadd.xlane.f32.xlu1 %v1033_v27  ;;  %v1036_v47 = vmul.f32 %v2588_v40, %v2588_v40 }
 0x25d   : > { %v1752_v30 = vpop.f32.mrb[9].mxu1 }
 0x25e   : > { %v1753_v33 = vadd.f32 %v1752_v30, %v1751_v28  ;;  %v1754_v34 = vpop.f32.mrb[10].mxu1  ;;  %1051 = vadd.xlane.f32.xlu0 %v1032_v29 }
 0x25f   : > { %v1755_v35 = vpop.f32.mrb[11].mxu1 }
 0x260   : > { %v1756_v36 = vadd.f32 %v1755_v35, %v1754_v34  ;;  %993 = vadd.xlane.f32.xlu1 %v2580_v31  ;;  %v2591_v43 = vadd.f32 %v1753_v33, %v2543_v57 }
 0x262   : > { %1055 = vadd.xlane.f32.xlu0 %v1034_v38  ;;  %v1037_v48 = vmul.f32 %v2591_v43, %v2591_v43  ;;  %v2600_v49 = vadd.f32 %v1756_v36, %v2543_v57 }
 0x264   : > { %v1757_v41 = vpop.f32.mrb[12].mxu1  ;;  %1057 = vadd.xlane.f32.xlu1 %v1035_v39  ;;  %v1038_v56 = vmul.f32 %v2600_v49, %v2600_v49 }
 0x265   : > { %v1758_v42 = vpop.f32.mrb[13].mxu1 }
 0x266   : > { %v1759_v15 = vadd.f32 %v1758_v42, %v1757_v41  ;;  %v1760_v44 = vpop.f32.mrb[14].mxu1  ;;  %995 = vadd.xlane.f32.xlu0 %v2588_v40 }
 0x267   : > { %v1761_v45 = vpop.f32.mrb[15].mxu1 }
 0x268   : > { %v1762_v46 = vadd.f32 %v1761_v45, %v1760_v44  ;;  %997 = vadd.xlane.f32.xlu1 %v2591_v43  ;;  %v2603_v52 = vadd.f32 %v1759_v15, %v2543_v57 }
 0x26a   : > { %1059 = vadd.xlane.f32.xlu0 %v1036_v47  ;;  %v1039_v23 = vmul.f32 %v2603_v52, %v2603_v52  ;;  %v2612_v58 = vadd.f32 %v1762_v46, %v2543_v57 }
 0x26c   : > { %1061 = vadd.xlane.f32.xlu1 %v1037_v48  ;;  %v1763_v50 = vpop.f32.mrb[16].mxu1  ;;  %v1040_v1 = vmul.f32 %v2612_v58, %v2612_v58 }
 0x26d   : > { %v1764_v51 = vpop.f32.mrb[17].mxu1 }
 0x26e   : > { %v1765_v20 = vadd.f32 %v1764_v51, %v1763_v50  ;;  %999 = vadd.xlane.f32.xlu0 %v2600_v49  ;;  %v1766_v53 = vpop.f32.mrb[18].mxu1 }
 0x26f   : > { %v1767_v54 = vpop.f32.mrb[19].mxu1 }
 0x270   : > { %v1768_v55 = vadd.f32 %v1767_v54, %v1766_v53  ;;  %1001 = vadd.xlane.f32.xlu1 %v2603_v52  ;;  %v2615_v61 = vadd.f32 %v1765_v20, %v2543_v57 }
 0x272   : > { %1063 = vadd.xlane.f32.xlu0 %v1038_v56  ;;  %v1041_v2 = vmul.f32 %v2615_v61, %v2615_v61  ;;  %v2624_v3 = vadd.f32 %v1768_v55, %v2543_v57 }
 0x274   : > { %1065 = vadd.xlane.f32.xlu1 %v1039_v23  ;;  %v1769_v59 = vpop.f32.mrb[20].mxu1  ;;  %v1042_v5 = vmul.f32 %v2624_v3, %v2624_v3 }
 0x275   : > { %v1770_v60 = vpop.f32.mrb[21].mxu1 }
 0x276   : > { %v1771_v62 = vadd.f32 %v1770_v60, %v1769_v59  ;;  %1003 = vadd.xlane.f32.xlu0 %v2612_v58  ;;  %v1772_v37 = vpop.f32.mrb[22].mxu1 }
 0x277   : > { %v1773_v63 = vpop.f32.mrb[23].mxu1 }
 0x278   : > { %v1774_v0 = vadd.f32 %v1773_v63, %v1772_v37  ;;  %1005 = vadd.xlane.f32.xlu1 %v2615_v61  ;;  %v2627_v4 = vadd.f32 %v1771_v62, %v2543_v57  ;;  %v2667_v37 = vld [vmem:[%s2905_s5] ss:$0 sm:$0xff] }
 0x27a   : > { %1067 = vadd.xlane.f32.xlu0 %v1040_v1  ;;  %v1043_v6 = vmul.f32 %v2627_v4, %v2627_v4  ;;  %v2636_v7 = vadd.f32 %v1774_v0, %v2543_v57 }
 0x27c   : > { %1069 = vadd.xlane.f32.xlu1 %v1041_v2  ;;  %v1044_v8 = vmul.f32 %v2636_v7, %v2636_v7 }
 0x27e   : > { %1007 = vadd.xlane.f32.xlu0 %v2624_v3 }
 0x280   : > { %1009 = vadd.xlane.f32.xlu1 %v2627_v4 }
 0x282   : > { %1071 = vadd.xlane.f32.xlu0 %v1042_v5 }
 0x284   : > { %1073 = vadd.xlane.f32.xlu1 %v1043_v6 }
 0x286   : > { %1011 = vadd.xlane.f32.xlu0 %v2636_v7 }
 0x28a   : > { %1075 = vadd.xlane.f32.xlu0 %v1044_v8 }
 0x2d7   : > { %v982_v9 = vpop.xlane.xlu0 %981 }
 0x2d8   : > { %v1013_v12 = vmul.f32 0.03125, %v982_v9 }
 0x2d9   : > { %v984_v11 = vpop.xlane.xlu1 %983 }
 0x2da   : > { %v1014_v16 = vmul.f32 0.03125, %v984_v11  ;;  %v1093_v22 = vmul.f32 %v1013_v12, %v1013_v12  ;;  %v1141_v2 = vsub.f32 %v2546_v26, %v1013_v12 }
 0x2db   : > { %v1048_v17 = vpop.xlane.xlu0 %1047 }
 0x2dc   : > { %v1094_v18 = vmul.f32 %v1014_v16, %v1014_v16  ;;  %v1078_v19 = vmul.f32 0.03125, %v1048_v17  ;;  %v1142_v23 = vsub.f32 %v2549_v32, %v1014_v16  ;;  %v2675_v32 = vld [vmem:[%s2906_s6] ss:$0 sm:$0xff] }
 0x2dd   : > { %v1046_v21 = vpop.xlane.xlu1 %1045 }
 0x2de   : > { %v1110_v25 = vsub.f32 %v1078_v19, %v1094_v18  ;;  %v1077_v27 = vmul.f32 0.03125, %v1046_v21 }
 0x2df   : > { %v986_v57 = vpop.xlane.xlu0 %985 }
 0x2e0   : > { %v1126_v28 = vmax.f32 %v1110_v25, 0.0  ;;  %v1109_v29 = vsub.f32 %v1077_v27, %v1093_v22  ;;  %v2641_v35 = vmul.f32 0.03125, %v986_v57 }
 0x2e1   : > { %v990_v30 = vpop.xlane.xlu1 %989 }
 0x2e2   : > { %v1158_v33 = vadd.f32 1e-05, %v1126_v28  ;;  %v1125_v34 = vmax.f32 %v1109_v29, 0.0  ;;  %v1095_v41 = vmul.f32 %v2641_v35, %v2641_v35  ;;  %v2645_v42 = vmul.f32 0.03125, %v990_v30 }
 0x2e3   : > { %v988_v36 = vpop.xlane.xlu0 %987  ;;  %v2690_v29 = vstv %s1253_s3 }
 0x2e4   : > { %1990 = vrsqrt.f32 %v1158_v33  ;;  %v1157_v38 = vadd.f32 1e-05, %v1125_v34  ;;  %v2647_v45 = vmul.f32 0.03125, %v988_v36  ;;  %v1097_v48 = vmul.f32 %v2645_v42, %v2645_v42 }
 0x2e5   : > { %v1050_v39 = vpop.xlane.xlu1 %1049 }
 0x2e6   : > { %1992 = vrsqrt.f32 %v1157_v38  ;;  %v1079_v15 = vmul.f32 0.03125, %v1050_v39  ;;  %v1096_v53 = vmul.f32 %v2647_v45, %v2647_v45 }
 0x2e7   : > { %v992_v44 = vpop.xlane.xlu0 %991 }
 0x2e8   : > { %v1111_v46 = vsub.f32 %v1079_v15, %v1095_v41  ;;  %v2662_v59 = vmul.f32 0.03125, %v992_v44 }
 0x2e9   : > { %v1054_v47 = vpop.xlane.xlu1 %1053 }
 0x2ea   : > { %v1127_v50 = vmax.f32 %v1111_v46, 0.0  ;;  %v1081_v51 = vmul.f32 0.03125, %v1054_v47  ;;  %v1098_v18 = vmul.f32 %v2662_v59, %v2662_v59  ;;  %v1143_v46 = vsub.f32 %v2558_v10, %v2641_v35 }
 0x2eb   : > { %v1052_v20 = vpop.xlane.xlu0 %1051  ;;  %v1145_v10 = vsub.f32 %v2561_v13, %v2645_v42 }
 0x2ec   : > { %v1159_v54 = vadd.f32 1e-05, %v1127_v50  ;;  %v1113_v55 = vsub.f32 %v1081_v51, %v1097_v48  ;;  %v1080_v56 = vmul.f32 0.03125, %v1052_v20 }
 0x2ed   : > { %v994_v60 = vpop.xlane.xlu1 %993 }
 0x2ee   : > { %v1991_v62 = vpop.eup %1990  ;;  %1994 = vrsqrt.f32 %v1159_v54  ;;  %v1129_v63 = vmax.f32 %v1113_v55, 0.0  ;;  %v1112_v0 = vsub.f32 %v1080_v56, %v1096_v53  ;;  %v2669_v1 = vmul.f32 0.03125, %v994_v60 }
 0x2ef   : > { %v1190_v5 = vmul.f32 %v1991_v62, %v1142_v23  ;;  %v1056_v6 = vpop.xlane.xlu0 %1055 }
 0x2f0   : > { %v1993_v8 = vpop.eup %1992  ;;  %v1161_v9 = vadd.f32 1e-05, %v1129_v63  ;;  %v1128_v11 = vmax.f32 %v1112_v0, 0.0  ;;  %v1082_v19 = vmul.f32 0.03125, %v1056_v6  ;;  %v1099_v21 = vmul.f32 %v2669_v1, %v2669_v1 }
 0x2f1   : > { %v1213_v16 = vmul.f32 %v2667_v37, %v1190_v5  ;;  %v1189_v17 = vmul.f32 %v1993_v8, %v1141_v2  ;;  %v1058_v26 = vpop.xlane.xlu1 %1057  ;;  %v1144_v6 = vsub.f32 %v2565_v14, %v2647_v45  ;;  %v1146_v14 = vsub.f32 %v2572_v24, %v2662_v59 }
 0x2f2   : > { %1996 = vrsqrt.f32 %v1161_v9  ;;  %v1160_v12 = vadd.f32 1e-05, %v1128_v11  ;;  %v1083_v22 = vmul.f32 0.03125, %v1058_v26  ;;  %v1114_v57 = vsub.f32 %v1082_v19, %v1098_v18 }
 0x2f3   : > { %v1236_v25 = vadd.f32 %v2675_v32, %v1213_v16  ;;  %v1212_v27 = vmul.f32 %v2667_v37, %v1189_v17  ;;  %v996_v28 = vpop.xlane.xlu0 %995 }
 0x2f4   : > { %1998 = vrsqrt.f32 %v1160_v12  ;;  %v1115_v30 = vsub.f32 %v1083_v22, %v1099_v21  ;;  %v2692_v33 = vmul.f32 0.03125, %v996_v28  ;;  %v1130_v36 = vmax.f32 %v1114_v57, 0.0 }
 0x2f5   : > { %v1235_v34 = vadd.f32 %v2675_v32, %v1212_v27  ;;  %v998_v38 = vpop.xlane.xlu1 %997  ;;  %v1256_v15 = vmax.f32 %v1236_v25, %v2690_v29 }
 0x2f6   : > { %v1131_v39 = vmax.f32 %v1115_v30, 0.0  ;;  %v2696_v41 = vmul.f32 0.03125, %v998_v38  ;;  %v1162_v47 = vadd.f32 1e-05, %v1130_v36  ;;  %v1100_v20 = vmul.f32 %v2692_v33, %v2692_v33 }
 0x2f7   : > { %v1255_v44 = vmax.f32 %v1235_v34, %v2690_v29  ;;  %v1060_v48 = vpop.xlane.xlu0 %1059  ;;  %v1147_v38 = vsub.f32 %v2580_v31, %v2669_v1 }
 0x2f8   : > { %v1995_v50 = vpop.eup %1994  ;;  %v1163_v51 = vadd.f32 1e-05, %v1131_v39  ;;  %v1084_v53 = vmul.f32 0.03125, %v1060_v48  ;;  %2000 = vrsqrt.f32 %v1162_v47  ;;  %v1101_v23 = vmul.f32 %v2696_v41, %v2696_v41 }
 0x2f9   : > { %v2704_v54 = vpack.c.bf16 %v1256_v15, %v1255_v44  ;;  %v1191_v55 = vmul.f32 %v1995_v50, %v1143_v46  ;;  %v1062_v56 = vpop.xlane.xlu1 %1061 }
 0x2fa   : > { %2002 = vrsqrt.f32 %v1163_v51  ;;  %v1116_v60 = vsub.f32 %v1084_v53, %v1100_v20  ;;  %v1085_v62 = vmul.f32 0.03125, %v1062_v56 }
 0x2fb   : > { %1284 = vst [vmem:[%s2708_s19] sm:$0xff] %v2704_v54  ;;  %v1000_v35 = vpop.xlane.xlu0 %999  ;;  %v1214_v8 = vmul.f32 %v2667_v37, %v1191_v55  ;;  %1839 = vmatprep.mubr.bf16.mxu0 (!%p1678_p11), %v2704_v54  ;;  %v2026_v54 = vld [vmem:[%s2907_s7 + $0x20] sm:$0xff] (!%p1678_p11)  }
 0x2fc   : > { %v1997_v63 = vpop.eup %1996  ;;  %v1132_v0 = vmax.f32 %v1116_v60, 0.0  ;;  %v1117_v2 = vsub.f32 %v1085_v62, %v1101_v23  ;;  %v2714_v5 = vmul.f32 0.03125, %v1000_v35 }
 0x2fd   : > { %v1193_v9 = vmul.f32 %v1997_v63, %v1145_v10  ;;  %v1002_v11 = vpop.xlane.xlu1 %1001  ;;  %v1237_v22 = vadd.f32 %v2675_v32, %v1214_v8 }
 0x2fe   : > { %v1999_v16 = vpop.eup %1998  ;;  %v1164_v17 = vadd.f32 1e-05, %v1132_v0  ;;  %v1133_v18 = vmax.f32 %v1117_v2, 0.0  ;;  %v2719_v26 = vmul.f32 0.03125, %v1002_v11  ;;  %v1102_v12 = vmul.f32 %v2714_v5, %v2714_v5 }
 0x2ff   : > { %v1192_v19 = vmul.f32 %v1999_v16, %v1144_v6  ;;  %v1064_v13 = vpop.xlane.xlu0 %1063  ;;  %v1216_v45 = vmul.f32 %v2667_v37, %v1193_v9  ;;  %v1257_v47 = vmax.f32 %v1237_v22, %v2690_v29  ;;  %v1148_v2 = vsub.f32 %v2588_v40, %v2692_v33 }
 0x300   : > { %2004 = vrsqrt.f32 %v1164_v17  ;;  %v1165_v42 = vadd.f32 1e-05, %v1133_v18  ;;  %v1086_v21 = vmul.f32 0.03125, %v1064_v13  ;;  %v1103_v57 = vmul.f32 %v2719_v26, %v2719_v26 }
 0x301   : > { %v1215_v25 = vmul.f32 %v2667_v37, %v1192_v19  ;;  %v1066_v27 = vpop.xlane.xlu1 %1065  ;;  %v1239_v48 = vadd.f32 %v2675_v32, %v1216_v45  ;;  %v1149_v18 = vsub.f32 %v2591_v43, %v2696_v41 }
 0x302   : > { %2006 = vrsqrt.f32 %v1165_v42  ;;  %v1118_v28 = vsub.f32 %v1086_v21, %v1102_v12  ;;  %v1087_v30 = vmul.f32 0.03125, %v1066_v27  ;;  %v2001_v34 = vpop.eup %2000 }
 0x303   : > { %v1238_v36 = vadd.f32 %v2675_v32, %v1215_v25  ;;  %v1004_v39 = vpop.xlane.xlu0 %1003  ;;  %v1194_v24 = vmul.f32 %v2001_v34, %v1146_v14  ;;  %v1259_v63 = vmax.f32 %v1239_v48, %v2690_v29 }
 0x304   : > { %v2003_v15 = vpop.eup %2002  ;;  %v1134_v59 = vmax.f32 %v1118_v28, 0.0  ;;  %v1119_v44 = vsub.f32 %v1087_v30, %v1103_v57  ;;  %v2733_v46 = vmul.f32 0.03125, %v1004_v39 }
 0x305   : > { %v1258_v50 = vmax.f32 %v1238_v36, %v2690_v29  ;;  %v1195_v51 = vmul.f32 %v2003_v15, %v1147_v38  ;;  %v1006_v20 = vpop.xlane.xlu1 %1005  ;;  %v1217_v53 = vmul.f32 %v2667_v37, %v1194_v24  ;;  %v1150_v24 = vsub.f32 %v2600_v49, %v2714_v5 }
 0x306   : > { %v1166_v55 = vadd.f32 1e-05, %v1134_v59  ;;  %v1135_v31 = vmax.f32 %v1119_v44, 0.0  ;;  %v1104_v56 = vmul.f32 %v2733_v46, %v2733_v46  ;;  %v2743_v23 = vmul.f32 0.03125, %v1006_v20 }
 0x307   : > { %v2739_v1 = vpack.c.bf16 %v1258_v50, %v1257_v47  ;;  %v1068_v60 = vpop.xlane.xlu0 %1067  ;;  %v1240_v62 = vadd.f32 %v2675_v32, %v1217_v53  ;;  %v1218_v0 = vmul.f32 %v2667_v37, %v1195_v51  ;;  %v1151_v20 = vsub.f32 %v2603_v52, %v2719_v26 }
 0x308   : > { %2008 = vrsqrt.f32 %v1166_v55  ;;  %v1167_v10 = vadd.f32 1e-05, %v1135_v31  ;;  %v1088_v35 = vmul.f32 0.03125, %v1068_v60  ;;  %v1105_v6 = vmul.f32 %v2743_v23, %v2743_v23 }
 0x309   : > { %1285 = vst [vmem:[%s2708_s19 + $0x8] sm:$0xff] %v2739_v1  ;;  %v1070_v8 = vpop.xlane.xlu1 %1069  ;;  %v1260_v11 = vmax.f32 %v1240_v62, %v2690_v29  ;;  %v1241_v22 = vadd.f32 %v2675_v32, %v1218_v0 }
 0x30a   : > { %v2005_v9 = vpop.eup %2004  ;;  %2010 = vrsqrt.f32 %v1167_v10  ;;  %v1120_v16 = vsub.f32 %v1088_v35, %v1104_v56  ;;  %v1089_v17 = vmul.f32 0.03125, %v1070_v8 }
 0x30b   : > { %v1196_v19 = vmul.f32 %v2005_v9, %v1148_v2  ;;  %v1008_v13 = vpop.xlane.xlu0 %1007  ;;  %v2757_v12 = vpack.c.bf16 %v1260_v11, %v1259_v63  ;;  %v1261_v38 = vmax.f32 %v1241_v22, %v2690_v29 }
 0x30c   : > { %v2007_v42 = vpop.eup %2006  ;;  %v1136_v40 = vmax.f32 %v1120_v16, 0.0  ;;  %v1121_v33 = vsub.f32 %v1089_v17, %v1105_v6  ;;  %v2759_v21 = vmul.f32 0.03125, %v1008_v13  ;;  %v1152_v16 = vsub.f32 %v2612_v58, %v2733_v46 }
 0x30d   : > { %v1219_v14 = vmul.f32 %v2667_v37, %v1196_v19  ;;  %v1197_v45 = vmul.f32 %v2007_v42, %v1149_v18  ;;  %v1010_v25 = vpop.xlane.xlu1 %1009  ;;  %1286 = vst [vmem:[%s2708_s19 + $0x10] sm:$0xff] %v2757_v12  ;;  %v1153_v13 = vsub.f32 %v2615_v61, %v2743_v23 }
 0x30e   : > { %v1168_v27 = vadd.f32 1e-05, %v1136_v40  ;;  %v1137_v57 = vmax.f32 %v1121_v33, 0.0  ;;  %v2766_v41 = vmul.f32 0.03125, %v1010_v25  ;;  %v1106_v34 = vmul.f32 %v2759_v21, %v2759_v21 }
 0x30f   : > { %v1242_v43 = vadd.f32 %v2675_v32, %v1219_v14  ;;  %v1072_v28 = vpop.xlane.xlu0 %1071  ;;  %v1220_v15 = vmul.f32 %v2667_v37, %v1197_v45  ;;  %v1154_v23 = vsub.f32 %v2624_v3, %v2759_v21 }
 0x310   : > { %2012 = vrsqrt.f32 %v1168_v27  ;;  %v1169_v30 = vadd.f32 1e-05, %v1137_v57  ;;  %v1090_v36 = vmul.f32 0.03125, %v1072_v28  ;;  %v1107_v47 = vmul.f32 %v2766_v41, %v2766_v41 }
 0x311   : > { %v1262_v39 = vmax.f32 %v1242_v43, %v2690_v29  ;;  %v1074_v59 = vpop.xlane.xlu1 %1073  ;;  %v1243_v49 = vadd.f32 %v2675_v32, %v1220_v15  ;;  %v1155_v28 = vsub.f32 %v2627_v4, %v2766_v41 }
 0x312   : > { %v2009_v44 = vpop.eup %2008  ;;  %2014 = vrsqrt.f32 %v1169_v30  ;;  %v1122_v48 = vsub.f32 %v1090_v36, %v1106_v34  ;;  %v1091_v50 = vmul.f32 0.03125, %v1074_v59 }
 0x313   : > { %v2777_v51 = vpack.c.bf16 %v1262_v39, %v1261_v38  ;;  %v1198_v53 = vmul.f32 %v2009_v44, %v1150_v24  ;;  %v1012_v55 = vpop.xlane.xlu0 %1011  ;;  %v1263_v8 = vmax.f32 %v1243_v49, %v2690_v29 }
 0x314   : > { %v2011_v31 = vpop.eup %2010  ;;  %v1138_v56 = vmax.f32 %v1122_v48, 0.0  ;;  %v1123_v60 = vsub.f32 %v1091_v50, %v1107_v47  ;;  %v1028_v62 = vmul.f32 0.03125, %v1012_v55 }
 0x315   : > { %1287 = vst [vmem:[%s2708_s19 + $0x18] sm:$0xff] %v2777_v51  ;;  %v1221_v5 = vmul.f32 %v2667_v37, %v1198_v53  ;;  %v1199_v10 = vmul.f32 %v2011_v31, %v1151_v20  ;;  %v2027_v31 = vld [vmem:[%s2907_s7 + $0x28] sm:$0xff] (!%p1678_p11)  }
 0x316   : > { %v1170_v35 = vadd.f32 1e-05, %v1138_v56  ;;  %v1139_v63 = vmax.f32 %v1123_v60, 0.0  ;;  %v1108_v26 = vmul.f32 %v1028_v62, %v1028_v62  ;;  %v1156_v4 = vsub.f32 %v2636_v7, %v1028_v62  ;;  %v2022_v7 = vld [vmem:[%s2907_s7] sm:$0xff] (!%p1678_p11)   ;;  %v2028_v56 = vld [vmem:[%s2907_s7 + $0x30] sm:$0xff] (!%p1678_p11)   ;;  %v2029_v60 = vld [vmem:[%s2907_s7 + $0x38] sm:$0xff] (!%p1678_p11)  }
 0x317   : > { %v1244_v0 = vadd.f32 %v2675_v32, %v1221_v5  ;;  %v1076_v2 = vpop.xlane.xlu0 %1075  ;;  %v1222_v11 = vmul.f32 %v2667_v37, %v1199_v10  ;;  %1823 = vmatprep.subr.bf16.mxu0 (!%p1678_p11), %v2022_v7  ;;  %1871 = vmatprep.subr.bf16.mxu1 (!%p1678_p11), %v2022_v7  ;;  %v1679_v62 = vld [vmem:[%s2908_s8] ss:$0 sm:$0xff] (!%p1678_p11) }
 0x318   : > { %2016 = vrsqrt.f32 %v1170_v35  ;;  %v1171_v52 = vadd.f32 1e-05, %v1139_v63  ;;  %v1092_v6 = vmul.f32 0.03125, %v1076_v2  ;;  %1824 = vmatpush3.bf16.msra.mxu0 (!%p1678_p11), %v2022_v7  ;;  %1879 = vmatpush3.bf16.msra.mxu1 (!%p1678_p11), %v2022_v7 }
 0x319   : > { %v1264_v9 = vmax.f32 %v1244_v0, %v2690_v29  ;;  %v1245_v22 = vadd.f32 %v2675_v32, %v1222_v11 }
 0x31a   : > { %v2013_v17 = vpop.eup %2012  ;;  %2018 = vrsqrt.f32 %v1171_v52  ;;  %v1124_v18 = vsub.f32 %v1092_v6, %v1108_v26 }
 0x31b   : > { %v1275_v19 = vpack.c.bf16 %v1264_v9, %v1263_v8  ;;  %v1200_v42 = vmul.f32 %v2013_v17, %v1152_v16  ;;  %v1265_v46 = vmax.f32 %v1245_v22, %v2690_v29 }
 0x31c   : > { %v2015_v40 = vpop.eup %2014  ;;  %v1140_v33 = vmax.f32 %v1124_v18, 0.0 }
 0x31d   : > { %1288 = vst [vmem:[%s2708_s19 + $0x20] sm:$0xff] %v1275_v19  ;;  %v1223_v14 = vmul.f32 %v2667_v37, %v1200_v42  ;;  %v1201_v45 = vmul.f32 %v2015_v40, %v1153_v13  ;;  %1847 = vmatprep.mubr.bf16.mxu1 (!%p1678_p11), %v1275_v19 }
 0x31e   : > { %v1172_v25 = vadd.f32 1e-05, %v1140_v33 }
 0x31f   : > { %v1246_v58 = vadd.f32 %v2675_v32, %v1223_v14  ;;  %v1224_v61 = vmul.f32 %v2667_v37, %v1201_v45 }
 0x320   : > { %2020 = vrsqrt.f32 %v1172_v25 }
 0x321   : > { %v1266_v27 = vmax.f32 %v1246_v58, %v2690_v29  ;;  %v1247_v36 = vadd.f32 %v2675_v32, %v1224_v61 }
 0x322   : > { %v2017_v57 = vpop.eup %2016 }
 0x323   : > { %v2802_v43 = vpack.c.bf16 %v1266_v27, %v1265_v46  ;;  %v1202_v30 = vmul.f32 %v2017_v57, %v1154_v23  ;;  %v1267_v3 = vmax.f32 %v1247_v36, %v2690_v29 }
 0x324   : > { %v2019_v34 = vpop.eup %2018 }
 0x325   : > { %1289 = vst [vmem:[%s2708_s19 + $0x28] sm:$0xff] %v2802_v43  ;;  %v1225_v38 = vmul.f32 %v2667_v37, %v1202_v30  ;;  %v1203_v39 = vmul.f32 %v2019_v34, %v1155_v28 }
 0x327   : > { %v1248_v15 = vadd.f32 %v2675_v32, %v1225_v38  ;;  %v1226_v24 = vmul.f32 %v2667_v37, %v1203_v39 }
 0x329   : > { %v1268_v21 = vmax.f32 %v1248_v15, %v2690_v29  ;;  %v1249_v47 = vadd.f32 %v2675_v32, %v1226_v24 }
 0x32a   : > { %v2021_v41 = vpop.eup %2020 }
 0x32b   : > { %v1277_v59 = vpack.c.bf16 %v1268_v21, %v1267_v3  ;;  %v1204_v44 = vmul.f32 %v2021_v41, %v1156_v4  ;;  %v1269_v20 = vmax.f32 %v1249_v47, %v2690_v29 }
 0x32d   : > { %1290 = vst [vmem:[%s2708_s19 + $0x30] sm:$0xff] %v1277_v59  ;;  %v1227_v48 = vmul.f32 %v2667_v37, %v1204_v44  ;;  %v2023_v37 = vld [vmem:[%s2907_s7 + $0x8] sm:$0xff] (!%p1678_p11)  }
 0x32e   : > { %1825 = vmatprep.subr.bf16.mxu0 (!%p1678_p11), %v2023_v37  ;;  %1872 = vmatprep.subr.bf16.mxu1 (!%p1678_p11), %v2023_v37 }
 0x32f   : > { %v1250_v50 = vadd.f32 %v2675_v32, %v1227_v48  ;;  %1295 = sbr.rel (%p1678_p11) target bundleno = 1068 (0x42c), region = 102  ;;  %v2024_v32 = vld [vmem:[%s2907_s7 + $0x10] sm:$0xff] (!%p1678_p11)   ;;  %1826 = vmatpush3.bf16.msra.mxu0 (!%p1678_p11), %v2023_v37  ;;  %1880 = vmatpush3.bf16.msra.mxu1 (!%p1678_p11), %v2023_v37 }
 0x330   : > { %1827 = vmatprep.subr.bf16.mxu0 (!%p1678_p11), %v2024_v32  ;;  %1873 = vmatprep.subr.bf16.mxu1 (!%p1678_p11), %v2024_v32 }
 0x331   : > { %v1270_v53 = vmax.f32 %v1250_v50, %v2690_v29  ;;  %v2025_v29 = vld [vmem:[%s2907_s7 + $0x18] sm:$0xff] (!%p1678_p11)  }
 0x333   : > { %v1278_v55 = vpack.c.bf16 %v1270_v53, %v1269_v20  ;;  %1828 = vmatpush3.bf16.msra.mxu0 (!%p1678_p11), %v2024_v32  ;;  %1881 = vmatpush3.bf16.msra.mxu1 (!%p1678_p11), %v2024_v32 }
 0x334   : > { %1829 = vmatprep.subr.bf16.mxu0 (!%p1678_p11), %v2025_v29  ;;  %1874 = vmatprep.subr.bf16.mxu1 (!%p1678_p11), %v2025_v29 }
 0x335   : > { %1291 = vst [vmem:[%s2708_s19 + $0x38] sm:$0xff] %v1278_v55 }
 0x337   : > { %1830 = vmatpush3.bf16.msra.mxu0 %v2025_v29  ;;  %1882 = vmatpush3.bf16.msra.mxu1 %v2025_v29 }
 0x338   : > { %1831 = vmatprep.subr.bf16.mxu0 %v2026_v54  ;;  %1875 = vmatprep.subr.bf16.mxu1 %v2026_v54 }
 0x33b   : > { %1832 = vmatpush3.bf16.msra.mxu0 %v2026_v54  ;;  %1883 = vmatpush3.bf16.msra.mxu1 %v2026_v54 }
 0x33c   : > { %1833 = vmatprep.subr.bf16.mxu0 %v2027_v31  ;;  %1876 = vmatprep.subr.bf16.mxu1 %v2027_v31 }
 0x33f   : > { %1834 = vmatpush3.bf16.msra.mxu0 %v2027_v31  ;;  %1884 = vmatpush3.bf16.msra.mxu1 %v2027_v31 }
 0x340   : > { %1835 = vmatprep.subr.bf16.mxu0 %v2028_v56  ;;  %1877 = vmatprep.subr.bf16.mxu1 %v2028_v56 }
 0x343   : > { %1836 = vmatpush3.bf16.msra.mxu0 %v2028_v56  ;;  %1885 = vmatpush3.bf16.msra.mxu1 %v2028_v56 }
 0x344   : > { %1837 = vmatprep.subr.bf16.mxu0 %v2029_v60  ;;  %1878 = vmatprep.subr.bf16.mxu1 %v2029_v60 }
 0x347   : > { %1838 = vmatpush3.bf16.msra.mxu0 %v2029_v60  ;;  %1886 = vmatpush3.bf16.msra.mxu1 %v2029_v60 }
 0x34a   : > { %1840 = vmatmul.mubr.bf16.vlgmr.msra.gmra.mrb[0].mxu0 %v2739_v1  ;;  %1848 = vmatmul.mubr.bf16.vlgmr.msra.gmra.mrb[0].mxu1 %v2802_v43 }
 0x34b   : > { %1843 = vmatprep.mubr.bf16.mxu0 %v2757_v12  ;;  %1851 = vmatprep.mubr.bf16.mxu1 %v1277_v59 }
 0x352   : > { %1844 = vmatmul.mubr.bf16.gmra.mrb[4].mxu0 %v2777_v51  ;;  %1852 = vmatmul.mubr.bf16.gmra.mrb[4].mxu1 %v1278_v55 }
 0x41d   : > { %v1841_v49 = vpop.f32.mrb[0].mxu0  ;;  %v1849_v5 = vpop.f32.mrb[0].mxu1 }
 0x41e   : > { %v1410_v10 = vadd.f32 %v1841_v49, %v1679_v62  ;;  %v1442_v35 = vadd.f32 %v1849_v5, %v1679_v62  ;;  %v1401_v63 = vpop.f32.mrb[1].mxu0  ;;  %v1433_v0 = vpop.f32.mrb[1].mxu1 }
 0x41f   : > { %v1402_v2 = vadd.f32 %v1679_v62, %v1401_v63  ;;  %v1434_v1 = vadd.f32 %v1679_v62, %v1433_v0  ;;  %v1842_v52 = vpop.f32.mrb[2].mxu0  ;;  %v1850_v26 = vpop.f32.mrb[2].mxu1 }
 0x420   : > { %1466 = vst [vmem:[#allocation9 + $0x10] sm:$0xff] %v1410_v10  ;;  %1474 = vst [vmem:[#allocation9 + $0x50] sm:$0xff] %v1442_v35  ;;  %v1413_v12 = vadd.f32 %v1842_v52, %v1679_v62  ;;  %v1445_v6 = vadd.f32 %v1850_v26, %v1679_v62  ;;  %v1404_v51 = vpop.f32.mrb[3].mxu0  ;;  %v1436_v8 = vpop.f32.mrb[3].mxu1 }
 0x421   : > { %1464 = vst [vmem:[#allocation9] sm:$0xff] %v1402_v2  ;;  %1472 = vst [vmem:[#allocation9 + $0x40] sm:$0xff] %v1434_v1  ;;  %v1405_v9 = vadd.f32 %v1679_v62, %v1404_v51  ;;  %v1437_v11 = vadd.f32 %v1679_v62, %v1436_v8 }
 0x422   : > { %1467 = vst [vmem:[#allocation9 + $0x18] sm:$0xff] %v1413_v12  ;;  %1475 = vst [vmem:[#allocation9 + $0x58] sm:$0xff] %v1445_v6 }
 0x423   : > { %1465 = vst [vmem:[#allocation9 + $0x8] sm:$0xff] %v1405_v9  ;;  %1473 = vst [vmem:[#allocation9 + $0x48] sm:$0xff] %v1437_v11 }
 0x425   : > { %v1845_v16 = vpop.f32.mrb[4].mxu0  ;;  %v1853_v17 = vpop.f32.mrb[4].mxu1 }
 0x426   : > { %v1426_v18 = vadd.f32 %v1845_v16, %v1679_v62  ;;  %v1458_v19 = vadd.f32 %v1853_v17, %v1679_v62  ;;  %v1417_v13 = vpop.f32.mrb[5].mxu0  ;;  %v1449_v42 = vpop.f32.mrb[5].mxu1 }
 0x427   : > { %v1418_v40 = vadd.f32 %v1679_v62, %v1417_v13  ;;  %v1450_v33 = vadd.f32 %v1679_v62, %v1449_v42  ;;  %v1846_v22 = vpop.f32.mrb[6].mxu0  ;;  %v1854_v14 = vpop.f32.mrb[6].mxu1 }
 0x428   : > { %1470 = vst [vmem:[#allocation9 + $0x30] sm:$0xff] %v1426_v18  ;;  %1478 = vst [vmem:[#allocation9 + $0x70] sm:$0xff] %v1458_v19  ;;  %v1429_v45 = vadd.f32 %v1846_v22, %v1679_v62  ;;  %v1461_v25 = vadd.f32 %v1854_v14, %v1679_v62  ;;  %v1420_v58 = vpop.f32.mrb[7].mxu0  ;;  %v1452_v46 = vpop.f32.mrb[7].mxu1 }
 0x429   : > { %1468 = vst [vmem:[#allocation9 + $0x20] sm:$0xff] %v1418_v40  ;;  %1476 = vst [vmem:[#allocation9 + $0x60] sm:$0xff] %v1450_v33  ;;  %v1421_v27 = vadd.f32 %v1679_v62, %v1420_v58  ;;  %v1453_v61 = vadd.f32 %v1679_v62, %v1452_v46 }
 0x42a   : > { %1471 = vst [vmem:[#allocation9 + $0x38] sm:$0xff] %v1429_v45  ;;  %1479 = vst [vmem:[#allocation9 + $0x78] sm:$0xff] %v1461_v25 }
 0x42b   : > { %1469 = vst [vmem:[#allocation9 + $0x28] sm:$0xff] %v1421_v27  ;;  %1477 = vst [vmem:[#allocation9 + $0x68] sm:$0xff] %v1453_v61 }
 0x42c PF: > { %s2928_s0 = sadd.s32 4294967295, %s2174_s14   ;;  %s2183_s28 = smov [#allocation9]  }
 0x42d   : > { %p2857_p13 = scmp.eq.s32.totalorder %s2928_s0, 2  ;;  %s1496_s30 = sshll.u32 %s2183_s28, 4  ;;  %s1497_s30 = int_to_ptr.vmem [resolvable:$true] %s1496_s30 }
 0x42e   : > { %s2088_s12 = scalar_lea.vmem %s1497_s30, 2048  ;;  %s2094_s22 = scalar_lea.vmem %s1497_s30, 4096 }
 0x42f   : > { %p2089_p2 = scmp.ne.s32.totalorder %s1497_s30, %s2088_s12  ;;  %p2095_p0 = scmp.lt.s32.totalorder %s1497_s30, %s1497_s30 }
 0x430   : > { %p2096_p6 = scmp.lt.s32.totalorder %s2094_s22, %s2088_s12 }
 0x431   : > { %p2090_p3 = pnand %p2089_p2, %p2857_p13 }
 0x432   : > { %p2097_p7 = por %p2096_p6, %p2095_p0 }
 0x433   : > { %p2091_p12 = pneg %p2090_p3 }
 0x435   : > { %p2098_p1 = pnand %p2097_p7, %p2091_p12 }
 0x437   : > { %2101 = shalt.err (!%p2098_p1)
}
 0x438   : > { %s2102_s27 = scalar_lea.hbm %s2909_s9, 2048 }
 0x439   : > { %p2103_p4 = scmp.ne.s32.totalorder %s2909_s9, %s2102_s27  ;;  %p2108_p9 = scmp.lt.u32.totalorder %s2102_s27, %s2909_s9 }
 0x43b   : > { %p2104_p5 = pnand %p2103_p4, %p2857_p13 }
 0x43d   : > { %p2105_p8 = pneg %p2104_p5 }
 0x43f   : > { %p2110_p10 = pnand %p2108_p9, %p2105_p8 }
 0x441   : > { %2113 = shalt.err (!%p2110_p10)
}
 0x442   : > { %s2184_s24 = smov 128   ;;  %s2185_s17 = smov 8  }
 0x443   : > { %1894 = dma.vmem_to_hbm [thread:$0]  (%p2857_p13), %s1497_s30, 2048, %s2909_s9, [#allocation6], %s2184_s24, %s2184_s24, %s2185_s17  }
 0x444 PF: > { %p1913_p11 = scmp.ge.s32.totalorder %s2174_s14, 2  ;;  %s2930_s0 = sadd.s32 4294967294, %s2174_s14  }
 0x445   : > { %p1914_p2 = scmp.eq.s32.totalorder %s2930_s0, 2 }
 0x447   : > { %p1906_p3 = pnand %p1914_p2, %p1913_p11 }
 0x449   : > { %2149 = dma.done.wait (!%p1906_p3), [#allocation6], 2048  }
 0x44a   : > { %2151 = vsyncadd (!%p1906_p3), [#allocation6], 4294965248  ;;  %s26_s14 = sadd.s32 1, %s2174_s14   ;;  %s2931_s30 = smov %s2158_s10 }
 0x44b   : > { %p23_p12 = scmp.ge.s32.totalorder %s26_s14, 5   ;;  %s2932_s10 = smov %s2162_s11 }
 0x44c   : > { %s2933_s11 = smov %s2322_s16  ;;  %s2934_s12 = smov %s2170_s13 }
 0x44d   : > { %s2935_s13 = smov %s2937_s26  ;;  %25 = sbr.rel (!%p23_p12) target bundleno = 10 (0xa), region = 163 }
 0x454   :  { %1517 = vsyncpa [#allocation5], 1 }
 0x455   :  { %1519 = vsyncpa [#allocation5 + $0x1], 1 }
 0x456   :  { %1520 = vsyncpa [#allocation8], 1 }
 0x457   :  { %1522 = vsyncpa [#allocation8 + $0x1], 1 }
 0x458   :  { %1523 = vsyncpa [#allocation6], 1 }
 0x459   :  { %1525 = vsyncpa [#allocation6 + $0x1], 1 }
 0x45a   :  { %1526 = vsyncmov [#allocation3] }
 0x45d   :  { %s1527_s23 = vpop.sfrf %1526 }
 0x45e   :  { %p1692_p13 = scmp.ne.s32.totalorder %s1527_s23, 0 }
 0x460   :  { %1531 = shalt.err (%p1692_p13)  }

// kernel: tpu_custom_call.1
= control target key start
LH: loop header
LB: loop body
LE: loop exit
PB: predicated region body
PF: predicated region fallthrough
CT: control target
= control target key end

     0   :  { %s2900_s0 = inlined_call_operand.hbm [shape: s8[128,128], index: 0, kind: input, shape index: {}]   ;;  %s2901_s1 = inlined_call_operand.vmem [shape: f32[128,1], index: 1, kind: input, shape index: {}]   ;;  %s2902_s2 = inlined_call_operand.vmem [shape: bf16[128,128], index: 2, kind: input, shape index: {}]   ;;  %s2903_s3 = inlined_call_operand.hbm [shape: bf16[3,256,128], index: 3, kind: input, shape index: {}]   ;;  %s2904_s4 = inlined_call_operand.vmem [shape: f32[3,1,128], index: 4, kind: input, shape index: {}]   ;;  %s2905_s5 = inlined_call_operand.vmem [shape: f32[1,128], index: 5, kind: input, shape index: {}]   ;;  %s2906_s6 = inlined_call_operand.vmem [shape: f32[1,128], index: 6, kind: input, shape index: {}]   ;;  %s2907_s7 = inlined_call_operand.vmem [shape: bf16[128,128], index: 7, kind: input, shape index: {}]   ;;  %s2908_s8 = inlined_call_operand.vmem [shape: f32[1,128], index: 8, kind: input, shape index: {}]   ;;  %s2909_s9 = inlined_call_operand.hbm [shape: f32[128,128], index: 9, kind: output, shape index: {}]  }
   0x1   :  { %2915 = sst [smem:[#allocation15_spill]] %s2900_s0 }
   0x2   :  { %2916 = sst [smem:[#allocation16_spill]] %s2903_s3 }
   0x3   :  { %14 = vsyncpa [#allocation5], 0 }
   0x4   :  { %15 = vsyncpa [#allocation8], 0 }
   0x5   :  { %17 = vsyncpa [#allocation8 + $0x1], 0 }
   0x6   :  { %18 = vsyncpa [#allocation6], 0 }
   0x7   :  { %20 = vsyncpa [#allocation6 + $0x1], 0  ;;  %s2236_s30 = smov 0   ;;  %s2238_s10 = smov 0  }
   0x8   :  { %s2240_s11 = smov 0   ;;  %s2242_s12 = smov 0  }
   0x9   :  { %s2244_s13 = smov 0   ;;  %s2246_s14 = smov 0  }
   0xa LB: > { %s2914_s15 = sadd.s32 4294967295, %s2174_s14   ;;  %p105_p0 = scmp.ne.s32.totalorder %s2158_s10, %s2154_s30  ;;  %s2174_s14 = sphi %s2246_s14, %s26_s14   ;;  %s2170_s13 = sphi %s2244_s13, %s2935_s13   ;;  %s2166_s12 = sphi %s2242_s12, %s2934_s12   ;;  %s2162_s11 = sphi %s2240_s11, %s2933_s11   ;;  %s2158_s10 = sphi %s2238_s10, %s2932_s10   ;;  %s2154_s30 = sphi %s2236_s30, %s2931_s30  }
   0xb   : > { %p2269_p1 = scmp.eq.s32.totalorder %s2914_s15, 0  ;;  %p1637_p2 = scmp.ge.s32.totalorder %s2174_s14, 1 }
   0xc   : > { %p256_p3 = scmp.lt.s32.totalorder %s2174_s14, 4  ;;  %s2176_s20 = smov [#allocation4]  }
   0xd   : > { %s2917_s17 = scalar_select %p2269_p1, 1, 0 }
   0xe   : > { %p2277_p4 = por %p2269_p1, %p105_p0  ;;  %p2281_p5 = pnand %p1637_p2, %p256_p3 }
   0xf   : > { %s268_s21 = sshll.u32 %s2176_s20, 4  ;;  %s2921_s0 = sld [smem:[#allocation15_spill]]  ;;  %s269_s21 = int_to_ptr.vmem [resolvable:$true] %s268_s21 }
  0x10   : > { %s2918_s18 = scalar_select %p2277_p4, 1, 0 }
  0x11   : > { %s2919_s19 = scalar_select %p2281_p5, 1, 0 }
  0x12   : > { %p1897_p6 = pneg %p2281_p5 }
  0x14   : > { %p2289_p7 = pnand %p1897_p6, %p2269_p1 }
  0x15   : > { %s2030_s25 = scalar_lea.hbm %s2921_s0, 512 }
  0x16   : > { %p2031_p8 = scmp.ne.s32.totalorder %s2921_s0, %s2030_s25  ;;  %p2032_p9 = pneg %p2289_p7 }
  0x17   : > { %p2037_p12 = scmp.lt.u32.totalorder %s2030_s25, %s2921_s0 }
  0x18   : > { %p2033_p10 = pnand %p2032_p9, %p2031_p8 }
  0x1a   : > { %p2034_p11 = pneg %p2033_p10 }
  0x1c   : > { %p2039_p13 = pnand %p2037_p12, %p2034_p11 }
  0x1e   : > { %2042 = shalt.err (!%p2039_p13)
}
  0x1f   : > { %s2043_s30 = scalar_lea.vmem %s269_s21, 512  ;;  %p2051_p6 = scmp.lt.s32.totalorder %s269_s21, %s269_s21 }
  0x20   : > { %p2044_p0 = scmp.ne.s32.totalorder %s269_s21, %s2043_s30  ;;  %p2052_p4 = scmp.lt.s32.totalorder %s2043_s30, %s2043_s30 }
  0x22   : > { %p2046_p2 = pnand %p2044_p0, %p2032_p9  ;;  %p2053_p1 = por %p2052_p4, %p2051_p6 }
  0x24   : > { %p2047_p3 = pneg %p2046_p2 }
  0x26   : > { %p2054_p5 = pnand %p2053_p1, %p2047_p3 }
  0x28   : > { %2057 = shalt.err (!%p2054_p5)
}
  0x29   : > { %s2177_s20 = smov 128   ;;  %s2178_s23 = smov 8  }
  0x2a   : > { %1900 = dma.hbm_to_vmem [thread:$0]  (!%p2289_p7), %s2921_s0, 512, %s269_s21, [#allocation5], %s2177_s20, %s2177_s20, %s2178_s23  }
  0x2b   : > { %s38_s26 = sadd.s32 1, %s2170_s13  ;;  %s92_s27 = sadd.s32 1, %s2162_s11 }
  0x2c   : > { %p40_p1 = scmp.ge.s32.totalorder %s38_s26, 3  ;;  %p99_p4 = scmp.ne.s32.totalorder %s2162_s11, %s2158_s10 }
  0x2d   : > { %p100_p5 = scmp.eq.s32.totalorder %s2174_s14, 0  ;;  %p1910_p8 = scmp.lt.s32.totalorder %s2174_s14, 3 }
  0x2e   : > { %s2937_s26 = smov (%p40_p1, %s38_s26), 0  ;;  %s303_s28 = sand.u32 1, %s2162_s11  }
  0x2f   : > { %p101_p9 = por %p100_p5, %p99_p4  ;;  %s89_s29 = ssub.s32 %s2170_s13, %s2937_s26 }
  0x30   : > { %p90_p10 = scmp.eq.s32.totalorder %s89_s29, 0  ;;  %s1641_s30 = sshll.u32 %s303_s28, 7 }
  0x31   : > { %s1693_s22 = sshll.u32 %s2170_s13, 11  ;;  %s2922_s3 = sld [smem:[#allocation16_spill]] }
  0x32   : > { %s2322_s16 = scalar_select %p90_p10, %s2162_s11, %s92_s27  }
  0x33   : > { %s307_s23 = scalar_lea.vmem [#allocation7], %s1641_s30  ;;  %p2333_p7 = pnand %p1910_p8, %p101_p9 }
  0x34   : > { %s314_s25 = sshll.u32 %s307_s23, 4  ;;  %s2337_s27 = scalar_lea.sflag [#allocation8], %s303_s28  ;;  %s2329_s25 = int_to_ptr.vmem [resolvable:$true] %s314_s25 }
  0x35   : > { %p2060_p12 = pneg %p2333_p7 }
  0x37   : > { %s2327_s20 = scalar_lea.hbm %s2922_s3, %s1693_s22  ;;  %s2063_s21 = scalar_lea.hbm %s2922_s3, 6144 }
  0x38   : > { %s2058_s24 = scalar_lea.hbm %s2327_s20, 2048  ;;  %p2064_p2 = scmp.lt.u32.totalorder %s2327_s20, %s2922_s3 }
  0x39   : > { %p2059_p11 = scmp.ne.s32.totalorder %s2327_s20, %s2058_s24  ;;  %p2065_p3 = scmp.lt.u32.totalorder %s2063_s21, %s2058_s24 }
  0x3a   : > { %p2067_p1 = scmp.lt.u32.totalorder %s2058_s24, %s2327_s20 }
  0x3b   : > { %p2061_p13 = pnand %p2060_p12, %p2059_p11  ;;  %p2066_p6 = por %p2065_p3, %p2064_p2 }
  0x3d   : > { %p2062_p0 = pneg %p2061_p13  ;;  %p2068_p4 = por %p2067_p1, %p2066_p6 }
  0x3f   : > { %p2069_p5 = pnand %p2068_p4, %p2062_p0 }
  0x41   : > { %2072 = shalt.err (!%p2069_p5)
}
  0x42   : > { %s2073_s28 = scalar_lea.vmem %s2329_s25, 2048  ;;  %s2179_s30 = smov [#allocation7]  }
  0x43   : > { %p2074_p8 = scmp.ne.s32.totalorder %s2329_s25, %s2073_s28  ;;  %s2078_s22 = sshll.u32 %s2179_s30, 4  ;;  %s2079_s22 = int_to_ptr.vmem [resolvable:$false] %s2078_s22 }
  0x44   : > { %s2080_s15 = scalar_lea.vmem %s2079_s22, 4096  ;;  %p2081_p11 = scmp.lt.s32.totalorder %s2329_s25, %s2079_s22 }
  0x45   : > { %p2076_p9 = pnand %p2074_p8, %p2060_p12  ;;  %p2082_p13 = scmp.lt.s32.totalorder %s2080_s15, %s2073_s28 }
  0x47   : > { %p2077_p10 = pneg %p2076_p9  ;;  %p2083_p2 = por %p2082_p13, %p2081_p11 }
  0x49   : > { %p2084_p3 = pnand %p2083_p2, %p2077_p10 }
  0x4b   : > { %2087 = shalt.err (!%p2084_p3)
}
  0x4c   : > { %s2180_s24 = smov 64   ;;  %s2181_s21 = smov 4  }
  0x4d   : > { %1904 = dma.hbm_to_vmem [thread:$0]  (!%p2333_p7), %s2327_s20, 2048, %s2329_s25, %s2337_s27, %s2180_s24, %s2180_s24, %s2181_s21  }
  0x4e   : > { %p2924_p12 = scmp.ne.s32.totalorder %s2919_s19, 0 }
  0x4f   : > { %p2925_p0 = scmp.ne.s32.totalorder (!%p2924_p12), %s2917_s17, 0 }
  0x50   : > { %332 = sbr.rel (%p2924_p12) target bundleno = 1092 (0x444), region = 52 }
  0x57   : > { %2139 = dma.done.wait (%p2925_p0), [#allocation5], 512  }
  0x58   : > { %2141 = vsyncadd (%p2925_p0), [#allocation5], 4294966784  ;;  %s338_s23 = sand.u32 1, %s2158_s10   ;;  %p2926_p6 = scmp.ne.s32.totalorder %s2918_s18, 0 }
  0x59   : > { %s1646_s28 = sshll.u32 %s338_s23, 7  ;;  %s339_s30 = scalar_lea.sflag [#allocation8], %s338_s23 }
  0x5a   : > { %s2372_s22 = scalar_lea.vmem [#allocation7], %s1646_s28 }
  0x5b   : > { %2143 = dma.done.wait (%p2926_p6), %s339_s30, 2048  }
  0x5c   : > { %2145 = vsyncadd (%p2926_p6), %s339_s30, 4294965248  ;;  %p389_p7 = scmp.lt.s32.totalorder %s2166_s12, 2  ;;  %s397_s17 = sadd.s32 1, %s2166_s12 }
  0x5d   : > { %p398_p1 = scmp.lt.s32.totalorder %s397_s17, 0  ;;  %s399_s19 = ssub.s32 0, %s397_s17 }
  0x5e   : > { %s2383_s20 = scalar_select %p389_p7, %s2166_s12, 2 }
  0x5f   : > { %s1647_s25 = smin.u32 %s399_s19, %s397_s17  ;;  %s412_s21 = ssub.s32 0, %s2166_s12 }
  0x60   : > { %s391_s27 = scalar_lea.vmem %s2904_s4, %s2383_s20  ;;  %s401_s15 = sand.u32 1, %s1647_s25  }
  0x61   : > { %s402_s24 = ssub.s32 0, %s401_s15  ;;  %s1651_s23 = smin.u32 %s2166_s12, %s412_s21 }
  0x62   : > { %s2939_s24 = smov (!%p398_p1, %s402_s24), %s401_s15  ;;  %p424_p4 = scmp.eq.s32.totalorder %s2166_s12, 0 }
  0x63   : > { %p1649_p5 = scmp.lt.s32.totalorder %s2939_s24, 0  ;;  %s408_s28 = sadd.s32 2, %s2939_s24  ;;  %v463_v0 = vld [vmem:[%s2902_s2] sm:$0xff] (%p424_p4)  ;;  %v465_v1 = vld [vmem:[%s2902_s2 + $0x8] sm:$0xff] (%p424_p4)  ;;  %v467_v2 = vld [vmem:[%s2902_s2 + $0x10] sm:$0xff] (%p424_p4) }
  0x64   : > { %p411_p8 = scmp.lt.s32.totalorder %s2166_s12, 0  ;;  %s414_s30 = sand.u32 1, %s1651_s23   ;;  %464 = vst [vmem:[#allocation2 + $0x40] sm:$0xff] (%p424_p4), %v463_v0  ;;  %466 = vst [vmem:[#allocation2 + $0x48] sm:$0xff] (%p424_p4), %v465_v1  ;;  %v469_v3 = vld [vmem:[%s2902_s2 + $0x18] sm:$0xff] (%p424_p4)  ;;  %v471_v4 = vld [vmem:[%s2902_s2 + $0x20] sm:$0xff] (%p424_p4) }
  0x65   : > { %s2941_s28 = smov (!%p1649_p5, %s408_s28), %s2939_s24  ;;  %s415_s0 = ssub.s32 0, %s414_s30  ;;  %468 = vst [vmem:[#allocation2 + $0x50] sm:$0xff] (%p424_p4), %v467_v2  ;;  %v473_v5 = vld [vmem:[%s2902_s2 + $0x28] sm:$0xff] (%p424_p4)  ;;  %470 = vst [vmem:[#allocation2 + $0x58] sm:$0xff] (%p424_p4), %v469_v3  ;;  %v475_v6 = vld [vmem:[%s2902_s2 + $0x30] sm:$0xff] (%p424_p4) }
  0x66   : > { %s1650_s3 = sshll.u32 %s2941_s28, 7  ;;  %s2943_s0 = smov (!%p411_p8, %s415_s0), %s414_s30  ;;  %472 = vst [vmem:[#allocation2 + $0x60] sm:$0xff] (%p424_p4), %v471_v4  ;;  %474 = vst [vmem:[#allocation2 + $0x68] sm:$0xff] (%p424_p4), %v473_v5  ;;  %v477_v7 = vld [vmem:[%s2902_s2 + $0x38] sm:$0xff] (%p424_p4) }
  0x67   : > { %p1653_p9 = scmp.lt.s32.totalorder %s2943_s0, 0  ;;  %s421_s17 = sadd.s32 2, %s2943_s0  ;;  %476 = vst [vmem:[#allocation2 + $0x70] sm:$0xff] (%p424_p4), %v475_v6  ;;  %478 = vst [vmem:[#allocation2 + $0x78] sm:$0xff] (%p424_p4), %v477_v7 }
  0x68   : > { %429 = sbr.rel (!%p424_p4) target bundleno = 114 (0x72), region = 64 }
  0x69   : > { %s2945_s17 = smov (!%p1653_p9, %s421_s17), %s2943_s0 }
  0x6a   : > { %s1654_s19 = sshll.u32 %s2945_s17, 7 }
  0x6f   : > { %486 = vsyncadd [#allocation3], 1024 }
  0x70   : > { %2146 = dma.done.wait [#allocation3], 1024 }
  0x71   : > { %2147 = vsyncadd [#allocation3], 4294966272 }
  0x72 PF: > { %s491_s0 = sshra.s32 %s1650_s3, 4  ;;  %v2425_v8 = vld [vmem:[#allocation4] sm:$0xff]  ;;  %v2182_v10 = vmov 0   ;;  %v635_v11 = vld [vmem:[%s2901_s1 + $0x30] sm:$0xff]  ;;  %v636_v13 = vld [vmem:[%s2901_s1 + $0x38] sm:$0xff]  ;;  %p2655_p10 = por %p424_p4, %p389_p7 }
  0x73   : > { %s1656_s23 = sshll.u32 %s491_s0, 3  ;;  %v524_v9 = vunpack.c.l.s8.bf16 %v2425_v8  ;;  %1973 = vset.pattern.permute.xlu1 %v2182_v10  ;;  %1972 = vset.pattern.permute.xlu0 %v2182_v10  ;;  %v633_v12 = vld [vmem:[%s2901_s1 + $0x20] sm:$0xff]  ;;  %v634_v17 = vld [vmem:[%s2901_s1 + $0x28] sm:$0xff]  ;;  %v640_v21 = vld [vmem:[%s2901_s1 + $0x58] sm:$0xff]  ;;  %v525_v44 = vunpack.c.h.s8.bf16 %v2425_v8  ;;  %s2684_s24 = sshra.s32 %s1654_s19, 4 }
  0x74   : > { %677 = vperm.xlu1 %1973, %v635_v11   ;;  %667 = vperm.xlu0 %1972, %v633_v12   ;;  %s2437_s15 = scalar_lea.vmem [#allocation2], %s1656_s23  ;;  %v638_v18 = vld [vmem:[%s2901_s1 + $0x48] sm:$0xff]  ;;  %v637_v19 = vld [vmem:[%s2901_s1 + $0x40] sm:$0xff]  ;;  %v639_v22 = vld [vmem:[%s2901_s1 + $0x50] sm:$0xff]  ;;  %s1677_s17 = sshll.u32 %s2684_s24, 3 }
  0x75   : > { %v2440_v14 = vld [vmem:[%s2437_s15] sm:$0xff]  ;;  %v2443_v15 = vld [vmem:[%s2437_s15 + $0x8] sm:$0xff]  ;;  %v497_v16 = vld [vmem:[%s2437_s15 + $0x10] sm:$0xff]  ;;  %1807 = vmatprep.mubr.bf16.mxu0 %v524_v9  ;;  %s1253_s3 = scalar_select %p2655_p10, 0.0, -inf }
  0x76   : > { %1791 = vmatprep.subr.bf16.mxu0 %v2440_v14  ;;  %932 = vmatprep.mubr.bf16.mxu1 %v497_v16  ;;  %v2460_v20 = vld [vmem:[%s2437_s15 + $0x18] sm:$0xff]  ;;  %v2469_v23 = vld [vmem:[%s2437_s15 + $0x20] sm:$0xff]  ;;  %v630_v24 = vld [vmem:[%s2901_s1 + $0x8] sm:$0xff]  ;;  %s2708_s19 = scalar_lea.vmem [#allocation2], %s1677_s17  ;;  %p1678_p11 = scmp.ne.s32.totalorder %s2166_s12, 2 }
  0x77   : > { %1792 = vmatpush3.bf16.msra.mxu0 %v2440_v14  ;;  %v629_v25 = vld [vmem:[%s2901_s1] sm:$0xff]  ;;  %v2480_v26 = vld [vmem:[%s2437_s15 + $0x28] sm:$0xff]  ;;  %v2495_v32 = vld [vmem:[%s2437_s15 + $0x30] sm:$0xff] }
  0x78   : > { %1793 = vmatprep.subr.bf16.mxu0 %v2443_v15  ;;  %682 = vperm.xlu1 %1973, %v636_v13   ;;  %v642_v27 = vld [vmem:[%s2901_s1 + $0x68] sm:$0xff]  ;;  %v1974_v28 = vld [vmem:[%s2372_s22 + $0x40] sm:$0xff]   ;;  %v632_v33 = vld [vmem:[%s2901_s1 + $0x18] sm:$0xff] }
  0x79   : > { %672 = vperm.xlu0 %1972, %v634_v17   ;;  %v1975_v29 = vld [vmem:[%s2372_s22] sm:$0xff]   ;;  %1855 = vmatprep.subr.bf16.mxu1 %v1974_v28  ;;  %v1976_v31 = vld [vmem:[%s2372_s22 + $0x48] sm:$0xff]   ;;  %v631_v35 = vld [vmem:[%s2901_s1 + $0x10] sm:$0xff] }
  0x7a   : > { %v641_v30 = vld [vmem:[%s2901_s1 + $0x60] sm:$0xff]  ;;  %1863 = vmatpush3.bf16.msra.mxu1 %v1975_v29  ;;  %v1977_v34 = vld [vmem:[%s2372_s22 + $0x8] sm:$0xff]   ;;  %v1978_v36 = vld [vmem:[%s2372_s22 + $0x50] sm:$0xff]  }
  0x7b   : > { %1794 = vmatpush3.bf16.msra.mxu0 %v2443_v15  ;;  %1856 = vmatprep.subr.bf16.mxu1 %v1976_v31  ;;  %v2508_v37 = vld [vmem:[%s2437_s15 + $0x38] sm:$0xff]  ;;  %v1979_v39 = vld [vmem:[%s2372_s22 + $0x10] sm:$0xff]   ;;  %v521_v41 = vld [vmem:[#allocation4 + $0x8] sm:$0xff] }
  0x7c   : > { %1795 = vmatprep.subr.bf16.mxu0 %v497_v16  ;;  %692 = vperm.xlu1 %1973, %v638_v18   ;;  %v644_v38 = vld [vmem:[%s2901_s1 + $0x78] sm:$0xff]  ;;  %v643_v40 = vld [vmem:[%s2901_s1 + $0x70] sm:$0xff]  ;;  %v1982_v45 = vld [vmem:[%s2372_s22 + $0x60] sm:$0xff]   ;;  %v526_v46 = vunpack.c.l.s8.bf16 %v521_v41  ;;  %v527_v50 = vunpack.c.h.s8.bf16 %v521_v41 }
  0x7d   : > { %687 = vperm.xlu0 %1972, %v637_v19   ;;  %v1980_v42 = vld [vmem:[%s2372_s22 + $0x58] sm:$0xff]   ;;  %v1983_v47 = vld [vmem:[%s2372_s22 + $0x20] sm:$0xff]   ;;  %v1984_v48 = vld [vmem:[%s2372_s22 + $0x68] sm:$0xff]  }
  0x7e   : > { %1864 = vmatpush3.bf16.msra.mxu1 %v1977_v34  ;;  %v1981_v43 = vld [vmem:[%s2372_s22 + $0x18] sm:$0xff]   ;;  %v522_v49 = vld [vmem:[#allocation4 + $0x10] sm:$0xff]  ;;  %v1985_v51 = vld [vmem:[%s2372_s22 + $0x28] sm:$0xff]  }
  0x7f   : > { %1796 = vmatpush3.bf16.msra.mxu0 %v497_v16  ;;  %1857 = vmatprep.subr.bf16.mxu1 %v1978_v36  ;;  %v528_v52 = vunpack.c.l.s8.bf16 %v522_v49  ;;  %v1986_v53 = vld [vmem:[%s2372_s22 + $0x70] sm:$0xff]   ;;  %v523_v54 = vld [vmem:[#allocation4 + $0x18] sm:$0xff]  ;;  %v529_v55 = vunpack.c.h.s8.bf16 %v522_v49 }
  0x80   : > { %1797 = vmatprep.subr.bf16.mxu0 %v2460_v20  ;;  %702 = vperm.xlu1 %1973, %v640_v21   ;;  %v530_v56 = vunpack.c.l.s8.bf16 %v523_v54  ;;  %v531_v57 = vunpack.c.h.s8.bf16 %v523_v54  ;;  %v1987_v58 = vld [vmem:[%s2372_s22 + $0x30] sm:$0xff]   ;;  %v1988_v59 = vld [vmem:[%s2372_s22 + $0x78] sm:$0xff]  }
  0x81   : > { %697 = vperm.xlu0 %1972, %v639_v22   ;;  %v1989_v60 = vld [vmem:[%s2372_s22 + $0x38] sm:$0xff]  }
  0x82   : > { %1865 = vmatpush3.bf16.msra.mxu1 %v1979_v39 }
  0x83   : > { %1798 = vmatpush3.bf16.msra.mxu0 %v2460_v20  ;;  %1858 = vmatprep.subr.bf16.mxu1 %v1980_v42 }
  0x84   : > { %1799 = vmatprep.subr.bf16.mxu0 %v2469_v23  ;;  %652 = vperm.xlu1 %1973, %v630_v24  }
  0x85   : > { %647 = vperm.xlu0 %1972, %v629_v25  }
  0x86   : > { %1866 = vmatpush3.bf16.msra.mxu1 %v1981_v43 }
  0x87   : > { %1800 = vmatpush3.bf16.msra.mxu0 %v2469_v23  ;;  %1859 = vmatprep.subr.bf16.mxu1 %v1982_v45 }
  0x88   : > { %1801 = vmatprep.subr.bf16.mxu0 %v2480_v26  ;;  %712 = vperm.xlu1 %1973, %v642_v27  }
  0x89   : > { %707 = vperm.xlu0 %1972, %v641_v30  }
  0x8a   : > { %1867 = vmatpush3.bf16.msra.mxu1 %v1983_v47 }
  0x8b   : > { %1802 = vmatpush3.bf16.msra.mxu0 %v2480_v26  ;;  %1860 = vmatprep.subr.bf16.mxu1 %v1984_v48 }
  0x8c   : > { %1803 = vmatprep.subr.bf16.mxu0 %v2495_v32  ;;  %662 = vperm.xlu1 %1973, %v632_v33  }
  0x8d   : > { %657 = vperm.xlu0 %1972, %v631_v35  }
  0x8e   : > { %1868 = vmatpush3.bf16.msra.mxu1 %v1985_v51 }
  0x8f   : > { %1804 = vmatpush3.bf16.msra.mxu0 %v2495_v32  ;;  %1861 = vmatprep.subr.bf16.mxu1 %v1986_v53 }
  0x90   : > { %1805 = vmatprep.subr.bf16.mxu0 %v2508_v37  ;;  %722 = vperm.xlu1 %1973, %v644_v38  }
  0x91   : > { %717 = vperm.xlu0 %1972, %v643_v40  }
  0x92   : > { %1869 = vmatpush3.bf16.msra.mxu1 %v1987_v58 }
  0x93   : > { %1806 = vmatpush3.bf16.msra.mxu0 %v2508_v37  ;;  %1862 = vmatprep.subr.bf16.mxu1 %v1988_v59 }
  0x94   : > { %1711 = vmatprep.subr.bf16.mxu0 %v1974_v28 }
  0x96   : > { %1808 = vmatmul.mubr.bf16.vlgmr.msra.gmra.mrb[0].mxu0 %v525_v44  ;;  %1870 = vmatpush3.bf16.msra.mxu1 %v1989_v60 }
  0x97   : > { %1811 = vmatprep.mubr.bf16.mxu0 %v526_v46  ;;  %1712 = vmatpush3.bf16.msra.mxu0 %v1975_v29 }
  0x98   : > { %1713 = vmatprep.subr.bf16.mxu0 %v1976_v31 }
  0x9b   : > { %1714 = vmatpush3.bf16.msra.mxu0 %v1977_v34 }
  0x9c   : > { %1715 = vmatprep.subr.bf16.mxu0 %v1978_v36 }
  0x9e   : > { %1812 = vmatmul.mubr.bf16.gmra.mrb[4].mxu0 %v527_v50 }
  0x9f   : > { %1815 = vmatprep.mubr.bf16.mxu0 %v528_v52  ;;  %1716 = vmatpush3.bf16.msra.mxu0 %v1979_v39 }
  0xa0   : > { %1717 = vmatprep.subr.bf16.mxu0 %v1980_v42 }
  0xa3   : > { %1718 = vmatpush3.bf16.msra.mxu0 %v1981_v43 }
  0xa4   : > { %1719 = vmatprep.subr.bf16.mxu0 %v1982_v45 }
  0xa6   : > { %1816 = vmatmul.mubr.bf16.gmra.mrb[8].mxu0 %v529_v55 }
  0xa7   : > { %1819 = vmatprep.mubr.bf16.mxu0 %v530_v56  ;;  %1720 = vmatpush3.bf16.msra.mxu0 %v1983_v47 }
  0xa8   : > { %1721 = vmatprep.subr.bf16.mxu0 %v1984_v48 }
  0xab   : > { %1722 = vmatpush3.bf16.msra.mxu0 %v1985_v51 }
  0xac   : > { %1723 = vmatprep.subr.bf16.mxu0 %v1986_v53 }
  0xae   : > { %1820 = vmatmul.mubr.bf16.gmra.mrb[12].mxu0 %v531_v57  ;;  %v2543_v57 = vld [vmem:[%s391_s27] ss:$0 sm:$0xff] }
  0xaf   : > { %916 = vmatprep.mubr.bf16.mxu0 %v2440_v14  ;;  %1724 = vmatpush3.bf16.msra.mxu0 %v1987_v58 }
  0xb0   : > { %1725 = vmatprep.subr.bf16.mxu0 %v1988_v59 }
  0xb3   : > { %1726 = vmatpush3.bf16.msra.mxu0 %v1989_v60 }
  0xf3   : > { %v678_v61 = vpop.permute.xlu1 %677  ;;  %v668_v62 = vpop.permute.xlu0 %667 }
  0xf7   : > { %v683_v63 = vpop.permute.xlu1 %682 }
  0xf8   : > { %v673_v0 = vpop.permute.xlu0 %672 }
  0xfb   : > { %v693_v1 = vpop.permute.xlu1 %692 }
  0xfc   : > { %v688_v2 = vpop.permute.xlu0 %687 }
  0xff   : > { %v703_v3 = vpop.permute.xlu1 %702 }
 0x100   : > { %v698_v4 = vpop.permute.xlu0 %697 }
 0x103   : > { %v653_v5 = vpop.permute.xlu1 %652 }
 0x104   : > { %v648_v6 = vpop.permute.xlu0 %647 }
 0x107   : > { %v713_v7 = vpop.permute.xlu1 %712 }
 0x108   : > { %v708_v8 = vpop.permute.xlu0 %707 }
 0x10b   : > { %v663_v10 = vpop.permute.xlu1 %662 }
 0x10c   : > { %v658_v12 = vpop.permute.xlu0 %657 }
 0x10f   : > { %v723_v47 = vpop.permute.xlu1 %722 }
 0x110   : > { %v718_v49 = vpop.permute.xlu0 %717 }
 0x169   : > { %v1809_v9 = vpop.f32.mrb[0].mxu0 }
 0x16a   : > { %v566_v11 = vpop.f32.mrb[1].mxu0  ;;  %v727_v14 = vmul.f32 %v1809_v9, %v658_v12 }
 0x16b   : > { %v1810_v13 = vpop.f32.mrb[2].mxu0  ;;  %v725_v18 = vmul.f32 %v648_v6, %v566_v11 }
 0x16c   : > { %v728_v16 = vmul.f32 %v1810_v13, %v663_v10  ;;  %v569_v17 = vpop.f32.mrb[3].mxu0 }
 0x16d   : > { %v726_v19 = vmul.f32 %v653_v5, %v569_v17 }
 0x16e   : > { %v742_v21 = vpack.c.bf16 %v728_v16, %v727_v14 }
 0x16f   : > { %v741_v22 = vpack.c.bf16 %v726_v19, %v725_v18 }
 0x171   : > { %v1813_v24 = vpop.f32.mrb[4].mxu0  ;;  %917 = vmatmul.mubr.bf16.vlgmr.msra.gmra.mrb[16].mxu0 %v741_v22 }
 0x172   : > { %v582_v25 = vpop.f32.mrb[5].mxu0  ;;  %924 = vmatprep.mubr.bf16.mxu0 %v2443_v15  ;;  %v731_v28 = vmul.f32 %v1813_v24, %v678_v61 }
 0x173   : > { %v1814_v27 = vpop.f32.mrb[6].mxu0  ;;  %v729_v31 = vmul.f32 %v668_v62, %v582_v25 }
 0x174   : > { %v732_v29 = vmul.f32 %v1814_v27, %v683_v63  ;;  %v585_v30 = vpop.f32.mrb[7].mxu0 }
 0x175   : > { %v730_v33 = vmul.f32 %v673_v0, %v585_v30 }
 0x176   : > { %v744_v34 = vpack.c.bf16 %v732_v29, %v731_v28 }
 0x177   : > { %v743_v35 = vpack.c.bf16 %v730_v33, %v729_v31 }
 0x179   : > { %v1817_v36 = vpop.f32.mrb[8].mxu0  ;;  %925 = vmatmul.mubr.bf16.gmra.mrb[20].mxu0 %v742_v21  ;;  %933 = vmatmul.mubr.bf16.vlgmr.msra.gmra.mrb[0].mxu1 %v743_v35 }
 0x17a   : > { %v598_v38 = vpop.f32.mrb[9].mxu0  ;;  %940 = vmatprep.mubr.bf16.mxu1 %v2460_v20  ;;  %v735_v40 = vmul.f32 %v1817_v36, %v698_v4 }
 0x17b   : > { %v1818_v39 = vpop.f32.mrb[10].mxu0  ;;  %v733_v43 = vmul.f32 %v688_v2, %v598_v38 }
 0x17c   : > { %v736_v41 = vmul.f32 %v1818_v39, %v703_v3  ;;  %v601_v42 = vpop.f32.mrb[11].mxu0 }
 0x17d   : > { %v734_v15 = vmul.f32 %v693_v1, %v601_v42 }
 0x17e   : > { %v746_v44 = vpack.c.bf16 %v736_v41, %v735_v40 }
 0x17f   : > { %v745_v45 = vpack.c.bf16 %v734_v15, %v733_v43 }
 0x181   : > { %v1821_v46 = vpop.f32.mrb[12].mxu0  ;;  %941 = vmatmul.mubr.bf16.gmra.mrb[4].mxu1 %v744_v34 }
 0x182   : > { %v614_v48 = vpop.f32.mrb[13].mxu0  ;;  %948 = vmatprep.mubr.bf16.mxu1 %v2469_v23  ;;  %v739_v51 = vmul.f32 %v1821_v46, %v718_v49 }
 0x183   : > { %v1822_v50 = vpop.f32.mrb[14].mxu0  ;;  %v737_v53 = vmul.f32 %v708_v8, %v614_v48 }
 0x184   : > { %v740_v52 = vmul.f32 %v1822_v50, %v723_v47  ;;  %v617_v20 = vpop.f32.mrb[15].mxu0 }
 0x185   : > { %v738_v54 = vmul.f32 %v713_v7, %v617_v20 }
 0x186   : > { %v748_v55 = vpack.c.bf16 %v740_v52, %v739_v51 }
 0x187   : > { %v747_v56 = vpack.c.bf16 %v738_v54, %v737_v53 }
 0x189   : > { %949 = vmatmul.mubr.bf16.gmra.mrb[8].mxu1 %v745_v45 }
 0x18a   : > { %956 = vmatprep.mubr.bf16.mxu1 %v2480_v26 }
 0x191   : > { %957 = vmatmul.mubr.bf16.gmra.mrb[12].mxu1 %v746_v44 }
 0x192   : > { %964 = vmatprep.mubr.bf16.mxu1 %v2495_v32 }
 0x199   : > { %965 = vmatmul.mubr.bf16.gmra.mrb[16].mxu1 %v747_v56 }
 0x19a   : > { %972 = vmatprep.mubr.bf16.mxu1 %v2508_v37 }
 0x1a1   : > { %973 = vmatmul.mubr.bf16.gmra.mrb[20].mxu1 %v748_v55 }
 0x244   : > { %v1727_v23 = vpop.f32.mrb[16].mxu0 }
 0x245   : > { %v1728_v58 = vpop.f32.mrb[17].mxu0 }
 0x246   : > { %v1729_v59 = vadd.f32 %v1728_v58, %v1727_v23  ;;  %v1730_v60 = vpop.f32.mrb[18].mxu0 }
 0x247   : > { %v1731_v61 = vpop.f32.mrb[19].mxu0 }
 0x248   : > { %v2546_v26 = vadd.f32 %v1729_v59, %v2543_v57  ;;  %v1732_v62 = vadd.f32 %v1731_v61, %v1730_v60 }
 0x24a   : > { %v2549_v32 = vadd.f32 %v1732_v62, %v2543_v57  ;;  %981 = vadd.xlane.f32.xlu0 %v2546_v26  ;;  %v1029_v7 = vmul.f32 %v2546_v26, %v2546_v26 }
 0x24c   : > { %v1733_v37 = vpop.f32.mrb[20].mxu0  ;;  %v1739_v63 = vpop.f32.mrb[0].mxu1  ;;  %983 = vadd.xlane.f32.xlu1 %v2549_v32  ;;  %v1030_v0 = vmul.f32 %v2549_v32, %v2549_v32 }
 0x24d   : > { %v1734_v1 = vpop.f32.mrb[21].mxu0  ;;  %v1740_v2 = vpop.f32.mrb[1].mxu1 }
 0x24e   : > { %v1735_v3 = vadd.f32 %v1734_v1, %v1733_v37  ;;  %v1741_v4 = vadd.f32 %v1740_v2, %v1739_v63  ;;  %v1736_v5 = vpop.f32.mrb[22].mxu0  ;;  %v1742_v6 = vpop.f32.mrb[2].mxu1  ;;  %1047 = vadd.xlane.f32.xlu0 %v1030_v0 }
 0x24f   : > { %v1737_v8 = vpop.f32.mrb[23].mxu0  ;;  %v1743_v9 = vpop.f32.mrb[3].mxu1 }
 0x250   : > { %v2558_v10 = vadd.f32 %v1735_v3, %v2543_v57  ;;  %v1738_v11 = vadd.f32 %v1737_v8, %v1736_v5  ;;  %v1744_v12 = vadd.f32 %v1743_v9, %v1742_v6  ;;  %1045 = vadd.xlane.f32.xlu1 %v1029_v7  ;;  %v2561_v13 = vadd.f32 %v1741_v4, %v2543_v57 }
 0x252   : > { %985 = vadd.xlane.f32.xlu0 %v2558_v10  ;;  %v2565_v14 = vadd.f32 %v1738_v11, %v2543_v57  ;;  %v1031_v21 = vmul.f32 %v2558_v10, %v2558_v10  ;;  %v2572_v24 = vadd.f32 %v1744_v12, %v2543_v57  ;;  %v1033_v27 = vmul.f32 %v2561_v13, %v2561_v13 }
 0x254   : > { %v1745_v16 = vpop.f32.mrb[4].mxu1  ;;  %989 = vadd.xlane.f32.xlu1 %v2561_v13  ;;  %v1032_v29 = vmul.f32 %v2565_v14, %v2565_v14  ;;  %v1034_v38 = vmul.f32 %v2572_v24, %v2572_v24 }
 0x255   : > { %v1746_v17 = vpop.f32.mrb[5].mxu1 }
 0x256   : > { %v1747_v18 = vadd.f32 %v1746_v17, %v1745_v16  ;;  %v1748_v19 = vpop.f32.mrb[6].mxu1  ;;  %987 = vadd.xlane.f32.xlu0 %v2565_v14 }
 0x257   : > { %v1749_v22 = vpop.f32.mrb[7].mxu1 }
 0x258   : > { %v1750_v25 = vadd.f32 %v1749_v22, %v1748_v19  ;;  %1049 = vadd.xlane.f32.xlu1 %v1031_v21  ;;  %v2580_v31 = vadd.f32 %v1747_v18, %v2543_v57 }
 0x25a   : > { %991 = vadd.xlane.f32.xlu0 %v2572_v24  ;;  %v1035_v39 = vmul.f32 %v2580_v31, %v2580_v31  ;;  %v2588_v40 = vadd.f32 %v1750_v25, %v2543_v57 }
 0x25c   : > { %v1751_v28 = vpop.f32.mrb[8].mxu1  ;;  %1053 = vadd.xlane.f32.xlu1 %v1033_v27  ;;  %v1036_v47 = vmul.f32 %v2588_v40, %v2588_v40 }
 0x25d   : > { %v1752_v30 = vpop.f32.mrb[9].mxu1 }
 0x25e   : > { %v1753_v33 = vadd.f32 %v1752_v30, %v1751_v28  ;;  %v1754_v34 = vpop.f32.mrb[10].mxu1  ;;  %1051 = vadd.xlane.f32.xlu0 %v1032_v29 }
 0x25f   : > { %v1755_v35 = vpop.f32.mrb[11].mxu1 }
 0x260   : > { %v1756_v36 = vadd.f32 %v1755_v35, %v1754_v34  ;;  %993 = vadd.xlane.f32.xlu1 %v2580_v31  ;;  %v2591_v43 = vadd.f32 %v1753_v33, %v2543_v57 }
 0x262   : > { %1055 = vadd.xlane.f32.xlu0 %v1034_v38  ;;  %v1037_v48 = vmul.f32 %v2591_v43, %v2591_v43  ;;  %v2600_v49 = vadd.f32 %v1756_v36, %v2543_v57 }
 0x264   : > { %v1757_v41 = vpop.f32.mrb[12].mxu1  ;;  %1057 = vadd.xlane.f32.xlu1 %v1035_v39  ;;  %v1038_v56 = vmul.f32 %v2600_v49, %v2600_v49 }
 0x265   : > { %v1758_v42 = vpop.f32.mrb[13].mxu1 }
 0x266   : > { %v1759_v15 = vadd.f32 %v1758_v42, %v1757_v41  ;;  %v1760_v44 = vpop.f32.mrb[14].mxu1  ;;  %995 = vadd.xlane.f32.xlu0 %v2588_v40 }
 0x267   : > { %v1761_v45 = vpop.f32.mrb[15].mxu1 }
 0x268   : > { %v1762_v46 = vadd.f32 %v1761_v45, %v1760_v44  ;;  %997 = vadd.xlane.f32.xlu1 %v2591_v43  ;;  %v2603_v52 = vadd.f32 %v1759_v15, %v2543_v57 }
 0x26a   : > { %1059 = vadd.xlane.f32.xlu0 %v1036_v47  ;;  %v1039_v23 = vmul.f32 %v2603_v52, %v2603_v52  ;;  %v2612_v58 = vadd.f32 %v1762_v46, %v2543_v57 }
 0x26c   : > { %1061 = vadd.xlane.f32.xlu1 %v1037_v48  ;;  %v1763_v50 = vpop.f32.mrb[16].mxu1  ;;  %v1040_v1 = vmul.f32 %v2612_v58, %v2612_v58 }
 0x26d   : > { %v1764_v51 = vpop.f32.mrb[17].mxu1 }
 0x26e   : > { %v1765_v20 = vadd.f32 %v1764_v51, %v1763_v50  ;;  %999 = vadd.xlane.f32.xlu0 %v2600_v49  ;;  %v1766_v53 = vpop.f32.mrb[18].mxu1 }
 0x26f   : > { %v1767_v54 = vpop.f32.mrb[19].mxu1 }
 0x270   : > { %v1768_v55 = vadd.f32 %v1767_v54, %v1766_v53  ;;  %1001 = vadd.xlane.f32.xlu1 %v2603_v52  ;;  %v2615_v61 = vadd.f32 %v1765_v20, %v2543_v57 }
 0x272   : > { %1063 = vadd.xlane.f32.xlu0 %v1038_v56  ;;  %v1041_v2 = vmul.f32 %v2615_v61, %v2615_v61  ;;  %v2624_v3 = vadd.f32 %v1768_v55, %v2543_v57 }
 0x274   : > { %1065 = vadd.xlane.f32.xlu1 %v1039_v23  ;;  %v1769_v59 = vpop.f32.mrb[20].mxu1  ;;  %v1042_v5 = vmul.f32 %v2624_v3, %v2624_v3 }
 0x275   : > { %v1770_v60 = vpop.f32.mrb[21].mxu1 }
 0x276   : > { %v1771_v62 = vadd.f32 %v1770_v60, %v1769_v59  ;;  %1003 = vadd.xlane.f32.xlu0 %v2612_v58  ;;  %v1772_v37 = vpop.f32.mrb[22].mxu1 }
 0x277   : > { %v1773_v63 = vpop.f32.mrb[23].mxu1 }
 0x278   : > { %v1774_v0 = vadd.f32 %v1773_v63, %v1772_v37  ;;  %1005 = vadd.xlane.f32.xlu1 %v2615_v61  ;;  %v2627_v4 = vadd.f32 %v1771_v62, %v2543_v57  ;;  %v2667_v37 = vld [vmem:[%s2905_s5] ss:$0 sm:$0xff] }
 0x27a   : > { %1067 = vadd.xlane.f32.xlu0 %v1040_v1  ;;  %v1043_v6 = vmul.f32 %v2627_v4, %v2627_v4  ;;  %v2636_v7 = vadd.f32 %v1774_v0, %v2543_v57 }
 0x27c   : > { %1069 = vadd.xlane.f32.xlu1 %v1041_v2  ;;  %v1044_v8 = vmul.f32 %v2636_v7, %v2636_v7 }
 0x27e   : > { %1007 = vadd.xlane.f32.xlu0 %v2624_v3 }
 0x280   : > { %1009 = vadd.xlane.f32.xlu1 %v2627_v4 }
 0x282   : > { %1071 = vadd.xlane.f32.xlu0 %v1042_v5 }
 0x284   : > { %1073 = vadd.xlane.f32.xlu1 %v1043_v6 }
 0x286   : > { %1011 = vadd.xlane.f32.xlu0 %v2636_v7 }
 0x28a   : > { %1075 = vadd.xlane.f32.xlu0 %v1044_v8 }
 0x2d7   : > { %v982_v9 = vpop.xlane.xlu0 %981 }
 0x2d8   : > { %v1013_v12 = vmul.f32 0.03125, %v982_v9 }
 0x2d9   : > { %v984_v11 = vpop.xlane.xlu1 %983 }
 0x2da   : > { %v1014_v16 = vmul.f32 0.03125, %v984_v11  ;;  %v1093_v22 = vmul.f32 %v1013_v12, %v1013_v12  ;;  %v1141_v2 = vsub.f32 %v2546_v26, %v1013_v12 }
 0x2db   : > { %v1048_v17 = vpop.xlane.xlu0 %1047 }
 0x2dc   : > { %v1094_v18 = vmul.f32 %v1014_v16, %v1014_v16  ;;  %v1078_v19 = vmul.f32 0.03125, %v1048_v17  ;;  %v1142_v23 = vsub.f32 %v2549_v32, %v1014_v16  ;;  %v2675_v32 = vld [vmem:[%s2906_s6] ss:$0 sm:$0xff] }
 0x2dd   : > { %v1046_v21 = vpop.xlane.xlu1 %1045 }
 0x2de   : > { %v1110_v25 = vsub.f32 %v1078_v19, %v1094_v18  ;;  %v1077_v27 = vmul.f32 0.03125, %v1046_v21 }
 0x2df   : > { %v986_v57 = vpop.xlane.xlu0 %985 }
 0x2e0   : > { %v1126_v28 = vmax.f32 %v1110_v25, 0.0  ;;  %v1109_v29 = vsub.f32 %v1077_v27, %v1093_v22  ;;  %v2641_v35 = vmul.f32 0.03125, %v986_v57 }
 0x2e1   : > { %v990_v30 = vpop.xlane.xlu1 %989 }
 0x2e2   : > { %v1158_v33 = vadd.f32 1e-05, %v1126_v28  ;;  %v1125_v34 = vmax.f32 %v1109_v29, 0.0  ;;  %v1095_v41 = vmul.f32 %v2641_v35, %v2641_v35  ;;  %v2645_v42 = vmul.f32 0.03125, %v990_v30 }
 0x2e3   : > { %v988_v36 = vpop.xlane.xlu0 %987  ;;  %v2690_v29 = vstv %s1253_s3 }
 0x2e4   : > { %1990 = vrsqrt.f32 %v1158_v33  ;;  %v1157_v38 = vadd.f32 1e-05, %v1125_v34  ;;  %v2647_v45 = vmul.f32 0.03125, %v988_v36  ;;  %v1097_v48 = vmul.f32 %v2645_v42, %v2645_v42 }
 0x2e5   : > { %v1050_v39 = vpop.xlane.xlu1 %1049 }
 0x2e6   : > { %1992 = vrsqrt.f32 %v1157_v38  ;;  %v1079_v15 = vmul.f32 0.03125, %v1050_v39  ;;  %v1096_v53 = vmul.f32 %v2647_v45, %v2647_v45 }
 0x2e7   : > { %v992_v44 = vpop.xlane.xlu0 %991 }
 0x2e8   : > { %v1111_v46 = vsub.f32 %v1079_v15, %v1095_v41  ;;  %v2662_v59 = vmul.f32 0.03125, %v992_v44 }
 0x2e9   : > { %v1054_v47 = vpop.xlane.xlu1 %1053 }
 0x2ea   : > { %v1127_v50 = vmax.f32 %v1111_v46, 0.0  ;;  %v1081_v51 = vmul.f32 0.03125, %v1054_v47  ;;  %v1098_v18 = vmul.f32 %v2662_v59, %v2662_v59  ;;  %v1143_v46 = vsub.f32 %v2558_v10, %v2641_v35 }
 0x2eb   : > { %v1052_v20 = vpop.xlane.xlu0 %1051  ;;  %v1145_v10 = vsub.f32 %v2561_v13, %v2645_v42 }
 0x2ec   : > { %v1159_v54 = vadd.f32 1e-05, %v1127_v50  ;;  %v1113_v55 = vsub.f32 %v1081_v51, %v1097_v48  ;;  %v1080_v56 = vmul.f32 0.03125, %v1052_v20 }
 0x2ed   : > { %v994_v60 = vpop.xlane.xlu1 %993 }
 0x2ee   : > { %v1991_v62 = vpop.eup %1990  ;;  %1994 = vrsqrt.f32 %v1159_v54  ;;  %v1129_v63 = vmax.f32 %v1113_v55, 0.0  ;;  %v1112_v0 = vsub.f32 %v1080_v56, %v1096_v53  ;;  %v2669_v1 = vmul.f32 0.03125, %v994_v60 }
 0x2ef   : > { %v1190_v5 = vmul.f32 %v1991_v62, %v1142_v23  ;;  %v1056_v6 = vpop.xlane.xlu0 %1055 }
 0x2f0   : > { %v1993_v8 = vpop.eup %1992  ;;  %v1161_v9 = vadd.f32 1e-05, %v1129_v63  ;;  %v1128_v11 = vmax.f32 %v1112_v0, 0.0  ;;  %v1082_v19 = vmul.f32 0.03125, %v1056_v6  ;;  %v1099_v21 = vmul.f32 %v2669_v1, %v2669_v1 }
 0x2f1   : > { %v1213_v16 = vmul.f32 %v2667_v37, %v1190_v5  ;;  %v1189_v17 = vmul.f32 %v1993_v8, %v1141_v2  ;;  %v1058_v26 = vpop.xlane.xlu1 %1057  ;;  %v1144_v6 = vsub.f32 %v2565_v14, %v2647_v45  ;;  %v1146_v14 = vsub.f32 %v2572_v24, %v2662_v59 }
 0x2f2   : > { %1996 = vrsqrt.f32 %v1161_v9  ;;  %v1160_v12 = vadd.f32 1e-05, %v1128_v11  ;;  %v1083_v22 = vmul.f32 0.03125, %v1058_v26  ;;  %v1114_v57 = vsub.f32 %v1082_v19, %v1098_v18 }
 0x2f3   : > { %v1236_v25 = vadd.f32 %v2675_v32, %v1213_v16  ;;  %v1212_v27 = vmul.f32 %v2667_v37, %v1189_v17  ;;  %v996_v28 = vpop.xlane.xlu0 %995 }
 0x2f4   : > { %1998 = vrsqrt.f32 %v1160_v12  ;;  %v1115_v30 = vsub.f32 %v1083_v22, %v1099_v21  ;;  %v2692_v33 = vmul.f32 0.03125, %v996_v28  ;;  %v1130_v36 = vmax.f32 %v1114_v57, 0.0 }
 0x2f5   : > { %v1235_v34 = vadd.f32 %v2675_v32, %v1212_v27  ;;  %v998_v38 = vpop.xlane.xlu1 %997  ;;  %v1256_v15 = vmax.f32 %v1236_v25, %v2690_v29 }
 0x2f6   : > { %v1131_v39 = vmax.f32 %v1115_v30, 0.0  ;;  %v2696_v41 = vmul.f32 0.03125, %v998_v38  ;;  %v1162_v47 = vadd.f32 1e-05, %v1130_v36  ;;  %v1100_v20 = vmul.f32 %v2692_v33, %v2692_v33 }
 0x2f7   : > { %v1255_v44 = vmax.f32 %v1235_v34, %v2690_v29  ;;  %v1060_v48 = vpop.xlane.xlu0 %1059  ;;  %v1147_v38 = vsub.f32 %v2580_v31, %v2669_v1 }
 0x2f8   : > { %v1995_v50 = vpop.eup %1994  ;;  %v1163_v51 = vadd.f32 1e-05, %v1131_v39  ;;  %v1084_v53 = vmul.f32 0.03125, %v1060_v48  ;;  %2000 = vrsqrt.f32 %v1162_v47  ;;  %v1101_v23 = vmul.f32 %v2696_v41, %v2696_v41 }
 0x2f9   : > { %v2704_v54 = vpack.c.bf16 %v1256_v15, %v1255_v44  ;;  %v1191_v55 = vmul.f32 %v1995_v50, %v1143_v46  ;;  %v1062_v56 = vpop.xlane.xlu1 %1061 }
 0x2fa   : > { %2002 = vrsqrt.f32 %v1163_v51  ;;  %v1116_v60 = vsub.f32 %v1084_v53, %v1100_v20  ;;  %v1085_v62 = vmul.f32 0.03125, %v1062_v56 }
 0x2fb   : > { %1284 = vst [vmem:[%s2708_s19] sm:$0xff] %v2704_v54  ;;  %v1000_v35 = vpop.xlane.xlu0 %999  ;;  %v1214_v8 = vmul.f32 %v2667_v37, %v1191_v55  ;;  %1839 = vmatprep.mubr.bf16.mxu0 (!%p1678_p11), %v2704_v54  ;;  %v2026_v54 = vld [vmem:[%s2907_s7 + $0x20] sm:$0xff] (!%p1678_p11)  }
 0x2fc   : > { %v1997_v63 = vpop.eup %1996  ;;  %v1132_v0 = vmax.f32 %v1116_v60, 0.0  ;;  %v1117_v2 = vsub.f32 %v1085_v62, %v1101_v23  ;;  %v2714_v5 = vmul.f32 0.03125, %v1000_v35 }
 0x2fd   : > { %v1193_v9 = vmul.f32 %v1997_v63, %v1145_v10  ;;  %v1002_v11 = vpop.xlane.xlu1 %1001  ;;  %v1237_v22 = vadd.f32 %v2675_v32, %v1214_v8 }
 0x2fe   : > { %v1999_v16 = vpop.eup %1998  ;;  %v1164_v17 = vadd.f32 1e-05, %v1132_v0  ;;  %v1133_v18 = vmax.f32 %v1117_v2, 0.0  ;;  %v2719_v26 = vmul.f32 0.03125, %v1002_v11  ;;  %v1102_v12 = vmul.f32 %v2714_v5, %v2714_v5 }
 0x2ff   : > { %v1192_v19 = vmul.f32 %v1999_v16, %v1144_v6  ;;  %v1064_v13 = vpop.xlane.xlu0 %1063  ;;  %v1216_v45 = vmul.f32 %v2667_v37, %v1193_v9  ;;  %v1257_v47 = vmax.f32 %v1237_v22, %v2690_v29  ;;  %v1148_v2 = vsub.f32 %v2588_v40, %v2692_v33 }
 0x300   : > { %2004 = vrsqrt.f32 %v1164_v17  ;;  %v1165_v42 = vadd.f32 1e-05, %v1133_v18  ;;  %v1086_v21 = vmul.f32 0.03125, %v1064_v13  ;;  %v1103_v57 = vmul.f32 %v2719_v26, %v2719_v26 }
 0x301   : > { %v1215_v25 = vmul.f32 %v2667_v37, %v1192_v19  ;;  %v1066_v27 = vpop.xlane.xlu1 %1065  ;;  %v1239_v48 = vadd.f32 %v2675_v32, %v1216_v45  ;;  %v1149_v18 = vsub.f32 %v2591_v43, %v2696_v41 }
 0x302   : > { %2006 = vrsqrt.f32 %v1165_v42  ;;  %v1118_v28 = vsub.f32 %v1086_v21, %v1102_v12  ;;  %v1087_v30 = vmul.f32 0.03125, %v1066_v27  ;;  %v2001_v34 = vpop.eup %2000 }
 0x303   : > { %v1238_v36 = vadd.f32 %v2675_v32, %v1215_v25  ;;  %v1004_v39 = vpop.xlane.xlu0 %1003  ;;  %v1194_v24 = vmul.f32 %v2001_v34, %v1146_v14  ;;  %v1259_v63 = vmax.f32 %v1239_v48, %v2690_v29 }
 0x304   : > { %v2003_v15 = vpop.eup %2002  ;;  %v1134_v59 = vmax.f32 %v1118_v28, 0.0  ;;  %v1119_v44 = vsub.f32 %v1087_v30, %v1103_v57  ;;  %v2733_v46 = vmul.f32 0.03125, %v1004_v39 }
 0x305   : > { %v1258_v50 = vmax.f32 %v1238_v36, %v2690_v29  ;;  %v1195_v51 = vmul.f32 %v2003_v15, %v1147_v38  ;;  %v1006_v20 = vpop.xlane.xlu1 %1005  ;;  %v1217_v53 = vmul.f32 %v2667_v37, %v1194_v24  ;;  %v1150_v24 = vsub.f32 %v2600_v49, %v2714_v5 }
 0x306   : > { %v1166_v55 = vadd.f32 1e-05, %v1134_v59  ;;  %v1135_v31 = vmax.f32 %v1119_v44, 0.0  ;;  %v1104_v56 = vmul.f32 %v2733_v46, %v2733_v46  ;;  %v2743_v23 = vmul.f32 0.03125, %v1006_v20 }
 0x307   : > { %v2739_v1 = vpack.c.bf16 %v1258_v50, %v1257_v47  ;;  %v1068_v60 = vpop.xlane.xlu0 %1067  ;;  %v1240_v62 = vadd.f32 %v2675_v32, %v1217_v53  ;;  %v1218_v0 = vmul.f32 %v2667_v37, %v1195_v51  ;;  %v1151_v20 = vsub.f32 %v2603_v52, %v2719_v26 }
 0x308   : > { %2008 = vrsqrt.f32 %v1166_v55  ;;  %v1167_v10 = vadd.f32 1e-05, %v1135_v31  ;;  %v1088_v35 = vmul.f32 0.03125, %v1068_v60  ;;  %v1105_v6 = vmul.f32 %v2743_v23, %v2743_v23 }
 0x309   : > { %1285 = vst [vmem:[%s2708_s19 + $0x8] sm:$0xff] %v2739_v1  ;;  %v1070_v8 = vpop.xlane.xlu1 %1069  ;;  %v1260_v11 = vmax.f32 %v1240_v62, %v2690_v29  ;;  %v1241_v22 = vadd.f32 %v2675_v32, %v1218_v0 }
 0x30a   : > { %v2005_v9 = vpop.eup %2004  ;;  %2010 = vrsqrt.f32 %v1167_v10  ;;  %v1120_v16 = vsub.f32 %v1088_v35, %v1104_v56  ;;  %v1089_v17 = vmul.f32 0.03125, %v1070_v8 }
 0x30b   : > { %v1196_v19 = vmul.f32 %v2005_v9, %v1148_v2  ;;  %v1008_v13 = vpop.xlane.xlu0 %1007  ;;  %v2757_v12 = vpack.c.bf16 %v1260_v11, %v1259_v63  ;;  %v1261_v38 = vmax.f32 %v1241_v22, %v2690_v29 }
 0x30c   : > { %v2007_v42 = vpop.eup %2006  ;;  %v1136_v40 = vmax.f32 %v1120_v16, 0.0  ;;  %v1121_v33 = vsub.f32 %v1089_v17, %v1105_v6  ;;  %v2759_v21 = vmul.f32 0.03125, %v1008_v13  ;;  %v1152_v16 = vsub.f32 %v2612_v58, %v2733_v46 }
 0x30d   : > { %v1219_v14 = vmul.f32 %v2667_v37, %v1196_v19  ;;  %v1197_v45 = vmul.f32 %v2007_v42, %v1149_v18  ;;  %v1010_v25 = vpop.xlane.xlu1 %1009  ;;  %1286 = vst [vmem:[%s2708_s19 + $0x10] sm:$0xff] %v2757_v12  ;;  %v1153_v13 = vsub.f32 %v2615_v61, %v2743_v23 }
 0x30e   : > { %v1168_v27 = vadd.f32 1e-05, %v1136_v40  ;;  %v1137_v57 = vmax.f32 %v1121_v33, 0.0  ;;  %v2766_v41 = vmul.f32 0.03125, %v1010_v25  ;;  %v1106_v34 = vmul.f32 %v2759_v21, %v2759_v21 }
 0x30f   : > { %v1242_v43 = vadd.f32 %v2675_v32, %v1219_v14  ;;  %v1072_v28 = vpop.xlane.xlu0 %1071  ;;  %v1220_v15 = vmul.f32 %v2667_v37, %v1197_v45  ;;  %v1154_v23 = vsub.f32 %v2624_v3, %v2759_v21 }
 0x310   : > { %2012 = vrsqrt.f32 %v1168_v27  ;;  %v1169_v30 = vadd.f32 1e-05, %v1137_v57  ;;  %v1090_v36 = vmul.f32 0.03125, %v1072_v28  ;;  %v1107_v47 = vmul.f32 %v2766_v41, %v2766_v41 }
 0x311   : > { %v1262_v39 = vmax.f32 %v1242_v43, %v2690_v29  ;;  %v1074_v59 = vpop.xlane.xlu1 %1073  ;;  %v1243_v49 = vadd.f32 %v2675_v32, %v1220_v15  ;;  %v1155_v28 = vsub.f32 %v2627_v4, %v2766_v41 }
 0x312   : > { %v2009_v44 = vpop.eup %2008  ;;  %2014 = vrsqrt.f32 %v1169_v30  ;;  %v1122_v48 = vsub.f32 %v1090_v36, %v1106_v34  ;;  %v1091_v50 = vmul.f32 0.03125, %v1074_v59 }
 0x313   : > { %v2777_v51 = vpack.c.bf16 %v1262_v39, %v1261_v38  ;;  %v1198_v53 = vmul.f32 %v2009_v44, %v1150_v24  ;;  %v1012_v55 = vpop.xlane.xlu0 %1011  ;;  %v1263_v8 = vmax.f32 %v1243_v49, %v2690_v29 }
 0x314   : > { %v2011_v31 = vpop.eup %2010  ;;  %v1138_v56 = vmax.f32 %v1122_v48, 0.0  ;;  %v1123_v60 = vsub.f32 %v1091_v50, %v1107_v47  ;;  %v1028_v62 = vmul.f32 0.03125, %v1012_v55 }
 0x315   : > { %1287 = vst [vmem:[%s2708_s19 + $0x18] sm:$0xff] %v2777_v51  ;;  %v1221_v5 = vmul.f32 %v2667_v37, %v1198_v53  ;;  %v1199_v10 = vmul.f32 %v2011_v31, %v1151_v20  ;;  %v2027_v31 = vld [vmem:[%s2907_s7 + $0x28] sm:$0xff] (!%p1678_p11)  }
 0x316   : > { %v1170_v35 = vadd.f32 1e-05, %v1138_v56  ;;  %v1139_v63 = vmax.f32 %v1123_v60, 0.0  ;;  %v1108_v26 = vmul.f32 %v1028_v62, %v1028_v62  ;;  %v1156_v4 = vsub.f32 %v2636_v7, %v1028_v62  ;;  %v2022_v7 = vld [vmem:[%s2907_s7] sm:$0xff] (!%p1678_p11)   ;;  %v2028_v56 = vld [vmem:[%s2907_s7 + $0x30] sm:$0xff] (!%p1678_p11)   ;;  %v2029_v60 = vld [vmem:[%s2907_s7 + $0x38] sm:$0xff] (!%p1678_p11)  }
 0x317   : > { %v1244_v0 = vadd.f32 %v2675_v32, %v1221_v5  ;;  %v1076_v2 = vpop.xlane.xlu0 %1075  ;;  %v1222_v11 = vmul.f32 %v2667_v37, %v1199_v10  ;;  %1823 = vmatprep.subr.bf16.mxu0 (!%p1678_p11), %v2022_v7  ;;  %1871 = vmatprep.subr.bf16.mxu1 (!%p1678_p11), %v2022_v7  ;;  %v1679_v62 = vld [vmem:[%s2908_s8] ss:$0 sm:$0xff] (!%p1678_p11) }
 0x318   : > { %2016 = vrsqrt.f32 %v1170_v35  ;;  %v1171_v52 = vadd.f32 1e-05, %v1139_v63  ;;  %v1092_v6 = vmul.f32 0.03125, %v1076_v2  ;;  %1824 = vmatpush3.bf16.msra.mxu0 (!%p1678_p11), %v2022_v7  ;;  %1879 = vmatpush3.bf16.msra.mxu1 (!%p1678_p11), %v2022_v7 }
 0x319   : > { %v1264_v9 = vmax.f32 %v1244_v0, %v2690_v29  ;;  %v1245_v22 = vadd.f32 %v2675_v32, %v1222_v11 }
 0x31a   : > { %v2013_v17 = vpop.eup %2012  ;;  %2018 = vrsqrt.f32 %v1171_v52  ;;  %v1124_v18 = vsub.f32 %v1092_v6, %v1108_v26 }
 0x31b   : > { %v1275_v19 = vpack.c.bf16 %v1264_v9, %v1263_v8  ;;  %v1200_v42 = vmul.f32 %v2013_v17, %v1152_v16  ;;  %v1265_v46 = vmax.f32 %v1245_v22, %v2690_v29 }
 0x31c   : > { %v2015_v40 = vpop.eup %2014  ;;  %v1140_v33 = vmax.f32 %v1124_v18, 0.0 }
 0x31d   : > { %1288 = vst [vmem:[%s2708_s19 + $0x20] sm:$0xff] %v1275_v19  ;;  %v1223_v14 = vmul.f32 %v2667_v37, %v1200_v42  ;;  %v1201_v45 = vmul.f32 %v2015_v40, %v1153_v13  ;;  %1847 = vmatprep.mubr.bf16.mxu1 (!%p1678_p11), %v1275_v19 }
 0x31e   : > { %v1172_v25 = vadd.f32 1e-05, %v1140_v33 }
 0x31f   : > { %v1246_v58 = vadd.f32 %v2675_v32, %v1223_v14  ;;  %v1224_v61 = vmul.f32 %v2667_v37, %v1201_v45 }
 0x320   : > { %2020 = vrsqrt.f32 %v1172_v25 }
 0x321   : > { %v1266_v27 = vmax.f32 %v1246_v58, %v2690_v29  ;;  %v1247_v36 = vadd.f32 %v2675_v32, %v1224_v61 }
 0x322   : > { %v2017_v57 = vpop.eup %2016 }
 0x323   : > { %v2802_v43 = vpack.c.bf16 %v1266_v27, %v1265_v46  ;;  %v1202_v30 = vmul.f32 %v2017_v57, %v1154_v23  ;;  %v1267_v3 = vmax.f32 %v1247_v36, %v2690_v29 }
 0x324   : > { %v2019_v34 = vpop.eup %2018 }
 0x325   : > { %1289 = vst [vmem:[%s2708_s19 + $0x28] sm:$0xff] %v2802_v43  ;;  %v1225_v38 = vmul.f32 %v2667_v37, %v1202_v30  ;;  %v1203_v39 = vmul.f32 %v2019_v34, %v1155_v28 }
 0x327   : > { %v1248_v15 = vadd.f32 %v2675_v32, %v1225_v38  ;;  %v1226_v24 = vmul.f32 %v2667_v37, %v1203_v39 }
 0x329   : > { %v1268_v21 = vmax.f32 %v1248_v15, %v2690_v29  ;;  %v1249_v47 = vadd.f32 %v2675_v32, %v1226_v24 }
 0x32a   : > { %v2021_v41 = vpop.eup %2020 }
 0x32b   : > { %v1277_v59 = vpack.c.bf16 %v1268_v21, %v1267_v3  ;;  %v1204_v44 = vmul.f32 %v2021_v41, %v1156_v4  ;;  %v1269_v20 = vmax.f32 %v1249_v47, %v2690_v29 }
 0x32d   : > { %1290 = vst [vmem:[%s2708_s19 + $0x30] sm:$0xff] %v1277_v59  ;;  %v1227_v48 = vmul.f32 %v2667_v37, %v1204_v44  ;;  %v2023_v37 = vld [vmem:[%s2907_s7 + $0x8] sm:$0xff] (!%p1678_p11)  }
 0x32e   : > { %1825 = vmatprep.subr.bf16.mxu0 (!%p1678_p11), %v2023_v37  ;;  %1872 = vmatprep.subr.bf16.mxu1 (!%p1678_p11), %v2023_v37 }
 0x32f   : > { %v1250_v50 = vadd.f32 %v2675_v32, %v1227_v48  ;;  %1295 = sbr.rel (%p1678_p11) target bundleno = 1068 (0x42c), region = 102  ;;  %v2024_v32 = vld [vmem:[%s2907_s7 + $0x10] sm:$0xff] (!%p1678_p11)   ;;  %1826 = vmatpush3.bf16.msra.mxu0 (!%p1678_p11), %v2023_v37  ;;  %1880 = vmatpush3.bf16.msra.mxu1 (!%p1678_p11), %v2023_v37 }
 0x330   : > { %1827 = vmatprep.subr.bf16.mxu0 (!%p1678_p11), %v2024_v32  ;;  %1873 = vmatprep.subr.bf16.mxu1 (!%p1678_p11), %v2024_v32 }
 0x331   : > { %v1270_v53 = vmax.f32 %v1250_v50, %v2690_v29  ;;  %v2025_v29 = vld [vmem:[%s2907_s7 + $0x18] sm:$0xff] (!%p1678_p11)  }
 0x333   : > { %v1278_v55 = vpack.c.bf16 %v1270_v53, %v1269_v20  ;;  %1828 = vmatpush3.bf16.msra.mxu0 (!%p1678_p11), %v2024_v32  ;;  %1881 = vmatpush3.bf16.msra.mxu1 (!%p1678_p11), %v2024_v32 }
 0x334   : > { %1829 = vmatprep.subr.bf16.mxu0 (!%p1678_p11), %v2025_v29  ;;  %1874 = vmatprep.subr.bf16.mxu1 (!%p1678_p11), %v2025_v29 }
 0x335   : > { %1291 = vst [vmem:[%s2708_s19 + $0x38] sm:$0xff] %v1278_v55 }
 0x337   : > { %1830 = vmatpush3.bf16.msra.mxu0 %v2025_v29  ;;  %1882 = vmatpush3.bf16.msra.mxu1 %v2025_v29 }
 0x338   : > { %1831 = vmatprep.subr.bf16.mxu0 %v2026_v54  ;;  %1875 = vmatprep.subr.bf16.mxu1 %v2026_v54 }
 0x33b   : > { %1832 = vmatpush3.bf16.msra.mxu0 %v2026_v54  ;;  %1883 = vmatpush3.bf16.msra.mxu1 %v2026_v54 }
 0x33c   : > { %1833 = vmatprep.subr.bf16.mxu0 %v2027_v31  ;;  %1876 = vmatprep.subr.bf16.mxu1 %v2027_v31 }
 0x33f   : > { %1834 = vmatpush3.bf16.msra.mxu0 %v2027_v31  ;;  %1884 = vmatpush3.bf16.msra.mxu1 %v2027_v31 }
 0x340   : > { %1835 = vmatprep.subr.bf16.mxu0 %v2028_v56  ;;  %1877 = vmatprep.subr.bf16.mxu1 %v2028_v56 }
 0x343   : > { %1836 = vmatpush3.bf16.msra.mxu0 %v2028_v56  ;;  %1885 = vmatpush3.bf16.msra.mxu1 %v2028_v56 }
 0x344   : > { %1837 = vmatprep.subr.bf16.mxu0 %v2029_v60  ;;  %1878 = vmatprep.subr.bf16.mxu1 %v2029_v60 }
 0x347   : > { %1838 = vmatpush3.bf16.msra.mxu0 %v2029_v60  ;;  %1886 = vmatpush3.bf16.msra.mxu1 %v2029_v60 }
 0x34a   : > { %1840 = vmatmul.mubr.bf16.vlgmr.msra.gmra.mrb[0].mxu0 %v2739_v1  ;;  %1848 = vmatmul.mubr.bf16.vlgmr.msra.gmra.mrb[0].mxu1 %v2802_v43 }
 0x34b   : > { %1843 = vmatprep.mubr.bf16.mxu0 %v2757_v12  ;;  %1851 = vmatprep.mubr.bf16.mxu1 %v1277_v59 }
 0x352   : > { %1844 = vmatmul.mubr.bf16.gmra.mrb[4].mxu0 %v2777_v51  ;;  %1852 = vmatmul.mubr.bf16.gmra.mrb[4].mxu1 %v1278_v55 }
 0x41d   : > { %v1841_v49 = vpop.f32.mrb[0].mxu0  ;;  %v1849_v5 = vpop.f32.mrb[0].mxu1 }
 0x41e   : > { %v1410_v10 = vadd.f32 %v1841_v49, %v1679_v62  ;;  %v1442_v35 = vadd.f32 %v1849_v5, %v1679_v62  ;;  %v1401_v63 = vpop.f32.mrb[1].mxu0  ;;  %v1433_v0 = vpop.f32.mrb[1].mxu1 }
 0x41f   : > { %v1402_v2 = vadd.f32 %v1679_v62, %v1401_v63  ;;  %v1434_v1 = vadd.f32 %v1679_v62, %v1433_v0  ;;  %v1842_v52 = vpop.f32.mrb[2].mxu0  ;;  %v1850_v26 = vpop.f32.mrb[2].mxu1 }
 0x420   : > { %1466 = vst [vmem:[#allocation9 + $0x10] sm:$0xff] %v1410_v10  ;;  %1474 = vst [vmem:[#allocation9 + $0x50] sm:$0xff] %v1442_v35  ;;  %v1413_v12 = vadd.f32 %v1842_v52, %v1679_v62  ;;  %v1445_v6 = vadd.f32 %v1850_v26, %v1679_v62  ;;  %v1404_v51 = vpop.f32.mrb[3].mxu0  ;;  %v1436_v8 = vpop.f32.mrb[3].mxu1 }
 0x421   : > { %1464 = vst [vmem:[#allocation9] sm:$0xff] %v1402_v2  ;;  %1472 = vst [vmem:[#allocation9 + $0x40] sm:$0xff] %v1434_v1  ;;  %v1405_v9 = vadd.f32 %v1679_v62, %v1404_v51  ;;  %v1437_v11 = vadd.f32 %v1679_v62, %v1436_v8 }
 0x422   : > { %1467 = vst [vmem:[#allocation9 + $0x18] sm:$0xff] %v1413_v12  ;;  %1475 = vst [vmem:[#allocation9 + $0x58] sm:$0xff] %v1445_v6 }
 0x423   : > { %1465 = vst [vmem:[#allocation9 + $0x8] sm:$0xff] %v1405_v9  ;;  %1473 = vst [vmem:[#allocation9 + $0x48] sm:$0xff] %v1437_v11 }
 0x425   : > { %v1845_v16 = vpop.f32.mrb[4].mxu0  ;;  %v1853_v17 = vpop.f32.mrb[4].mxu1 }
 0x426   : > { %v1426_v18 = vadd.f32 %v1845_v16, %v1679_v62  ;;  %v1458_v19 = vadd.f32 %v1853_v17, %v1679_v62  ;;  %v1417_v13 = vpop.f32.mrb[5].mxu0  ;;  %v1449_v42 = vpop.f32.mrb[5].mxu1 }
 0x427   : > { %v1418_v40 = vadd.f32 %v1679_v62, %v1417_v13  ;;  %v1450_v33 = vadd.f32 %v1679_v62, %v1449_v42  ;;  %v1846_v22 = vpop.f32.mrb[6].mxu0  ;;  %v1854_v14 = vpop.f32.mrb[6].mxu1 }
 0x428   : > { %1470 = vst [vmem:[#allocation9 + $0x30] sm:$0xff] %v1426_v18  ;;  %1478 = vst [vmem:[#allocation9 + $0x70] sm:$0xff] %v1458_v19  ;;  %v1429_v45 = vadd.f32 %v1846_v22, %v1679_v62  ;;  %v1461_v25 = vadd.f32 %v1854_v14, %v1679_v62  ;;  %v1420_v58 = vpop.f32.mrb[7].mxu0  ;;  %v1452_v46 = vpop.f32.mrb[7].mxu1 }
 0x429   : > { %1468 = vst [vmem:[#allocation9 + $0x20] sm:$0xff] %v1418_v40  ;;  %1476 = vst [vmem:[#allocation9 + $0x60] sm:$0xff] %v1450_v33  ;;  %v1421_v27 = vadd.f32 %v1679_v62, %v1420_v58  ;;  %v1453_v61 = vadd.f32 %v1679_v62, %v1452_v46 }
 0x42a   : > { %1471 = vst [vmem:[#allocation9 + $0x38] sm:$0xff] %v1429_v45  ;;  %1479 = vst [vmem:[#allocation9 + $0x78] sm:$0xff] %v1461_v25 }
 0x42b   : > { %1469 = vst [vmem:[#allocation9 + $0x28] sm:$0xff] %v1421_v27  ;;  %1477 = vst [vmem:[#allocation9 + $0x68] sm:$0xff] %v1453_v61 }
 0x42c PF: > { %s2928_s0 = sadd.s32 4294967295, %s2174_s14   ;;  %s2183_s28 = smov [#allocation9]  }
 0x42d   : > { %p2857_p13 = scmp.eq.s32.totalorder %s2928_s0, 2  ;;  %s1496_s30 = sshll.u32 %s2183_s28, 4  ;;  %s1497_s30 = int_to_ptr.vmem [resolvable:$true] %s1496_s30 }
 0x42e   : > { %s2088_s12 = scalar_lea.vmem %s1497_s30, 2048  ;;  %s2094_s22 = scalar_lea.vmem %s1497_s30, 4096 }
 0x42f   : > { %p2089_p2 = scmp.ne.s32.totalorder %s1497_s30, %s2088_s12  ;;  %p2095_p0 = scmp.lt.s32.totalorder %s1497_s30, %s1497_s30 }
 0x430   : > { %p2096_p6 = scmp.lt.s32.totalorder %s2094_s22, %s2088_s12 }
 0x431   : > { %p2090_p3 = pnand %p2089_p2, %p2857_p13 }
 0x432   : > { %p2097_p7 = por %p2096_p6, %p2095_p0 }
 0x433   : > { %p2091_p12 = pneg %p2090_p3 }
 0x435   : > { %p2098_p1 = pnand %p2097_p7, %p2091_p12 }
 0x437   : > { %2101 = shalt.err (!%p2098_p1)
}
 0x438   : > { %s2102_s27 = scalar_lea.hbm %s2909_s9, 2048 }
 0x439   : > { %p2103_p4 = scmp.ne.s32.totalorder %s2909_s9, %s2102_s27  ;;  %p2108_p9 = scmp.lt.u32.totalorder %s2102_s27, %s2909_s9 }
 0x43b   : > { %p2104_p5 = pnand %p2103_p4, %p2857_p13 }
 0x43d   : > { %p2105_p8 = pneg %p2104_p5 }
 0x43f   : > { %p2110_p10 = pnand %p2108_p9, %p2105_p8 }
 0x441   : > { %2113 = shalt.err (!%p2110_p10)
}
 0x442   : > { %s2184_s24 = smov 128   ;;  %s2185_s17 = smov 8  }
 0x443   : > { %1894 = dma.vmem_to_hbm [thread:$0]  (%p2857_p13), %s1497_s30, 2048, %s2909_s9, [#allocation6], %s2184_s24, %s2184_s24, %s2185_s17  }
 0x444 PF: > { %p1913_p11 = scmp.ge.s32.totalorder %s2174_s14, 2  ;;  %s2930_s0 = sadd.s32 4294967294, %s2174_s14  }
 0x445   : > { %p1914_p2 = scmp.eq.s32.totalorder %s2930_s0, 2 }
 0x447   : > { %p1906_p3 = pnand %p1914_p2, %p1913_p11 }
 0x449   : > { %2149 = dma.done.wait (!%p1906_p3), [#allocation6], 2048  }
 0x44a   : > { %2151 = vsyncadd (!%p1906_p3), [#allocation6], 4294965248  ;;  %s26_s14 = sadd.s32 1, %s2174_s14   ;;  %s2931_s30 = smov %s2158_s10 }
 0x44b   : > { %p23_p12 = scmp.ge.s32.totalorder %s26_s14, 5   ;;  %s2932_s10 = smov %s2162_s11 }
 0x44c   : > { %s2933_s11 = smov %s2322_s16  ;;  %s2934_s12 = smov %s2170_s13 }
 0x44d   : > { %s2935_s13 = smov %s2937_s26  ;;  %25 = sbr.rel (!%p23_p12) target bundleno = 10 (0xa), region = 163 }
 0x454   :  { %1517 = vsyncpa [#allocation5], 1 }
 0x455   :  { %1519 = vsyncpa [#allocation5 + $0x1], 1 }
 0x456   :  { %1520 = vsyncpa [#allocation8], 1 }
 0x457   :  { %1522 = vsyncpa [#allocation8 + $0x1], 1 }
 0x458   :  { %1523 = vsyncpa [#allocation6], 1 }
 0x459   :  { %1525 = vsyncpa [#allocation6 + $0x1], 1 }
 0x45a   :  { %1526 = vsyncmov [#allocation3] }
 0x45d   :  { %s1527_s23 = vpop.sfrf %1526 }
 0x45e   :  { %p1692_p13 = scmp.ne.s32.totalorder %s1527_s23, 0 }
 0x460   :  { %1531 = shalt.err (%p1692_p13)  }

</bundles_post_ra>
